<compile_context>
chip_gen: v7x
topology: tpu7x:2x2x1
jax: 0.10.0
libtpu: 0.0.40
codegen_flags: <defaults>
</compile_context>

<pallas_src>
import functools

import jax
import jax.numpy as jnp
from jax.experimental import pallas as pl
from jax.experimental.pallas import tpu as pltpu


# ---------------------------------------------------------------------------
# Glue: stride-2 5x5 conv  ==  stride-1 3x3 conv on a space-to-depth(2) input
# ---------------------------------------------------------------------------
def _space_to_depth2(x):
    """(N,H,W,C) -> (N, ceil(H/2), ceil(W/2), 4*C); channel order (dh, dw, c).

    Zero-pads odd H/W; the padded rows/cols only ever meet zero taps in the
    rearranged weights, so the result is exact.
    """
    n, h, w, c = x.shape
    hp, wp = h + (h & 1), w + (w & 1)
    if (hp, wp) != (h, w):
        x = jnp.pad(x, ((0, 0), (0, hp - h), (0, wp - w), (0, 0)))
    x = x.reshape(n, hp // 2, 2, wp // 2, 2, c)
    x = jnp.transpose(x, (0, 1, 3, 2, 4, 5))
    return x.reshape(n, hp // 2, wp // 2, 4 * c)


def _s2d_conv_weights(w):
    """(5,5,Cin,Cout) -> (9, 4*Cin, Cout) taps of the equivalent 3x3 stride-1 conv.

    w'[3*ii+jj, (a*2+b)*Cin + c, o] = w[2*ii+a, 2*jj+b, c, o]   (0 where index > 4)
    """
    kh, kw, cin, cout = w.shape
    assert kh == 5 and kw == 5
    wp = jnp.pad(w, ((0, 1), (0, 1), (0, 0), (0, 0)))     # (6,6,Cin,Cout)
    wp = wp.reshape(3, 2, 3, 2, cin, cout)                # (ii, a, jj, b, c, o)
    wp = jnp.transpose(wp, (0, 2, 1, 3, 4, 5))            # (ii, jj, a, b, c, o)
    return wp.reshape(9, 4 * cin, cout)


# ---------------------------------------------------------------------------
# Pallas kernel 1: fused conv5x5/stride2 + bias + ReLU (one output row / step)
# ---------------------------------------------------------------------------
def _conv5x5s2_kernel(x_ref, w_ref, b_ref, o_ref):
    """Grid = (batch, OH); computes one full output row.

    x_ref: (1, OH+2, OW+2, 4*Cin)  bf16  space-to-depth image (resident per batch idx)
    w_ref: (9, 4*Cin, Cout)        bf16  rearranged taps (resident)
    b_ref: (1, Cout)               f32
    o_ref: (1, 1, OW, Cout)        output row
    """
    p = pl.program_id(1)
    ow = o_ref.shape[2]
    cout = o_ref.shape[3]

    acc = jnp.zeros((ow, cout), jnp.float32)
    for t in range(9):                                    # unrolled 9-tap K-reduction
        ii, jj = divmod(t, 3)
        # (1, OW, 4*Cin) static/contiguous window -> (OW, 4*Cin), bf16 MXU operand.
        patch = x_ref[0, pl.ds(p + ii, 1), pl.ds(jj, ow), :][0]
        acc = acc + jnp.dot(patch, w_ref[t], preferred_element_type=jnp.float32)

    y = jnp.maximum(acc + b_ref[...], 0.0)                # bias + ReLU in f32
    o_ref[0, 0] = y.astype(o_ref.dtype)


def conv5x5s2_relu(x, w, b):
    """x: (N,H,W,Cin) float, w: (5,5,Cin,Cout) f32, b: (Cout,) f32.
    VALID padding, stride 2, fused ReLU. Returns bf16 (N, OH, OW, Cout)."""
    n, h, wd, cin = x.shape
    kh, kw, cin2, cout = w.shape
    assert (kh, kw) == (5, 5) and cin2 == cin
    oh = (h - 5) // 2 + 1
    ow = (wd - 5) // 2 + 1

    xs = _space_to_depth2(x.astype(jnp.bfloat16))         # (N, OH+2, OW+2, 4*Cin)
    ws = _s2d_conv_weights(w).astype(jnp.bfloat16)        # (9, 4*Cin, Cout)
    b2 = b.reshape(1, cout).astype(jnp.float32)
    hs, wss, k4 = xs.shape[1], xs.shape[2], xs.shape[3]
    assert hs == oh + 2 and wss == ow + 2

    return pl.pallas_call(
        _conv5x5s2_kernel,
        out_shape=jax.ShapeDtypeStruct((n, oh, ow, cout), jnp.bfloat16),
        grid=(n, oh),
        in_specs=[
            # whole (tiny) s2d image, resident across the OH axis
            pl.BlockSpec((1, hs, wss, k4), lambda i, p: (i, 0, 0, 0)),
            pl.BlockSpec((9, k4, cout), lambda i, p: (0, 0, 0)),
            pl.BlockSpec((1, cout), lambda i, p: (0, 0)),
        ],
        out_specs=pl.BlockSpec((1, 1, ow, cout), lambda i, p: (i, p, 0, 0)),
        compiler_params=pltpu.CompilerParams(
            dimension_semantics=("parallel", "parallel")),   # both axes shard on v7x
    )(xs, ws, b2)


# ---------------------------------------------------------------------------
# Pallas kernel 2: linear (+ optional ReLU), bf16 MXU, f32 accumulate, no padding
# ---------------------------------------------------------------------------
def _linear_kernel(x_ref, w_ref, b_ref, o_ref, *, relu):
    y = jnp.dot(x_ref[...], w_ref[...], preferred_element_type=jnp.float32)
    y = y + b_ref[...]
    if relu:
        y = jnp.maximum(y, 0.0)
    o_ref[...] = y.astype(o_ref.dtype)


def pallas_linear(x, w, b, *, relu, out_dtype=jnp.float32):
    """out = act(x @ w + b). x:(M,K), w:(K,N), b:(N,).

    M (=batch) and small/ragged N are full-array block dims (no M/N padding or
    output slicing); N is tiled (tn=256) when it divides evenly so both v7x
    TensorCores get work. K is kept whole (small here) so no accumulator needed.
    """
    M, K = x.shape
    K2, N = w.shape
    assert K == K2 and b.shape == (N,)

    xb = x.astype(jnp.bfloat16)
    wb = w.astype(jnp.bfloat16)
    b2 = b.reshape(1, N).astype(jnp.float32)

    if N % 256 == 0:
        tn = 256                  # full 256-wide MXU pass on v6e/v7x; fine on v5e
    elif N % 128 == 0:
        tn = 128
    else:
        tn = N                    # small ragged N (e.g. 10 logits): single block
    grid = (N // tn,)

    return pl.pallas_call(
        functools.partial(_linear_kernel, relu=relu),
        out_shape=jax.ShapeDtypeStruct((M, N), out_dtype),
        grid=grid,
        in_specs=[
            pl.BlockSpec((M, K), lambda j: (0, 0)),     # x resident across N tiles
            pl.BlockSpec((K, tn), lambda j: (0, j)),
            pl.BlockSpec((1, tn), lambda j: (0, j)),
        ],
        out_specs=pl.BlockSpec((M, tn), lambda j: (0, j)),
        compiler_params=pltpu.CompilerParams(dimension_semantics=("parallel",)),
    )(xb, wb, b2)


# ---------------------------------------------------------------------------
# Full module forward (width=50 -> hidden_out=576)
# ---------------------------------------------------------------------------
def init_params(key, in_size, out_size, width=50):
    assert width == 50, "demo uses width=50 -> hidden_out=576"
    hidden_out = 576

    def dense_init(k, fan_in, shape):
        return jax.random.normal(k, shape, jnp.float32) / jnp.sqrt(fan_in)

    ks = jax.random.split(key, 10)
    return {
        "conv1_w": dense_init(ks[0], 5 * 5 * in_size, (5, 5, in_size, 16)),
        "conv1_b": jnp.zeros((16,), jnp.float32),
        "conv2_w": dense_init(ks[1], 5 * 5 * 16, (5, 5, 16, 32)),
        "conv2_b": jnp.zeros((32,), jnp.float32),
        "conv3_w": dense_init(ks[2], 5 * 5 * 32, (5, 5, 32, 64)),
        "conv3_b": jnp.zeros((64,), jnp.float32),
        "fc1_w": dense_init(ks[3], hidden_out, (hidden_out, 1024)),
        "fc1_b": jnp.zeros((1024,), jnp.float32),
        "fc2_w": dense_init(ks[4], 1024, (1024, out_size)),
        "fc2_b": jnp.zeros((out_size,), jnp.float32),
    }


def conv2d_module_forward(params, x_nchw):
    # Accept NCHW (PyTorch convention), run kernels in NHWC.
    x = jnp.transpose(x_nchw, (0, 2, 3, 1))

    x = conv5x5s2_relu(x, params["conv1_w"], params["conv1_b"])
    x = conv5x5s2_relu(x, params["conv2_w"], params["conv2_b"])
    x = conv5x5s2_relu(x, params["conv3_w"], params["conv3_b"])

    # Match torch's x.view(N, -1) on NCHW tensors: flatten in (C, H, W) order.
    n = x.shape[0]
    x = jnp.transpose(x, (0, 3, 1, 2)).reshape(n, -1)     # (N, 576) bf16

    # TODO(synk): dropout layers are identity here (inference / eval mode).
    x = pallas_linear(x, params["fc1_w"], params["fc1_b"], relu=True,
                      out_dtype=jnp.bfloat16)
    x = pallas_linear(x, params["fc2_w"], params["fc2_b"], relu=False,
                      out_dtype=jnp.float32)
    return x


# ---------------------------------------------------------------------------
# Pure-JAX reference with matching bf16-operand / f32-accumulate precision
# ---------------------------------------------------------------------------
def reference_forward(params, x_nchw):
    x = jnp.transpose(x_nchw, (0, 2, 3, 1))

    def conv(x, w, b):
        y = jax.lax.conv_general_dilated(
            x.astype(jnp.bfloat16), w.astype(jnp.bfloat16),
            window_strides=(2, 2), padding="VALID",
            dimension_numbers=("NHWC", "HWIO", "NHWC"),
            preferred_element_type=jnp.float32)
        return jnp.maximum(y + b, 0.0).astype(jnp.bfloat16)

    x = conv(x, params["conv1_w"], params["conv1_b"])
    x = conv(x, params["conv2_w"], params["conv2_b"])
    x = conv(x, params["conv3_w"], params["conv3_b"])
    n = x.shape[0]
    x = jnp.transpose(x, (0, 3, 1, 2)).reshape(n, -1)
    h = jnp.dot(x, params["fc1_w"].astype(jnp.bfloat16),
                preferred_element_type=jnp.float32) + params["fc1_b"]
    h = jnp.maximum(h, 0.0).astype(jnp.bfloat16)
    return jnp.dot(h, params["fc2_w"].astype(jnp.bfloat16),
                   preferred_element_type=jnp.float32) + params["fc2_b"]


if __name__ == "__main__":
    key = jax.random.PRNGKey(0)
    k_params, k_x = jax.random.split(key)

    in_size, out_size, width = 3, 10, 50      # width=50 -> hidden_out=576
    batch = 2

    params = init_params(k_params, in_size, out_size, width=width)
    x = jax.random.normal(k_x, (batch, in_size, width, width), jnp.float32)

    fwd = jax.jit(conv2d_module_forward)
    out = jax.block_until_ready(fwd(params, x))

    assert out.shape == (batch, out_size), out.shape
    assert bool(jnp.all(jnp.isfinite(out)))

    ref = reference_forward(params, x)
    max_abs = float(jnp.max(jnp.abs(out - ref)))
    assert max_abs < 1e-1, f"mismatch vs XLA reference: {max_abs}"

    print("KERNEL_OK")
</pallas_src>

<mosaic_0001>
module attributes {stable_mosaic.version = 11 : i64} {
  func.func @_conv5x5s2_kernel(%arg0: i32, %arg1: i32, %arg2: memref<1x25x25x12xbf16, #tpu.memory_space<vmem>>, %arg3: memref<9x12x16xbf16, #tpu.memory_space<vmem>>, %arg4: memref<1x16xf32, #tpu.memory_space<vmem>>, %arg5: memref<1x1x23x16xbf16, #tpu.memory_space<vmem>>) attributes {dimension_semantics = [#tpu.dimension_semantics<parallel>, #tpu.dimension_semantics<parallel>], iteration_bounds = array<i64: 2, 23>, scalar_prefetch = 0 : i64, scratch_operands = 0 : i64, tpu.core_type = #tpu.core_type<tc>, window_params = [{transform_indices = @transform_0, window_bounds = array<i64: 1, 25, 25, 12>}, {pipeline_mode = #tpu.pipeline_mode<synchronous>, transform_indices = @transform_1, window_bounds = array<i64: 9, 12, 16>}, {pipeline_mode = #tpu.pipeline_mode<synchronous>, transform_indices = @transform_2, window_bounds = array<i64: 1, 16>}, {transform_indices = @transform_3, window_bounds = array<i64: 1, 1, 23, 16>}]} {
    %cst = arith.constant 0.000000e+00 : f32
    %0 = vector.broadcast %cst : f32 to vector<23x16xf32>
    %c0_i32 = arith.constant 0 : i32
    %1 = arith.addi %arg1, %c0_i32 : i32
    %c0 = arith.constant 0 : index
    %2 = arith.index_cast %1 : i32 to index
    %c0_0 = arith.constant 0 : index
    %c0_1 = arith.constant 0 : index
    %3 = vector.load %arg2[%c0, %2, %c0_0, %c0_1] : memref<1x25x25x12xbf16, #tpu.memory_space<vmem>>, vector<1x1x23x12xbf16>
    %4 = vector.shape_cast %3 : vector<1x1x23x12xbf16> to vector<1x23x12xbf16>
    %5 = vector.shape_cast %4 : vector<1x23x12xbf16> to vector<23x12xbf16>
    %c0_2 = arith.constant 0 : index
    %c0_3 = arith.constant 0 : index
    %c0_4 = arith.constant 0 : index
    %6 = vector.load %arg3[%c0_2, %c0_3, %c0_4] : memref<9x12x16xbf16, #tpu.memory_space<vmem>>, vector<1x12x16xbf16>
    %7 = vector.shape_cast %6 : vector<1x12x16xbf16> to vector<12x16xbf16>
    %cst_5 = arith.constant dense<0.000000e+00> : vector<23x16xf32>
    %8 = tpu.matmul %5, %7, %cst_5 {dimension_numbers = #tpu.dot_dimension_numbers<[1], [0], [0], [1], [0, 0, 1, 1], [], []>} : vector<23x12xbf16>, vector<12x16xbf16>, vector<23x16xf32> -> vector<23x16xf32>
    %9 = arith.addf %0, %8 : vector<23x16xf32>
    %c0_i32_6 = arith.constant 0 : i32
    %10 = arith.addi %arg1, %c0_i32_6 : i32
    %c0_7 = arith.constant 0 : index
    %11 = arith.index_cast %10 : i32 to index
    %c1 = arith.constant 1 : index
    %c0_8 = arith.constant 0 : index
    %12 = vector.load %arg2[%c0_7, %11, %c1, %c0_8] : memref<1x25x25x12xbf16, #tpu.memory_space<vmem>>, vector<1x1x23x12xbf16>
    %13 = vector.shape_cast %12 : vector<1x1x23x12xbf16> to vector<1x23x12xbf16>
    %14 = vector.shape_cast %13 : vector<1x23x12xbf16> to vector<23x12xbf16>
    %c1_9 = arith.constant 1 : index
    %c0_10 = arith.constant 0 : index
    %c0_11 = arith.constant 0 : index
    %15 = vector.load %arg3[%c1_9, %c0_10, %c0_11] : memref<9x12x16xbf16, #tpu.memory_space<vmem>>, vector<1x12x16xbf16>
    %16 = vector.shape_cast %15 : vector<1x12x16xbf16> to vector<12x16xbf16>
    %cst_12 = arith.constant dense<0.000000e+00> : vector<23x16xf32>
    %17 = tpu.matmul %14, %16, %cst_12 {dimension_numbers = #tpu.dot_dimension_numbers<[1], [0], [0], [1], [0, 0, 1, 1], [], []>} : vector<23x12xbf16>, vector<12x16xbf16>, vector<23x16xf32> -> vector<23x16xf32>
    %18 = arith.addf %9, %17 : vector<23x16xf32>
    %c0_i32_13 = arith.constant 0 : i32
    %19 = arith.addi %arg1, %c0_i32_13 : i32
    %c0_14 = arith.constant 0 : index
    %20 = arith.index_cast %19 : i32 to index
    %c2 = arith.constant 2 : index
    %c0_15 = arith.constant 0 : index
    %21 = vector.load %arg2[%c0_14, %20, %c2, %c0_15] : memref<1x25x25x12xbf16, #tpu.memory_space<vmem>>, vector<1x1x23x12xbf16>
    %22 = vector.shape_cast %21 : vector<1x1x23x12xbf16> to vector<1x23x12xbf16>
    %23 = vector.shape_cast %22 : vector<1x23x12xbf16> to vector<23x12xbf16>
    %c2_16 = arith.constant 2 : index
    %c0_17 = arith.constant 0 : index
    %c0_18 = arith.constant 0 : index
    %24 = vector.load %arg3[%c2_16, %c0_17, %c0_18] : memref<9x12x16xbf16, #tpu.memory_space<vmem>>, vector<1x12x16xbf16>
    %25 = vector.shape_cast %24 : vector<1x12x16xbf16> to vector<12x16xbf16>
    %cst_19 = arith.constant dense<0.000000e+00> : vector<23x16xf32>
    %26 = tpu.matmul %23, %25, %cst_19 {dimension_numbers = #tpu.dot_dimension_numbers<[1], [0], [0], [1], [0, 0, 1, 1], [], []>} : vector<23x12xbf16>, vector<12x16xbf16>, vector<23x16xf32> -> vector<23x16xf32>
    %27 = arith.addf %18, %26 : vector<23x16xf32>
    %c1_i32 = arith.constant 1 : i32
    %28 = arith.addi %arg1, %c1_i32 : i32
    %c0_20 = arith.constant 0 : index
    %29 = arith.index_cast %28 : i32 to index
    %c0_21 = arith.constant 0 : index
    %c0_22 = arith.constant 0 : index
    %30 = vector.load %arg2[%c0_20, %29, %c0_21, %c0_22] : memref<1x25x25x12xbf16, #tpu.memory_space<vmem>>, vector<1x1x23x12xbf16>
    %31 = vector.shape_cast %30 : vector<1x1x23x12xbf16> to vector<1x23x12xbf16>
    %32 = vector.shape_cast %31 : vector<1x23x12xbf16> to vector<23x12xbf16>
    %c3 = arith.constant 3 : index
    %c0_23 = arith.constant 0 : index
    %c0_24 = arith.constant 0 : index
    %33 = vector.load %arg3[%c3, %c0_23, %c0_24] : memref<9x12x16xbf16, #tpu.memory_space<vmem>>, vector<1x12x16xbf16>
    %34 = vector.shape_cast %33 : vector<1x12x16xbf16> to vector<12x16xbf16>
    %cst_25 = arith.constant dense<0.000000e+00> : vector<23x16xf32>
    %35 = tpu.matmul %32, %34, %cst_25 {dimension_numbers = #tpu.dot_dimension_numbers<[1], [0], [0], [1], [0, 0, 1, 1], [], []>} : vector<23x12xbf16>, vector<12x16xbf16>, vector<23x16xf32> -> vector<23x16xf32>
    %36 = arith.addf %27, %35 : vector<23x16xf32>
    %c1_i32_26 = arith.constant 1 : i32
    %37 = arith.addi %arg1, %c1_i32_26 : i32
    %c0_27 = arith.constant 0 : index
    %38 = arith.index_cast %37 : i32 to index
    %c1_28 = arith.constant 1 : index
    %c0_29 = arith.constant 0 : index
    %39 = vector.load %arg2[%c0_27, %38, %c1_28, %c0_29] : memref<1x25x25x12xbf16, #tpu.memory_space<vmem>>, vector<1x1x23x12xbf16>
    %40 = vector.shape_cast %39 : vector<1x1x23x12xbf16> to vector<1x23x12xbf16>
    %41 = vector.shape_cast %40 : vector<1x23x12xbf16> to vector<23x12xbf16>
    %c4 = arith.constant 4 : index
    %c0_30 = arith.constant 0 : index
    %c0_31 = arith.constant 0 : index
    %42 = vector.load %arg3[%c4, %c0_30, %c0_31] : memref<9x12x16xbf16, #tpu.memory_space<vmem>>, vector<1x12x16xbf16>
    %43 = vector.shape_cast %42 : vector<1x12x16xbf16> to vector<12x16xbf16>
    %cst_32 = arith.constant dense<0.000000e+00> : vector<23x16xf32>
    %44 = tpu.matmul %41, %43, %cst_32 {dimension_numbers = #tpu.dot_dimension_numbers<[1], [0], [0], [1], [0, 0, 1, 1], [], []>} : vector<23x12xbf16>, vector<12x16xbf16>, vector<23x16xf32> -> vector<23x16xf32>
    %45 = arith.addf %36, %44 : vector<23x16xf32>
    %c1_i32_33 = arith.constant 1 : i32
    %46 = arith.addi %arg1, %c1_i32_33 : i32
    %c0_34 = arith.constant 0 : index
    %47 = arith.index_cast %46 : i32 to index
    %c2_35 = arith.constant 2 : index
    %c0_36 = arith.constant 0 : index
    %48 = vector.load %arg2[%c0_34, %47, %c2_35, %c0_36] : memref<1x25x25x12xbf16, #tpu.memory_space<vmem>>, vector<1x1x23x12xbf16>
    %49 = vector.shape_cast %48 : vector<1x1x23x12xbf16> to vector<1x23x12xbf16>
    %50 = vector.shape_cast %49 : vector<1x23x12xbf16> to vector<23x12xbf16>
    %c5 = arith.constant 5 : index
    %c0_37 = arith.constant 0 : index
    %c0_38 = arith.constant 0 : index
    %51 = vector.load %arg3[%c5, %c0_37, %c0_38] : memref<9x12x16xbf16, #tpu.memory_space<vmem>>, vector<1x12x16xbf16>
    %52 = vector.shape_cast %51 : vector<1x12x16xbf16> to vector<12x16xbf16>
    %cst_39 = arith.constant dense<0.000000e+00> : vector<23x16xf32>
    %53 = tpu.matmul %50, %52, %cst_39 {dimension_numbers = #tpu.dot_dimension_numbers<[1], [0], [0], [1], [0, 0, 1, 1], [], []>} : vector<23x12xbf16>, vector<12x16xbf16>, vector<23x16xf32> -> vector<23x16xf32>
    %54 = arith.addf %45, %53 : vector<23x16xf32>
    %c2_i32 = arith.constant 2 : i32
    %55 = arith.addi %arg1, %c2_i32 : i32
    %c0_40 = arith.constant 0 : index
    %56 = arith.index_cast %55 : i32 to index
    %c0_41 = arith.constant 0 : index
    %c0_42 = arith.constant 0 : index
    %57 = vector.load %arg2[%c0_40, %56, %c0_41, %c0_42] : memref<1x25x25x12xbf16, #tpu.memory_space<vmem>>, vector<1x1x23x12xbf16>
    %58 = vector.shape_cast %57 : vector<1x1x23x12xbf16> to vector<1x23x12xbf16>
    %59 = vector.shape_cast %58 : vector<1x23x12xbf16> to vector<23x12xbf16>
    %c6 = arith.constant 6 : index
    %c0_43 = arith.constant 0 : index
    %c0_44 = arith.constant 0 : index
    %60 = vector.load %arg3[%c6, %c0_43, %c0_44] : memref<9x12x16xbf16, #tpu.memory_space<vmem>>, vector<1x12x16xbf16>
    %61 = vector.shape_cast %60 : vector<1x12x16xbf16> to vector<12x16xbf16>
    %cst_45 = arith.constant dense<0.000000e+00> : vector<23x16xf32>
    %62 = tpu.matmul %59, %61, %cst_45 {dimension_numbers = #tpu.dot_dimension_numbers<[1], [0], [0], [1], [0, 0, 1, 1], [], []>} : vector<23x12xbf16>, vector<12x16xbf16>, vector<23x16xf32> -> vector<23x16xf32>
    %63 = arith.addf %54, %62 : vector<23x16xf32>
    %c2_i32_46 = arith.constant 2 : i32
    %64 = arith.addi %arg1, %c2_i32_46 : i32
    %c0_47 = arith.constant 0 : index
    %65 = arith.index_cast %64 : i32 to index
    %c1_48 = arith.constant 1 : index
    %c0_49 = arith.constant 0 : index
    %66 = vector.load %arg2[%c0_47, %65, %c1_48, %c0_49] : memref<1x25x25x12xbf16, #tpu.memory_space<vmem>>, vector<1x1x23x12xbf16>
    %67 = vector.shape_cast %66 : vector<1x1x23x12xbf16> to vector<1x23x12xbf16>
    %68 = vector.shape_cast %67 : vector<1x23x12xbf16> to vector<23x12xbf16>
    %c7 = arith.constant 7 : index
    %c0_50 = arith.constant 0 : index
    %c0_51 = arith.constant 0 : index
    %69 = vector.load %arg3[%c7, %c0_50, %c0_51] : memref<9x12x16xbf16, #tpu.memory_space<vmem>>, vector<1x12x16xbf16>
    %70 = vector.shape_cast %69 : vector<1x12x16xbf16> to vector<12x16xbf16>
    %cst_52 = arith.constant dense<0.000000e+00> : vector<23x16xf32>
    %71 = tpu.matmul %68, %70, %cst_52 {dimension_numbers = #tpu.dot_dimension_numbers<[1], [0], [0], [1], [0, 0, 1, 1], [], []>} : vector<23x12xbf16>, vector<12x16xbf16>, vector<23x16xf32> -> vector<23x16xf32>
    %72 = arith.addf %63, %71 : vector<23x16xf32>
    %c2_i32_53 = arith.constant 2 : i32
    %73 = arith.addi %arg1, %c2_i32_53 : i32
    %c0_54 = arith.constant 0 : index
    %74 = arith.index_cast %73 : i32 to index
    %c2_55 = arith.constant 2 : index
    %c0_56 = arith.constant 0 : index
    %75 = vector.load %arg2[%c0_54, %74, %c2_55, %c0_56] : memref<1x25x25x12xbf16, #tpu.memory_space<vmem>>, vector<1x1x23x12xbf16>
    %76 = vector.shape_cast %75 : vector<1x1x23x12xbf16> to vector<1x23x12xbf16>
    %77 = vector.shape_cast %76 : vector<1x23x12xbf16> to vector<23x12xbf16>
    %c8 = arith.constant 8 : index
    %c0_57 = arith.constant 0 : index
    %c0_58 = arith.constant 0 : index
    %78 = vector.load %arg3[%c8, %c0_57, %c0_58] : memref<9x12x16xbf16, #tpu.memory_space<vmem>>, vector<1x12x16xbf16>
    %79 = vector.shape_cast %78 : vector<1x12x16xbf16> to vector<12x16xbf16>
    %cst_59 = arith.constant dense<0.000000e+00> : vector<23x16xf32>
    %80 = tpu.matmul %77, %79, %cst_59 {dimension_numbers = #tpu.dot_dimension_numbers<[1], [0], [0], [1], [0, 0, 1, 1], [], []>} : vector<23x12xbf16>, vector<12x16xbf16>, vector<23x16xf32> -> vector<23x16xf32>
    %81 = arith.addf %72, %80 : vector<23x16xf32>
    %c0_60 = arith.constant 0 : index
    %c0_61 = arith.constant 0 : index
    %82 = vector.load %arg4[%c0_60, %c0_61] : memref<1x16xf32, #tpu.memory_space<vmem>>, vector<1x16xf32>
    %83 = vector.broadcast %82 : vector<1x16xf32> to vector<23x16xf32>
    %84 = arith.addf %81, %83 : vector<23x16xf32>
    %cst_62 = arith.constant 0.000000e+00 : f32
    %85 = vector.broadcast %cst_62 : f32 to vector<23x16xf32>
    %86 = arith.maximumf %84, %85 : vector<23x16xf32>
    %87 = arith.truncf %86 : vector<23x16xf32> to vector<23x16xbf16>
    %c0_63 = arith.constant 0 : index
    %c0_64 = arith.constant 0 : index
    %c0_65 = arith.constant 0 : index
    %c0_66 = arith.constant 0 : index
    %88 = vector.load %arg5[%c0_63, %c0_64, %c0_65, %c0_66] : memref<1x1x23x16xbf16, #tpu.memory_space<vmem>>, vector<1x1x23x16xbf16>
    %89 = vector.shape_cast %88 : vector<1x1x23x16xbf16> to vector<23x16xbf16>
    %90 = vector.shape_cast %87 : vector<23x16xbf16> to vector<1x1x23x16xbf16>
    tpu.vector_store %arg5[%c0_63, %c0_64, %c0_65, %c0_66], %90 {strides = array<i32>} : memref<1x1x23x16xbf16, #tpu.memory_space<vmem>>, vector<1x1x23x16xbf16>,
    return
  }
  func.func @transform_0(%arg0: i32, %arg1: i32) -> (i32, i32, i32, i32) {
    %c0_i32 = arith.constant 0 : i32
    %c0_i32_0 = arith.constant 0 : i32
    %c0_i32_1 = arith.constant 0 : i32
    %c0_i32_2 = arith.constant 0 : i32
    return %arg0, %c0_i32, %c0_i32_0, %c0_i32_1 : i32, i32, i32, i32
  }
  func.func @transform_1(%arg0: i32, %arg1: i32) -> (i32, i32, i32) {
    %c0_i32 = arith.constant 0 : i32
    %c0_i32_0 = arith.constant 0 : i32
    %c0_i32_1 = arith.constant 0 : i32
    %c0_i32_2 = arith.constant 0 : i32
    return %c0_i32, %c0_i32_0, %c0_i32_1 : i32, i32, i32
  }
  func.func @transform_2(%arg0: i32, %arg1: i32) -> (i32, i32) {
    %c0_i32 = arith.constant 0 : i32
    %c0_i32_0 = arith.constant 0 : i32
    %c0_i32_1 = arith.constant 0 : i32
    return %c0_i32, %c0_i32_0 : i32, i32
  }
  func.func @transform_3(%arg0: i32, %arg1: i32) -> (i32, i32, i32, i32) {
    %c0_i32 = arith.constant 0 : i32
    %c0_i32_0 = arith.constant 0 : i32
    %c0_i32_1 = arith.constant 0 : i32
    return %arg0, %arg1, %c0_i32, %c0_i32_0 : i32, i32, i32, i32
  }
}

module attributes {stable_mosaic.version = 11 : i64} {
  func.func @_conv5x5s2_kernel(%arg0: i32, %arg1: i32, %arg2: memref<1x12x12x64xbf16, #tpu.memory_space<vmem>>, %arg3: memref<9x64x32xbf16, #tpu.memory_space<vmem>>, %arg4: memref<1x32xf32, #tpu.memory_space<vmem>>, %arg5: memref<1x1x10x32xbf16, #tpu.memory_space<vmem>>) attributes {dimension_semantics = [#tpu.dimension_semantics<parallel>, #tpu.dimension_semantics<parallel>], iteration_bounds = array<i64: 2, 10>, scalar_prefetch = 0 : i64, scratch_operands = 0 : i64, tpu.core_type = #tpu.core_type<tc>, window_params = [{transform_indices = @transform_0, window_bounds = array<i64: 1, 12, 12, 64>}, {pipeline_mode = #tpu.pipeline_mode<synchronous>, transform_indices = @transform_1, window_bounds = array<i64: 9, 64, 32>}, {pipeline_mode = #tpu.pipeline_mode<synchronous>, transform_indices = @transform_2, window_bounds = array<i64: 1, 32>}, {transform_indices = @transform_3, window_bounds = array<i64: 1, 1, 10, 32>}]} {
    %cst = arith.constant 0.000000e+00 : f32
    %0 = vector.broadcast %cst : f32 to vector<10x32xf32>
    %c0_i32 = arith.constant 0 : i32
    %1 = arith.addi %arg1, %c0_i32 : i32
    %c0 = arith.constant 0 : index
    %2 = arith.index_cast %1 : i32 to index
    %c0_0 = arith.constant 0 : index
    %c0_1 = arith.constant 0 : index
    %3 = vector.load %arg2[%c0, %2, %c0_0, %c0_1] : memref<1x12x12x64xbf16, #tpu.memory_space<vmem>>, vector<1x1x10x64xbf16>
    %4 = vector.shape_cast %3 : vector<1x1x10x64xbf16> to vector<1x10x64xbf16>
    %5 = vector.shape_cast %4 : vector<1x10x64xbf16> to vector<10x64xbf16>
    %c0_2 = arith.constant 0 : index
    %c0_3 = arith.constant 0 : index
    %c0_4 = arith.constant 0 : index
    %6 = vector.load %arg3[%c0_2, %c0_3, %c0_4] : memref<9x64x32xbf16, #tpu.memory_space<vmem>>, vector<1x64x32xbf16>
    %7 = vector.shape_cast %6 : vector<1x64x32xbf16> to vector<64x32xbf16>
    %cst_5 = arith.constant dense<0.000000e+00> : vector<10x32xf32>
    %8 = tpu.matmul %5, %7, %cst_5 {dimension_numbers = #tpu.dot_dimension_numbers<[1], [0], [0], [1], [0, 0, 1, 1], [], []>} : vector<10x64xbf16>, vector<64x32xbf16>, vector<10x32xf32> -> vector<10x32xf32>
    %9 = arith.addf %0, %8 : vector<10x32xf32>
    %c0_i32_6 = arith.constant 0 : i32
    %10 = arith.addi %arg1, %c0_i32_6 : i32
    %c0_7 = arith.constant 0 : index
    %11 = arith.index_cast %10 : i32 to index
    %c1 = arith.constant 1 : index
    %c0_8 = arith.constant 0 : index
    %12 = vector.load %arg2[%c0_7, %11, %c1, %c0_8] : memref<1x12x12x64xbf16, #tpu.memory_space<vmem>>, vector<1x1x10x64xbf16>
    %13 = vector.shape_cast %12 : vector<1x1x10x64xbf16> to vector<1x10x64xbf16>
    %14 = vector.shape_cast %13 : vector<1x10x64xbf16> to vector<10x64xbf16>
    %c1_9 = arith.constant 1 : index
    %c0_10 = arith.constant 0 : index
    %c0_11 = arith.constant 0 : index
    %15 = vector.load %arg3[%c1_9, %c0_10, %c0_11] : memref<9x64x32xbf16, #tpu.memory_space<vmem>>, vector<1x64x32xbf16>
    %16 = vector.shape_cast %15 : vector<1x64x32xbf16> to vector<64x32xbf16>
    %cst_12 = arith.constant dense<0.000000e+00> : vector<10x32xf32>
    %17 = tpu.matmul %14, %16, %cst_12 {dimension_numbers = #tpu.dot_dimension_numbers<[1], [0], [0], [1], [0, 0, 1, 1], [], []>} : vector<10x64xbf16>, vector<64x32xbf16>, vector<10x32xf32> -> vector<10x32xf32>
    %18 = arith.addf %9, %17 : vector<10x32xf32>
    %c0_i32_13 = arith.constant 0 : i32
    %19 = arith.addi %arg1, %c0_i32_13 : i32
    %c0_14 = arith.constant 0 : index
    %20 = arith.index_cast %19 : i32 to index
    %c2 = arith.constant 2 : index
    %c0_15 = arith.constant 0 : index
    %21 = vector.load %arg2[%c0_14, %20, %c2, %c0_15] : memref<1x12x12x64xbf16, #tpu.memory_space<vmem>>, vector<1x1x10x64xbf16>
    %22 = vector.shape_cast %21 : vector<1x1x10x64xbf16> to vector<1x10x64xbf16>
    %23 = vector.shape_cast %22 : vector<1x10x64xbf16> to vector<10x64xbf16>
    %c2_16 = arith.constant 2 : index
    %c0_17 = arith.constant 0 : index
    %c0_18 = arith.constant 0 : index
    %24 = vector.load %arg3[%c2_16, %c0_17, %c0_18] : memref<9x64x32xbf16, #tpu.memory_space<vmem>>, vector<1x64x32xbf16>
    %25 = vector.shape_cast %24 : vector<1x64x32xbf16> to vector<64x32xbf16>
    %cst_19 = arith.constant dense<0.000000e+00> : vector<10x32xf32>
    %26 = tpu.matmul %23, %25, %cst_19 {dimension_numbers = #tpu.dot_dimension_numbers<[1], [0], [0], [1], [0, 0, 1, 1], [], []>} : vector<10x64xbf16>, vector<64x32xbf16>, vector<10x32xf32> -> vector<10x32xf32>
    %27 = arith.addf %18, %26 : vector<10x32xf32>
    %c1_i32 = arith.constant 1 : i32
    %28 = arith.addi %arg1, %c1_i32 : i32
    %c0_20 = arith.constant 0 : index
    %29 = arith.index_cast %28 : i32 to index
    %c0_21 = arith.constant 0 : index
    %c0_22 = arith.constant 0 : index
    %30 = vector.load %arg2[%c0_20, %29, %c0_21, %c0_22] : memref<1x12x12x64xbf16, #tpu.memory_space<vmem>>, vector<1x1x10x64xbf16>
    %31 = vector.shape_cast %30 : vector<1x1x10x64xbf16> to vector<1x10x64xbf16>
    %32 = vector.shape_cast %31 : vector<1x10x64xbf16> to vector<10x64xbf16>
    %c3 = arith.constant 3 : index
    %c0_23 = arith.constant 0 : index
    %c0_24 = arith.constant 0 : index
    %33 = vector.load %arg3[%c3, %c0_23, %c0_24] : memref<9x64x32xbf16, #tpu.memory_space<vmem>>, vector<1x64x32xbf16>
    %34 = vector.shape_cast %33 : vector<1x64x32xbf16> to vector<64x32xbf16>
    %cst_25 = arith.constant dense<0.000000e+00> : vector<10x32xf32>
    %35 = tpu.matmul %32, %34, %cst_25 {dimension_numbers = #tpu.dot_dimension_numbers<[1], [0], [0], [1], [0, 0, 1, 1], [], []>} : vector<10x64xbf16>, vector<64x32xbf16>, vector<10x32xf32> -> vector<10x32xf32>
    %36 = arith.addf %27, %35 : vector<10x32xf32>
    %c1_i32_26 = arith.constant 1 : i32
    %37 = arith.addi %arg1, %c1_i32_26 : i32
    %c0_27 = arith.constant 0 : index
    %38 = arith.index_cast %37 : i32 to index
    %c1_28 = arith.constant 1 : index
    %c0_29 = arith.constant 0 : index
    %39 = vector.load %arg2[%c0_27, %38, %c1_28, %c0_29] : memref<1x12x12x64xbf16, #tpu.memory_space<vmem>>, vector<1x1x10x64xbf16>
    %40 = vector.shape_cast %39 : vector<1x1x10x64xbf16> to vector<1x10x64xbf16>
    %41 = vector.shape_cast %40 : vector<1x10x64xbf16> to vector<10x64xbf16>
    %c4 = arith.constant 4 : index
    %c0_30 = arith.constant 0 : index
    %c0_31 = arith.constant 0 : index
    %42 = vector.load %arg3[%c4, %c0_30, %c0_31] : memref<9x64x32xbf16, #tpu.memory_space<vmem>>, vector<1x64x32xbf16>
    %43 = vector.shape_cast %42 : vector<1x64x32xbf16> to vector<64x32xbf16>
    %cst_32 = arith.constant dense<0.000000e+00> : vector<10x32xf32>
    %44 = tpu.matmul %41, %43, %cst_32 {dimension_numbers = #tpu.dot_dimension_numbers<[1], [0], [0], [1], [0, 0, 1, 1], [], []>} : vector<10x64xbf16>, vector<64x32xbf16>, vector<10x32xf32> -> vector<10x32xf32>
    %45 = arith.addf %36, %44 : vector<10x32xf32>
    %c1_i32_33 = arith.constant 1 : i32
    %46 = arith.addi %arg1, %c1_i32_33 : i32
    %c0_34 = arith.constant 0 : index
    %47 = arith.index_cast %46 : i32 to index
    %c2_35 = arith.constant 2 : index
    %c0_36 = arith.constant 0 : index
    %48 = vector.load %arg2[%c0_34, %47, %c2_35, %c0_36] : memref<1x12x12x64xbf16, #tpu.memory_space<vmem>>, vector<1x1x10x64xbf16>
    %49 = vector.shape_cast %48 : vector<1x1x10x64xbf16> to vector<1x10x64xbf16>
    %50 = vector.shape_cast %49 : vector<1x10x64xbf16> to vector<10x64xbf16>
    %c5 = arith.constant 5 : index
    %c0_37 = arith.constant 0 : index
    %c0_38 = arith.constant 0 : index
    %51 = vector.load %arg3[%c5, %c0_37, %c0_38] : memref<9x64x32xbf16, #tpu.memory_space<vmem>>, vector<1x64x32xbf16>
    %52 = vector.shape_cast %51 : vector<1x64x32xbf16> to vector<64x32xbf16>
    %cst_39 = arith.constant dense<0.000000e+00> : vector<10x32xf32>
    %53 = tpu.matmul %50, %52, %cst_39 {dimension_numbers = #tpu.dot_dimension_numbers<[1], [0], [0], [1], [0, 0, 1, 1], [], []>} : vector<10x64xbf16>, vector<64x32xbf16>, vector<10x32xf32> -> vector<10x32xf32>
    %54 = arith.addf %45, %53 : vector<10x32xf32>
    %c2_i32 = arith.constant 2 : i32
    %55 = arith.addi %arg1, %c2_i32 : i32
    %c0_40 = arith.constant 0 : index
    %56 = arith.index_cast %55 : i32 to index
    %c0_41 = arith.constant 0 : index
    %c0_42 = arith.constant 0 : index
    %57 = vector.load %arg2[%c0_40, %56, %c0_41, %c0_42] : memref<1x12x12x64xbf16, #tpu.memory_space<vmem>>, vector<1x1x10x64xbf16>
    %58 = vector.shape_cast %57 : vector<1x1x10x64xbf16> to vector<1x10x64xbf16>
    %59 = vector.shape_cast %58 : vector<1x10x64xbf16> to vector<10x64xbf16>
    %c6 = arith.constant 6 : index
    %c0_43 = arith.constant 0 : index
    %c0_44 = arith.constant 0 : index
    %60 = vector.load %arg3[%c6, %c0_43, %c0_44] : memref<9x64x32xbf16, #tpu.memory_space<vmem>>, vector<1x64x32xbf16>
    %61 = vector.shape_cast %60 : vector<1x64x32xbf16> to vector<64x32xbf16>
    %cst_45 = arith.constant dense<0.000000e+00> : vector<10x32xf32>
    %62 = tpu.matmul %59, %61, %cst_45 {dimension_numbers = #tpu.dot_dimension_numbers<[1], [0], [0], [1], [0, 0, 1, 1], [], []>} : vector<10x64xbf16>, vector<64x32xbf16>, vector<10x32xf32> -> vector<10x32xf32>
    %63 = arith.addf %54, %62 : vector<10x32xf32>
    %c2_i32_46 = arith.constant 2 : i32
    %64 = arith.addi %arg1, %c2_i32_46 : i32
    %c0_47 = arith.constant 0 : index
    %65 = arith.index_cast %64 : i32 to index
    %c1_48 = arith.constant 1 : index
    %c0_49 = arith.constant 0 : index
    %66 = vector.load %arg2[%c0_47, %65, %c1_48, %c0_49] : memref<1x12x12x64xbf16, #tpu.memory_space<vmem>>, vector<1x1x10x64xbf16>
    %67 = vector.shape_cast %66 : vector<1x1x10x64xbf16> to vector<1x10x64xbf16>
    %68 = vector.shape_cast %67 : vector<1x10x64xbf16> to vector<10x64xbf16>
    %c7 = arith.constant 7 : index
    %c0_50 = arith.constant 0 : index
    %c0_51 = arith.constant 0 : index
    %69 = vector.load %arg3[%c7, %c0_50, %c0_51] : memref<9x64x32xbf16, #tpu.memory_space<vmem>>, vector<1x64x32xbf16>
    %70 = vector.shape_cast %69 : vector<1x64x32xbf16> to vector<64x32xbf16>
    %cst_52 = arith.constant dense<0.000000e+00> : vector<10x32xf32>
    %71 = tpu.matmul %68, %70, %cst_52 {dimension_numbers = #tpu.dot_dimension_numbers<[1], [0], [0], [1], [0, 0, 1, 1], [], []>} : vector<10x64xbf16>, vector<64x32xbf16>, vector<10x32xf32> -> vector<10x32xf32>
    %72 = arith.addf %63, %71 : vector<10x32xf32>
    %c2_i32_53 = arith.constant 2 : i32
    %73 = arith.addi %arg1, %c2_i32_53 : i32
    %c0_54 = arith.constant 0 : index
    %74 = arith.index_cast %73 : i32 to index
    %c2_55 = arith.constant 2 : index
    %c0_56 = arith.constant 0 : index
    %75 = vector.load %arg2[%c0_54, %74, %c2_55, %c0_56] : memref<1x12x12x64xbf16, #tpu.memory_space<vmem>>, vector<1x1x10x64xbf16>
    %76 = vector.shape_cast %75 : vector<1x1x10x64xbf16> to vector<1x10x64xbf16>
    %77 = vector.shape_cast %76 : vector<1x10x64xbf16> to vector<10x64xbf16>
    %c8 = arith.constant 8 : index
    %c0_57 = arith.constant 0 : index
    %c0_58 = arith.constant 0 : index
    %78 = vector.load %arg3[%c8, %c0_57, %c0_58] : memref<9x64x32xbf16, #tpu.memory_space<vmem>>, vector<1x64x32xbf16>
    %79 = vector.shape_cast %78 : vector<1x64x32xbf16> to vector<64x32xbf16>
    %cst_59 = arith.constant dense<0.000000e+00> : vector<10x32xf32>
    %80 = tpu.matmul %77, %79, %cst_59 {dimension_numbers = #tpu.dot_dimension_numbers<[1], [0], [0], [1], [0, 0, 1, 1], [], []>} : vector<10x64xbf16>, vector<64x32xbf16>, vector<10x32xf32> -> vector<10x32xf32>
    %81 = arith.addf %72, %80 : vector<10x32xf32>
    %c0_60 = arith.constant 0 : index
    %c0_61 = arith.constant 0 : index
    %82 = vector.load %arg4[%c0_60, %c0_61] : memref<1x32xf32, #tpu.memory_space<vmem>>, vector<1x32xf32>
    %83 = vector.broadcast %82 : vector<1x32xf32> to vector<10x32xf32>
    %84 = arith.addf %81, %83 : vector<10x32xf32>
    %cst_62 = arith.constant 0.000000e+00 : f32
    %85 = vector.broadcast %cst_62 : f32 to vector<10x32xf32>
    %86 = arith.maximumf %84, %85 : vector<10x32xf32>
    %87 = arith.truncf %86 : vector<10x32xf32> to vector<10x32xbf16>
    %c0_63 = arith.constant 0 : index
    %c0_64 = arith.constant 0 : index
    %c0_65 = arith.constant 0 : index
    %c0_66 = arith.constant 0 : index
    %88 = vector.load %arg5[%c0_63, %c0_64, %c0_65, %c0_66] : memref<1x1x10x32xbf16, #tpu.memory_space<vmem>>, vector<1x1x10x32xbf16>
    %89 = vector.shape_cast %88 : vector<1x1x10x32xbf16> to vector<10x32xbf16>
    %90 = vector.shape_cast %87 : vector<10x32xbf16> to vector<1x1x10x32xbf16>
    tpu.vector_store %arg5[%c0_63, %c0_64, %c0_65, %c0_66], %90 {strides = array<i32>} : memref<1x1x10x32xbf16, #tpu.memory_space<vmem>>, vector<1x1x10x32xbf16>,
    return
  }
  func.func @transform_0(%arg0: i32, %arg1: i32) -> (i32, i32, i32, i32) {
    %c0_i32 = arith.constant 0 : i32
    %c0_i32_0 = arith.constant 0 : i32
    %c0_i32_1 = arith.constant 0 : i32
    %c0_i32_2 = arith.constant 0 : i32
    return %arg0, %c0_i32, %c0_i32_0, %c0_i32_1 : i32, i32, i32, i32
  }
  func.func @transform_1(%arg0: i32, %arg1: i32) -> (i32, i32, i32) {
    %c0_i32 = arith.constant 0 : i32
    %c0_i32_0 = arith.constant 0 : i32
    %c0_i32_1 = arith.constant 0 : i32
    %c0_i32_2 = arith.constant 0 : i32
    return %c0_i32, %c0_i32_0, %c0_i32_1 : i32, i32, i32
  }
  func.func @transform_2(%arg0: i32, %arg1: i32) -> (i32, i32) {
    %c0_i32 = arith.constant 0 : i32
    %c0_i32_0 = arith.constant 0 : i32
    %c0_i32_1 = arith.constant 0 : i32
    return %c0_i32, %c0_i32_0 : i32, i32
  }
  func.func @transform_3(%arg0: i32, %arg1: i32) -> (i32, i32, i32, i32) {
    %c0_i32 = arith.constant 0 : i32
    %c0_i32_0 = arith.constant 0 : i32
    %c0_i32_1 = arith.constant 0 : i32
    return %arg0, %arg1, %c0_i32, %c0_i32_0 : i32, i32, i32, i32
  }
}

module attributes {stable_mosaic.version = 11 : i64} {
  func.func @_conv5x5s2_kernel(%arg0: i32, %arg1: i32, %arg2: memref<1x5x5x128xbf16, #tpu.memory_space<vmem>>, %arg3: memref<9x128x64xbf16, #tpu.memory_space<vmem>>, %arg4: memref<1x64xf32, #tpu.memory_space<vmem>>, %arg5: memref<1x1x3x64xbf16, #tpu.memory_space<vmem>>) attributes {dimension_semantics = [#tpu.dimension_semantics<parallel>, #tpu.dimension_semantics<parallel>], iteration_bounds = array<i64: 2, 3>, scalar_prefetch = 0 : i64, scratch_operands = 0 : i64, tpu.core_type = #tpu.core_type<tc>, window_params = [{transform_indices = @transform_0, window_bounds = array<i64: 1, 5, 5, 128>}, {pipeline_mode = #tpu.pipeline_mode<synchronous>, transform_indices = @transform_1, window_bounds = array<i64: 9, 128, 64>}, {pipeline_mode = #tpu.pipeline_mode<synchronous>, transform_indices = @transform_2, window_bounds = array<i64: 1, 64>}, {transform_indices = @transform_3, window_bounds = array<i64: 1, 1, 3, 64>}]} {
    %cst = arith.constant 0.000000e+00 : f32
    %0 = vector.broadcast %cst : f32 to vector<3x64xf32>
    %c0_i32 = arith.constant 0 : i32
    %1 = arith.addi %arg1, %c0_i32 : i32
    %c0 = arith.constant 0 : index
    %2 = arith.index_cast %1 : i32 to index
    %c0_0 = arith.constant 0 : index
    %c0_1 = arith.constant 0 : index
    %3 = vector.load %arg2[%c0, %2, %c0_0, %c0_1] : memref<1x5x5x128xbf16, #tpu.memory_space<vmem>>, vector<1x1x3x128xbf16>
    %4 = vector.shape_cast %3 : vector<1x1x3x128xbf16> to vector<1x3x128xbf16>
    %5 = vector.shape_cast %4 : vector<1x3x128xbf16> to vector<3x128xbf16>
    %c0_2 = arith.constant 0 : index
    %c0_3 = arith.constant 0 : index
    %c0_4 = arith.constant 0 : index
    %6 = vector.load %arg3[%c0_2, %c0_3, %c0_4] : memref<9x128x64xbf16, #tpu.memory_space<vmem>>, vector<1x128x64xbf16>
    %7 = vector.shape_cast %6 : vector<1x128x64xbf16> to vector<128x64xbf16>
    %cst_5 = arith.constant dense<0.000000e+00> : vector<3x64xf32>
    %8 = tpu.matmul %5, %7, %cst_5 {dimension_numbers = #tpu.dot_dimension_numbers<[1], [0], [0], [1], [0, 0, 1, 1], [], []>} : vector<3x128xbf16>, vector<128x64xbf16>, vector<3x64xf32> -> vector<3x64xf32>
    %9 = arith.addf %0, %8 : vector<3x64xf32>
    %c0_i32_6 = arith.constant 0 : i32
    %10 = arith.addi %arg1, %c0_i32_6 : i32
    %c0_7 = arith.constant 0 : index
    %11 = arith.index_cast %10 : i32 to index
    %c1 = arith.constant 1 : index
    %c0_8 = arith.constant 0 : index
    %12 = vector.load %arg2[%c0_7, %11, %c1, %c0_8] : memref<1x5x5x128xbf16, #tpu.memory_space<vmem>>, vector<1x1x3x128xbf16>
    %13 = vector.shape_cast %12 : vector<1x1x3x128xbf16> to vector<1x3x128xbf16>
    %14 = vector.shape_cast %13 : vector<1x3x128xbf16> to vector<3x128xbf16>
    %c1_9 = arith.constant 1 : index
    %c0_10 = arith.constant 0 : index
    %c0_11 = arith.constant 0 : index
    %15 = vector.load %arg3[%c1_9, %c0_10, %c0_11] : memref<9x128x64xbf16, #tpu.memory_space<vmem>>, vector<1x128x64xbf16>
    %16 = vector.shape_cast %15 : vector<1x128x64xbf16> to vector<128x64xbf16>
    %cst_12 = arith.constant dense<0.000000e+00> : vector<3x64xf32>
    %17 = tpu.matmul %14, %16, %cst_12 {dimension_numbers = #tpu.dot_dimension_numbers<[1], [0], [0], [1], [0, 0, 1, 1], [], []>} : vector<3x128xbf16>, vector<128x64xbf16>, vector<3x64xf32> -> vector<3x64xf32>
    %18 = arith.addf %9, %17 : vector<3x64xf32>
    %c0_i32_13 = arith.constant 0 : i32
    %19 = arith.addi %arg1, %c0_i32_13 : i32
    %c0_14 = arith.constant 0 : index
    %20 = arith.index_cast %19 : i32 to index
    %c2 = arith.constant 2 : index
    %c0_15 = arith.constant 0 : index
    %21 = vector.load %arg2[%c0_14, %20, %c2, %c0_15] : memref<1x5x5x128xbf16, #tpu.memory_space<vmem>>, vector<1x1x3x128xbf16>
    %22 = vector.shape_cast %21 : vector<1x1x3x128xbf16> to vector<1x3x128xbf16>
    %23 = vector.shape_cast %22 : vector<1x3x128xbf16> to vector<3x128xbf16>
    %c2_16 = arith.constant 2 : index
    %c0_17 = arith.constant 0 : index
    %c0_18 = arith.constant 0 : index
    %24 = vector.load %arg3[%c2_16, %c0_17, %c0_18] : memref<9x128x64xbf16, #tpu.memory_space<vmem>>, vector<1x128x64xbf16>
    %25 = vector.shape_cast %24 : vector<1x128x64xbf16> to vector<128x64xbf16>
    %cst_19 = arith.constant dense<0.000000e+00> : vector<3x64xf32>
    %26 = tpu.matmul %23, %25, %cst_19 {dimension_numbers = #tpu.dot_dimension_numbers<[1], [0], [0], [1], [0, 0, 1, 1], [], []>} : vector<3x128xbf16>, vector<128x64xbf16>, vector<3x64xf32> -> vector<3x64xf32>
    %27 = arith.addf %18, %26 : vector<3x64xf32>
    %c1_i32 = arith.constant 1 : i32
    %28 = arith.addi %arg1, %c1_i32 : i32
    %c0_20 = arith.constant 0 : index
    %29 = arith.index_cast %28 : i32 to index
    %c0_21 = arith.constant 0 : index
    %c0_22 = arith.constant 0 : index
    %30 = vector.load %arg2[%c0_20, %29, %c0_21, %c0_22] : memref<1x5x5x128xbf16, #tpu.memory_space<vmem>>, vector<1x1x3x128xbf16>
    %31 = vector.shape_cast %30 : vector<1x1x3x128xbf16> to vector<1x3x128xbf16>
    %32 = vector.shape_cast %31 : vector<1x3x128xbf16> to vector<3x128xbf16>
    %c3 = arith.constant 3 : index
    %c0_23 = arith.constant 0 : index
    %c0_24 = arith.constant 0 : index
    %33 = vector.load %arg3[%c3, %c0_23, %c0_24] : memref<9x128x64xbf16, #tpu.memory_space<vmem>>, vector<1x128x64xbf16>
    %34 = vector.shape_cast %33 : vector<1x128x64xbf16> to vector<128x64xbf16>
    %cst_25 = arith.constant dense<0.000000e+00> : vector<3x64xf32>
    %35 = tpu.matmul %32, %34, %cst_25 {dimension_numbers = #tpu.dot_dimension_numbers<[1], [0], [0], [1], [0, 0, 1, 1], [], []>} : vector<3x128xbf16>, vector<128x64xbf16>, vector<3x64xf32> -> vector<3x64xf32>
    %36 = arith.addf %27, %35 : vector<3x64xf32>
    %c1_i32_26 = arith.constant 1 : i32
    %37 = arith.addi %arg1, %c1_i32_26 : i32
    %c0_27 = arith.constant 0 : index
    %38 = arith.index_cast %37 : i32 to index
    %c1_28 = arith.constant 1 : index
    %c0_29 = arith.constant 0 : index
    %39 = vector.load %arg2[%c0_27, %38, %c1_28, %c0_29] : memref<1x5x5x128xbf16, #tpu.memory_space<vmem>>, vector<1x1x3x128xbf16>
    %40 = vector.shape_cast %39 : vector<1x1x3x128xbf16> to vector<1x3x128xbf16>
    %41 = vector.shape_cast %40 : vector<1x3x128xbf16> to vector<3x128xbf16>
    %c4 = arith.constant 4 : index
    %c0_30 = arith.constant 0 : index
    %c0_31 = arith.constant 0 : index
    %42 = vector.load %arg3[%c4, %c0_30, %c0_31] : memref<9x128x64xbf16, #tpu.memory_space<vmem>>, vector<1x128x64xbf16>
    %43 = vector.shape_cast %42 : vector<1x128x64xbf16> to vector<128x64xbf16>
    %cst_32 = arith.constant dense<0.000000e+00> : vector<3x64xf32>
    %44 = tpu.matmul %41, %43, %cst_32 {dimension_numbers = #tpu.dot_dimension_numbers<[1], [0], [0], [1], [0, 0, 1, 1], [], []>} : vector<3x128xbf16>, vector<128x64xbf16>, vector<3x64xf32> -> vector<3x64xf32>
    %45 = arith.addf %36, %44 : vector<3x64xf32>
    %c1_i32_33 = arith.constant 1 : i32
    %46 = arith.addi %arg1, %c1_i32_33 : i32
    %c0_34 = arith.constant 0 : index
    %47 = arith.index_cast %46 : i32 to index
    %c2_35 = arith.constant 2 : index
    %c0_36 = arith.constant 0 : index
    %48 = vector.load %arg2[%c0_34, %47, %c2_35, %c0_36] : memref<1x5x5x128xbf16, #tpu.memory_space<vmem>>, vector<1x1x3x128xbf16>
    %49 = vector.shape_cast %48 : vector<1x1x3x128xbf16> to vector<1x3x128xbf16>
    %50 = vector.shape_cast %49 : vector<1x3x128xbf16> to vector<3x128xbf16>
    %c5 = arith.constant 5 : index
    %c0_37 = arith.constant 0 : index
    %c0_38 = arith.constant 0 : index
    %51 = vector.load %arg3[%c5, %c0_37, %c0_38] : memref<9x128x64xbf16, #tpu.memory_space<vmem>>, vector<1x128x64xbf16>
    %52 = vector.shape_cast %51 : vector<1x128x64xbf16> to vector<128x64xbf16>
    %cst_39 = arith.constant dense<0.000000e+00> : vector<3x64xf32>
    %53 = tpu.matmul %50, %52, %cst_39 {dimension_numbers = #tpu.dot_dimension_numbers<[1], [0], [0], [1], [0, 0, 1, 1], [], []>} : vector<3x128xbf16>, vector<128x64xbf16>, vector<3x64xf32> -> vector<3x64xf32>
    %54 = arith.addf %45, %53 : vector<3x64xf32>
    %c2_i32 = arith.constant 2 : i32
    %55 = arith.addi %arg1, %c2_i32 : i32
    %c0_40 = arith.constant 0 : index
    %56 = arith.index_cast %55 : i32 to index
    %c0_41 = arith.constant 0 : index
    %c0_42 = arith.constant 0 : index
    %57 = vector.load %arg2[%c0_40, %56, %c0_41, %c0_42] : memref<1x5x5x128xbf16, #tpu.memory_space<vmem>>, vector<1x1x3x128xbf16>
    %58 = vector.shape_cast %57 : vector<1x1x3x128xbf16> to vector<1x3x128xbf16>
    %59 = vector.shape_cast %58 : vector<1x3x128xbf16> to vector<3x128xbf16>
    %c6 = arith.constant 6 : index
    %c0_43 = arith.constant 0 : index
    %c0_44 = arith.constant 0 : index
    %60 = vector.load %arg3[%c6, %c0_43, %c0_44] : memref<9x128x64xbf16, #tpu.memory_space<vmem>>, vector<1x128x64xbf16>
    %61 = vector.shape_cast %60 : vector<1x128x64xbf16> to vector<128x64xbf16>
    %cst_45 = arith.constant dense<0.000000e+00> : vector<3x64xf32>
    %62 = tpu.matmul %59, %61, %cst_45 {dimension_numbers = #tpu.dot_dimension_numbers<[1], [0], [0], [1], [0, 0, 1, 1], [], []>} : vector<3x128xbf16>, vector<128x64xbf16>, vector<3x64xf32> -> vector<3x64xf32>
    %63 = arith.addf %54, %62 : vector<3x64xf32>
    %c2_i32_46 = arith.constant 2 : i32
    %64 = arith.addi %arg1, %c2_i32_46 : i32
    %c0_47 = arith.constant 0 : index
    %65 = arith.index_cast %64 : i32 to index
    %c1_48 = arith.constant 1 : index
    %c0_49 = arith.constant 0 : index
    %66 = vector.load %arg2[%c0_47, %65, %c1_48, %c0_49] : memref<1x5x5x128xbf16, #tpu.memory_space<vmem>>, vector<1x1x3x128xbf16>
    %67 = vector.shape_cast %66 : vector<1x1x3x128xbf16> to vector<1x3x128xbf16>
    %68 = vector.shape_cast %67 : vector<1x3x128xbf16> to vector<3x128xbf16>
    %c7 = arith.constant 7 : index
    %c0_50 = arith.constant 0 : index
    %c0_51 = arith.constant 0 : index
    %69 = vector.load %arg3[%c7, %c0_50, %c0_51] : memref<9x128x64xbf16, #tpu.memory_space<vmem>>, vector<1x128x64xbf16>
    %70 = vector.shape_cast %69 : vector<1x128x64xbf16> to vector<128x64xbf16>
    %cst_52 = arith.constant dense<0.000000e+00> : vector<3x64xf32>
    %71 = tpu.matmul %68, %70, %cst_52 {dimension_numbers = #tpu.dot_dimension_numbers<[1], [0], [0], [1], [0, 0, 1, 1], [], []>} : vector<3x128xbf16>, vector<128x64xbf16>, vector<3x64xf32> -> vector<3x64xf32>
    %72 = arith.addf %63, %71 : vector<3x64xf32>
    %c2_i32_53 = arith.constant 2 : i32
    %73 = arith.addi %arg1, %c2_i32_53 : i32
    %c0_54 = arith.constant 0 : index
    %74 = arith.index_cast %73 : i32 to index
    %c2_55 = arith.constant 2 : index
    %c0_56 = arith.constant 0 : index
    %75 = vector.load %arg2[%c0_54, %74, %c2_55, %c0_56] : memref<1x5x5x128xbf16, #tpu.memory_space<vmem>>, vector<1x1x3x128xbf16>
    %76 = vector.shape_cast %75 : vector<1x1x3x128xbf16> to vector<1x3x128xbf16>
    %77 = vector.shape_cast %76 : vector<1x3x128xbf16> to vector<3x128xbf16>
    %c8 = arith.constant 8 : index
    %c0_57 = arith.constant 0 : index
    %c0_58 = arith.constant 0 : index
    %78 = vector.load %arg3[%c8, %c0_57, %c0_58] : memref<9x128x64xbf16, #tpu.memory_space<vmem>>, vector<1x128x64xbf16>
    %79 = vector.shape_cast %78 : vector<1x128x64xbf16> to vector<128x64xbf16>
    %cst_59 = arith.constant dense<0.000000e+00> : vector<3x64xf32>
    %80 = tpu.matmul %77, %79, %cst_59 {dimension_numbers = #tpu.dot_dimension_numbers<[1], [0], [0], [1], [0, 0, 1, 1], [], []>} : vector<3x128xbf16>, vector<128x64xbf16>, vector<3x64xf32> -> vector<3x64xf32>
    %81 = arith.addf %72, %80 : vector<3x64xf32>
    %c0_60 = arith.constant 0 : index
    %c0_61 = arith.constant 0 : index
    %82 = vector.load %arg4[%c0_60, %c0_61] : memref<1x64xf32, #tpu.memory_space<vmem>>, vector<1x64xf32>
    %83 = vector.broadcast %82 : vector<1x64xf32> to vector<3x64xf32>
    %84 = arith.addf %81, %83 : vector<3x64xf32>
    %cst_62 = arith.constant 0.000000e+00 : f32
    %85 = vector.broadcast %cst_62 : f32 to vector<3x64xf32>
    %86 = arith.maximumf %84, %85 : vector<3x64xf32>
    %87 = arith.truncf %86 : vector<3x64xf32> to vector<3x64xbf16>
    %c0_63 = arith.constant 0 : index
    %c0_64 = arith.constant 0 : index
    %c0_65 = arith.constant 0 : index
    %c0_66 = arith.constant 0 : index
    %88 = vector.load %arg5[%c0_63, %c0_64, %c0_65, %c0_66] : memref<1x1x3x64xbf16, #tpu.memory_space<vmem>>, vector<1x1x3x64xbf16>
    %89 = vector.shape_cast %88 : vector<1x1x3x64xbf16> to vector<3x64xbf16>
    %90 = vector.shape_cast %87 : vector<3x64xbf16> to vector<1x1x3x64xbf16>
    tpu.vector_store %arg5[%c0_63, %c0_64, %c0_65, %c0_66], %90 {strides = array<i32>} : memref<1x1x3x64xbf16, #tpu.memory_space<vmem>>, vector<1x1x3x64xbf16>,
    return
  }
  func.func @transform_0(%arg0: i32, %arg1: i32) -> (i32, i32, i32, i32) {
    %c0_i32 = arith.constant 0 : i32
    %c0_i32_0 = arith.constant 0 : i32
    %c0_i32_1 = arith.constant 0 : i32
    %c0_i32_2 = arith.constant 0 : i32
    return %arg0, %c0_i32, %c0_i32_0, %c0_i32_1 : i32, i32, i32, i32
  }
  func.func @transform_1(%arg0: i32, %arg1: i32) -> (i32, i32, i32) {
    %c0_i32 = arith.constant 0 : i32
    %c0_i32_0 = arith.constant 0 : i32
    %c0_i32_1 = arith.constant 0 : i32
    %c0_i32_2 = arith.constant 0 : i32
    return %c0_i32, %c0_i32_0, %c0_i32_1 : i32, i32, i32
  }
  func.func @transform_2(%arg0: i32, %arg1: i32) -> (i32, i32) {
    %c0_i32 = arith.constant 0 : i32
    %c0_i32_0 = arith.constant 0 : i32
    %c0_i32_1 = arith.constant 0 : i32
    return %c0_i32, %c0_i32_0 : i32, i32
  }
  func.func @transform_3(%arg0: i32, %arg1: i32) -> (i32, i32, i32, i32) {
    %c0_i32 = arith.constant 0 : i32
    %c0_i32_0 = arith.constant 0 : i32
    %c0_i32_1 = arith.constant 0 : i32
    return %arg0, %arg1, %c0_i32, %c0_i32_0 : i32, i32, i32, i32
  }
}

module attributes {stable_mosaic.version = 11 : i64} {
  func.func @_linear_kernel(%arg0: i32, %arg1: memref<2x576xbf16, #tpu.memory_space<vmem>>, %arg2: memref<576x256xbf16, #tpu.memory_space<vmem>>, %arg3: memref<1x256xf32, #tpu.memory_space<vmem>>, %arg4: memref<2x256xbf16, #tpu.memory_space<vmem>>) attributes {dimension_semantics = [#tpu.dimension_semantics<parallel>], iteration_bounds = array<i64: 4>, scalar_prefetch = 0 : i64, scratch_operands = 0 : i64, tpu.core_type = #tpu.core_type<tc>, window_params = [{pipeline_mode = #tpu.pipeline_mode<synchronous>, transform_indices = @transform_0, window_bounds = array<i64: 2, 576>}, {transform_indices = @transform_1, window_bounds = array<i64: 576, 256>}, {transform_indices = @transform_2, window_bounds = array<i64: 1, 256>}, {transform_indices = @transform_3, window_bounds = array<i64: 2, 256>}]} {
    %c0 = arith.constant 0 : index
    %c0_0 = arith.constant 0 : index
    %0 = vector.load %arg1[%c0, %c0_0] : memref<2x576xbf16, #tpu.memory_space<vmem>>, vector<2x576xbf16>
    %c0_1 = arith.constant 0 : index
    %c0_2 = arith.constant 0 : index
    %1 = vector.load %arg2[%c0_1, %c0_2] : memref<576x256xbf16, #tpu.memory_space<vmem>>, vector<576x256xbf16>
    %cst = arith.constant dense<0.000000e+00> : vector<2x256xf32>
    %2 = tpu.matmul %0, %1, %cst {dimension_numbers = #tpu.dot_dimension_numbers<[1], [0], [0], [1], [0, 0, 1, 1], [], []>} : vector<2x576xbf16>, vector<576x256xbf16>, vector<2x256xf32> -> vector<2x256xf32>
    %c0_3 = arith.constant 0 : index
    %c0_4 = arith.constant 0 : index
    %3 = vector.load %arg3[%c0_3, %c0_4] : memref<1x256xf32, #tpu.memory_space<vmem>>, vector<1x256xf32>
    %4 = vector.broadcast %3 : vector<1x256xf32> to vector<2x256xf32>
    %5 = arith.addf %2, %4 : vector<2x256xf32>
    %cst_5 = arith.constant 0.000000e+00 : f32
    %6 = vector.broadcast %cst_5 : f32 to vector<2x256xf32>
    %7 = arith.maximumf %5, %6 : vector<2x256xf32>
    %8 = arith.truncf %7 : vector<2x256xf32> to vector<2x256xbf16>
    %c0_6 = arith.constant 0 : index
    %c0_7 = arith.constant 0 : index
    %9 = vector.load %arg4[%c0_6, %c0_7] : memref<2x256xbf16, #tpu.memory_space<vmem>>, vector<2x256xbf16>
    tpu.vector_store %arg4[%c0_6, %c0_7], %8 {strides = array<i32>} : memref<2x256xbf16, #tpu.memory_space<vmem>>, vector<2x256xbf16>,
    return
  }
  func.func @transform_0(%arg0: i32) -> (i32, i32) {
    %c0_i32 = arith.constant 0 : i32
    %c0_i32_0 = arith.constant 0 : i32
    %c0_i32_1 = arith.constant 0 : i32
    return %c0_i32, %c0_i32_0 : i32, i32
  }
  func.func @transform_1(%arg0: i32) -> (i32, i32) {
    %c0_i32 = arith.constant 0 : i32
    %c0_i32_0 = arith.constant 0 : i32
    return %c0_i32, %arg0 : i32, i32
  }
  func.func @transform_2(%arg0: i32) -> (i32, i32) {
    %c0_i32 = arith.constant 0 : i32
    %c0_i32_0 = arith.constant 0 : i32
    return %c0_i32, %arg0 : i32, i32
  }
  func.func @transform_3(%arg0: i32) -> (i32, i32) {
    %c0_i32 = arith.constant 0 : i32
    %c0_i32_0 = arith.constant 0 : i32
    return %c0_i32, %arg0 : i32, i32
  }
}

module attributes {stable_mosaic.version = 11 : i64} {
  func.func @_linear_kernel(%arg0: i32, %arg1: memref<2x1024xbf16, #tpu.memory_space<vmem>>, %arg2: memref<1024x10xbf16, #tpu.memory_space<vmem>>, %arg3: memref<1x10xf32, #tpu.memory_space<vmem>>, %arg4: memref<2x10xf32, #tpu.memory_space<vmem>>) attributes {dimension_semantics = [#tpu.dimension_semantics<parallel>], iteration_bounds = array<i64: 1>, scalar_prefetch = 0 : i64, scratch_operands = 0 : i64, tpu.core_type = #tpu.core_type<tc>, window_params = [{pipeline_mode = #tpu.pipeline_mode<synchronous>, transform_indices = @transform_0, window_bounds = array<i64: 2, 1024>}, {transform_indices = @transform_1, window_bounds = array<i64: 1024, 10>}, {transform_indices = @transform_2, window_bounds = array<i64: 1, 10>}, {transform_indices = @transform_3, window_bounds = array<i64: 2, 10>}]} {
    %c0 = arith.constant 0 : index
    %c0_0 = arith.constant 0 : index
    %0 = vector.load %arg1[%c0, %c0_0] : memref<2x1024xbf16, #tpu.memory_space<vmem>>, vector<2x1024xbf16>
    %c0_1 = arith.constant 0 : index
    %c0_2 = arith.constant 0 : index
    %1 = vector.load %arg2[%c0_1, %c0_2] : memref<1024x10xbf16, #tpu.memory_space<vmem>>, vector<1024x10xbf16>
    %cst = arith.constant dense<0.000000e+00> : vector<2x10xf32>
    %2 = tpu.matmul %0, %1, %cst {dimension_numbers = #tpu.dot_dimension_numbers<[1], [0], [0], [1], [0, 0, 1, 1], [], []>} : vector<2x1024xbf16>, vector<1024x10xbf16>, vector<2x10xf32> -> vector<2x10xf32>
    %c0_3 = arith.constant 0 : index
    %c0_4 = arith.constant 0 : index
    %3 = vector.load %arg3[%c0_3, %c0_4] : memref<1x10xf32, #tpu.memory_space<vmem>>, vector<1x10xf32>
    %4 = vector.broadcast %3 : vector<1x10xf32> to vector<2x10xf32>
    %5 = arith.addf %2, %4 : vector<2x10xf32>
    %c0_5 = arith.constant 0 : index
    %c0_6 = arith.constant 0 : index
    %6 = vector.load %arg4[%c0_5, %c0_6] : memref<2x10xf32, #tpu.memory_space<vmem>>, vector<2x10xf32>
    tpu.vector_store %arg4[%c0_5, %c0_6], %5 {strides = array<i32>} : memref<2x10xf32, #tpu.memory_space<vmem>>, vector<2x10xf32>,
    return
  }
  func.func @transform_0(%arg0: i32) -> (i32, i32) {
    %c0_i32 = arith.constant 0 : i32
    %c0_i32_0 = arith.constant 0 : i32
    %c0_i32_1 = arith.constant 0 : i32
    return %c0_i32, %c0_i32_0 : i32, i32
  }
  func.func @transform_1(%arg0: i32) -> (i32, i32) {
    %c0_i32 = arith.constant 0 : i32
    %c0_i32_0 = arith.constant 0 : i32
    return %c0_i32, %arg0 : i32, i32
  }
  func.func @transform_2(%arg0: i32) -> (i32, i32) {
    %c0_i32 = arith.constant 0 : i32
    %c0_i32_0 = arith.constant 0 : i32
    return %c0_i32, %arg0 : i32, i32
  }
  func.func @transform_3(%arg0: i32) -> (i32, i32) {
    %c0_i32 = arith.constant 0 : i32
    %c0_i32_0 = arith.constant 0 : i32
    return %c0_i32, %arg0 : i32, i32
  }
}

</mosaic_0001>

<bundles_post_ra>
// kernel: conv2d_module_forward.5
= control target key start
LH: loop header
LB: loop body
LE: loop exit
PB: predicated region body
PF: predicated region fallthrough
CT: control target
= control target key end

     0   :  { %s1370_s12 = smov 0   ;;  %s1372_s13 = smov 0   ;;  %s1519_s0 = inlined_call_operand.vmem [shape: bf16[2,25,25,12], index: 0, kind: input, shape index: {}]   ;;  %s1520_s1 = inlined_call_operand.vmem [shape: bf16[9,12,16], index: 1, kind: input, shape index: {}]   ;;  %s1521_s2 = inlined_call_operand.vmem [shape: f32[1,16], index: 2, kind: input, shape index: {}]   ;;  %s1522_s3 = inlined_call_operand.vmem [shape: bf16[2,23,23,16], index: 3, kind: output, shape index: {}]  }
   0x1   :  { %s1374_s14 = smov 0   ;;  %s1376_s15 = smov 0  }
   0x2   :  { %s1378_s16 = smov 0  }
   0x3 LB: > { %s22_s17 = sadd.s32 1, %s1340_s14  ;;  %s25_s18 = sadd.s32 1, %s1344_s15  ;;  %s1348_s16 = sphi %s1378_s16, %s13_s16   ;;  %s1344_s15 = sphi %s1376_s15, %s1526_s15   ;;  %s1340_s14 = sphi %s1374_s14, %s1525_s14   ;;  %s1336_s13 = sphi %s1372_s13, %s1524_s13   ;;  %s1332_s12 = sphi %s1370_s12, %s1523_s12  }
   0x4   : > { %p23_p0 = scmp.ge.s32.totalorder %s22_s17, 23  ;;  %p1070_p1 = scmp.ge.s32.totalorder %s1348_s16, 1 }
   0x5   : > { %p151_p2 = scmp.lt.s32.totalorder %s1348_s16, 47 }
   0x6   : > { %s1528_s17 = smov (%p23_p0, %s22_s17), 0  ;;  %s1530_s18 = smov (!%p23_p0, %s25_s18), %s1344_s15 }
   0x7   : > { %p152_p3 = pnand %p1070_p1, %p151_p2  ;;  %p27_p4 = scmp.ge.s32.totalorder %s1530_s18, 2 }
   0x8   : > { %v1289_v0 = vld [vmem:[%s1520_s1 + $0x8] sm:$0x3f] (!%p152_p3)   ;;  %vm241_vm0 = vcmask (!%p152_p3), 1045504   ;;  %p179_p5 = scmp.lt.s32.totalorder (!%p152_p3), %s1336_s13, 1  ;;  %v1290_v2 = vld [vmem:[%s1520_s1] sm:$0x3f] (!%p152_p3)  }
   0x9   : > { %s1532_s18 = smov (%p27_p4, %s1530_s18), 0  ;;  %155 = sbr.rel (%p152_p3) target bundleno = 286 (0x11e), region = 32 }
   0xa   : > { %1237 = vmatprep.subr.msk.bf16.mxu0 (!%p152_p3), %vm241_vm0, %v1289_v0  ;;  %v243_v1 = vsel (!%p152_p3), %vm241_vm0, %v1289_v0, 0  ;;  %1238 = vmatprep.subr.msk.bf16.mxu1 (!%p152_p3), %vm241_vm0, %v1290_v2  ;;  %v303_v3 = vsel (!%p152_p3), %vm241_vm0, %v1290_v2, 0  ;;  %v1293_v4 = vld [vmem:[%s1520_s1 + $0x10] sm:$0x3f] (!%p152_p3)   ;;  %s1152_s26 = sshll.u32 (!%p152_p3), %s1332_s12, 4  ;;  %vm234_vm2 = vcmask (!%p152_p3), 97280  }
   0xb   : > { %1184 = vmatpush3.bf16.msra.mxu0 (!%p152_p3), %v243_v1  ;;  %1190 = vmatpush3.bf16.msra.mxu1 (!%p152_p3), %v303_v3  ;;  %v1294_v5 = vld [vmem:[%s1520_s1 + $0x18] sm:$0x3f] (!%p152_p3)   ;;  %vm213_vm1 = vsmask.f32 (!%p152_p3), 7424  ;;  %v1300_v6 = vld [vmem:[%s1520_s1 + $0x28] sm:$0x3f] (!%p152_p3)  }
   0xc   : > { %1239 = vmatprep.subr.msk.bf16.mxu0 (!%p152_p3), %vm241_vm0, %v1293_v4  ;;  %1240 = vmatprep.subr.msk.bf16.mxu1 (!%p152_p3), %vm241_vm0, %v1294_v5  ;;  %v469_v9 = vsel (!%p152_p3), %vm241_vm0, %v1294_v5, 0  ;;  %vm370_vm3 = vcmask (!%p152_p3), 1046528   ;;  %v1297_v24 = vld [vmem:[%s1520_s1 + $0x20] sm:$0x3f] (!%p152_p3)   ;;  %v386_v26 = vsel (!%p152_p3), %vm241_vm0, %v1293_v4, 0  ;;  %v635_v35 = vsel (!%p152_p3), %vm241_vm0, %v1300_v6, 0 }
   0xd   : > { %v1304_v37 = vld [vmem:[%s1520_s1 + $0x38] sm:$0x3f] (!%p152_p3)   ;;  %v550_v47 = vsel (!%p152_p3), %vm241_vm0, %v1297_v24, 0  ;;  %v1301_v49 = vld [vmem:[%s1520_s1 + $0x30] sm:$0x3f] (!%p152_p3)   ;;  %p186_p6 = scmp.lt.s32.totalorder (!%p152_p3), %s1332_s12, 22 }
   0xe   : > { %v799_v53 = vsel (!%p152_p3), %vm241_vm0, %v1304_v37, 0  ;;  %v718_v57 = vsel (!%p152_p3), %vm241_vm0, %v1301_v49, 0  ;;  %v1306_v58 = vld [vmem:[%s1520_s1 + $0x40] sm:$0x3f] (!%p152_p3)   ;;  %vm963_vm4 = vcmask (!%p152_p3), 125952  }
   0xf   : > { %v884_v0 = vsel (!%p152_p3), %vm241_vm0, %v1306_v58, 0  ;;  %vm967_vm5 = vsmask.f32 (!%p152_p3), 3328 }
  0x10   : > { %s1534_s13 = smov (!%p179_p5, %s1336_s13), 1  ;;  %s1536_s12 = smov (!%p186_p6, %s1332_s12), 22  ;;  %vm968_vm6 = vmand %vm963_vm4, %vm967_vm5 }
  0x11   : > { %s1246_s25 = smul.u32 400, %s1534_s13 }
  0x12   : > { %s1248_s23 = smul.u32 69, %s1534_s13 }
  0x13   : > { %s183_s4 = scalar_lea.vmem %s1519_s0, %s1246_s25  ;;  %s1247_s24 = smul.u32 3, %s1536_s12 }
  0x14   : > { %s1427_s5 = scalar_lea.vmem %s183_s4, %s1152_s26 }
  0x15   : > { %v1291_v7 = vld [vmem:[%s1427_s5] sm:$0xff]   ;;  %v1292_v8 = vld [vmem:[%s1427_s5 + $0x8] ss:$0 sps:$4 sm:$0xff]   ;;  %v1298_v19 = vld [vmem:[%s1427_s5 + $0x10] sm:$0xff]   ;;  %s190_s25 = sadd.s32 %s1248_s23, %s1247_s24 }
  0x16   : > { %v215_v10 = vshrl.u32 %v1291_v7, 16  ;;  %v217_v11 = vshll.u32 %v1291_v7, 16  ;;  %v222_v12 = vshll.u32 %v1292_v8, 16  ;;  %v226_v13 = vshrl.u32 %v1292_v8, 16  ;;  %1191 = vmatprep.mubr.msk.bf16.mxu1 %vm234_vm2, %v1291_v7  ;;  %v1295_v14 = vld [vmem:[%s1427_s5] sm:$0xfe]  }
  0x17   : > { %1192 = vmatmul.mubr.msk.bf16.vlgmr.msra.gmra.mrb[0].mxu1 %vm234_vm2, %v1292_v8  ;;  %v1296_v15 = vld [vmem:[%s1427_s5 + $0x8] sm:$0x1f]   ;;  %v371_v18 = vrot.slane %v1295_v14, 1  ;;  %v1299_v21 = vld [vmem:[%s1427_s5 + $0x18] ss:$0 sps:$4 sm:$0xff]   ;;  %v527_v25 = vshll.u32 %v1298_v19, 16 }
  0x18   : > { %v219_v16 = vrot.slane %v217_v11, 1  ;;  %v224_v17 = vrot.slane %v222_v12, 1  ;;  %1202 = vmatpush3.bf16.msra.mxu1 %v469_v9  ;;  %v372_v20 = vrot.slane %v1296_v15, 1  ;;  %1203 = vmatprep.mubr.msk.bf16.mxu1 %vm234_vm2, %v1298_v19  ;;  %v531_v27 = vshll.u32 %v1299_v21, 16  ;;  %v1302_v32 = vld [vmem:[%s1427_s5 + $0x10] sm:$0xfe]  }
  0x19   : > { %1242 = vmatprep.subr.msk.bf16.mxu1 %vm241_vm0, %v1300_v6  ;;  %v525_v30 = vshrl.u32 %v1298_v19, 16  ;;  %v529_v31 = vrot.slane %v527_v25, 1  ;;  %v1303_v33 = vld [vmem:[%s1427_s5 + $0x18] sm:$0x1f]   ;;  %v1305_v34 = vld [vmem:[%s1427_s5 + $0x20] sm:$0xff]   ;;  %v620_v36 = vrot.slane %v1302_v32, 1 }
  0x1a   : > { %v220_v22 = vor.u32 %v219_v16, %v215_v10  ;;  %v228_v23 = vor.u32 %v226_v13, %v224_v17  ;;  %v373_v29 = vsel %vm370_vm3, %v371_v18, %v372_v20  ;;  %v533_v38 = vrot.slane %v531_v27, 1  ;;  %v1307_v44 = vld [vmem:[%s1427_s5 + $0x28] ss:$0 sps:$4 sm:$0xff]   ;;  %v1308_v60 = vld [vmem:[%s1427_s5 + $0x20] sm:$0xfe]   ;;  %s1072_s26 = sshll.u32 %s190_s25, 2 }
  0x1b   : > { %v621_v39 = vrot.slane %v1303_v33, 1  ;;  %v530_v40 = vor.u32 %v529_v31, %v525_v30  ;;  %v774_v41 = vshrl.u32 %v1305_v34, 16  ;;  %v776_v42 = vshll.u32 %v1305_v34, 16  ;;  %v1309_v61 = vld [vmem:[%s1427_s5 + $0x28] sm:$0x1f]   ;;  %s192_s29 = scalar_lea.vmem %s1522_s3, %s1072_s26 }
  0x1c   : > { %v225_v28 = vsel %vm213_vm1, %v220_v22, %v224_v17  ;;  %v780_v46 = vshll.u32 %v1307_v44, 16  ;;  %v535_v52 = vshrl.u32 %v1299_v21, 16  ;;  %v784_v55 = vshrl.u32 %v1307_v44, 16 }
  0x1d   : > { %1185 = vmatprep.mubr.msk.bf16.mxu0 %vm234_vm2, %v225_v28  ;;  %v622_v43 = vsel %vm370_vm3, %v620_v36, %v621_v39  ;;  %v778_v45 = vrot.slane %v776_v42, 1  ;;  %v534_v48 = vsel %vm213_vm1, %v530_v40, %v533_v38  ;;  %v869_v62 = vrot.slane %v1308_v60, 1 }
  0x1e   : > { %1186 = vmatmul.mubr.msk.bf16.vlgmr.msra.gmra.mrb[0].mxu0 %vm234_vm2, %v228_v23  ;;  %v782_v51 = vrot.slane %v780_v46, 1  ;;  %v537_v56 = vor.u32 %v535_v52, %v533_v38  ;;  %v870_v63 = vrot.slane %v1309_v61, 1 }
  0x1f   : > { %1196 = vmatpush3.bf16.msra.mxu0 %v386_v26  ;;  %1197 = vmatprep.mubr.msk.bf16.mxu0 %vm234_vm2, %v373_v29  ;;  %v779_v50 = vor.u32 %v778_v45, %v774_v41 }
  0x20   : > { %1241 = vmatprep.subr.msk.bf16.mxu0 %vm241_vm0, %v1297_v24  ;;  %1204 = vmatmul.mubr.msk.bf16.vlgmr.msra.gmra.mrb[4].mxu1 %vm234_vm2, %v1299_v21  ;;  %v786_v59 = vor.u32 %v784_v55, %v782_v51  ;;  %v871_v1 = vsel %vm370_vm3, %v869_v62, %v870_v63 }
  0x21   : > { %1214 = vmatpush3.bf16.msra.mxu1 %v635_v35  ;;  %1215 = vmatprep.mubr.msk.bf16.mxu1 %vm234_vm2, %v622_v43  ;;  %v783_v54 = vsel %vm213_vm1, %v779_v50, %v782_v51 }
  0x22   : > { %1244 = vmatprep.subr.msk.bf16.mxu1 %vm241_vm0, %v1304_v37 }
  0x26   : > { %1198 = vmatmul.mubr.msk.bf16.vlgmr.msra.gmra.mrb[4].mxu0 %vm234_vm2, %v372_v20 }
  0x27   : > { %1208 = vmatpush3.bf16.msra.mxu0 %v550_v47  ;;  %1209 = vmatprep.mubr.msk.bf16.mxu0 %vm234_vm2, %v534_v48 }
  0x28   : > { %1243 = vmatprep.subr.msk.bf16.mxu0 %vm241_vm0, %v1301_v49  ;;  %1216 = vmatmul.mubr.msk.bf16.vlgmr.msra.gmra.mrb[8].mxu1 %vm234_vm2, %v621_v39 }
  0x29   : > { %1226 = vmatpush3.bf16.msra.mxu1 %v799_v53  ;;  %1227 = vmatprep.mubr.msk.bf16.mxu1 %vm234_vm2, %v783_v54 }
  0x2e   : > { %1210 = vmatmul.mubr.msk.bf16.vlgmr.msra.gmra.mrb[8].mxu0 %vm234_vm2, %v537_v56  ;;  %v1146_v56 = vld [vmem:[%s1521_s2] ss:$0 sm:$0xff] }
  0x2f   : > { %1220 = vmatpush3.bf16.msra.mxu0 %v718_v57  ;;  %1221 = vmatprep.mubr.msk.bf16.mxu0 %vm234_vm2, %v1305_v34 }
  0x30   : > { %1245 = vmatprep.subr.msk.bf16.mxu0 %vm241_vm0, %v1306_v58  ;;  %1228 = vmatmul.mubr.msk.bf16.vlgmr.msra.gmra.mrb[12].mxu1 %vm234_vm2, %v786_v59 }
  0x36   : > { %1222 = vmatmul.mubr.msk.bf16.vlgmr.msra.gmra.mrb[12].mxu0 %vm234_vm2, %v1307_v44 }
  0x37   : > { %1232 = vmatpush3.bf16.msra.mxu0 %v884_v0  ;;  %1233 = vmatprep.mubr.msk.bf16.mxu0 %vm234_vm2, %v871_v1 }
  0x3e   : > { %1234 = vmatmul.mubr.msk.bf16.vlgmr.msra.gmra.mrb[16].mxu0 %vm234_vm2, %v870_v63 }
  0xea   : > { %v1193_v2 = vpop.f32.mrb[0].mxu1 }
  0xeb   : > { %v339_v3 = vpop.f32.mrb[1].mxu1 }
  0xec   : > { %v1194_v4 = vpop.f32.mrb[2].mxu1 }
  0xed   : > { %v342_v5 = vpop.f32.mrb[3].mxu1 }
  0xf1   : > { %v1187_v6 = vpop.f32.mrb[0].mxu0 }
  0xf2   : > { %v348_v7 = vadd.f32 %v1193_v2, %v1187_v6  ;;  %v279_v8 = vpop.f32.mrb[1].mxu0  ;;  %v969_v2 = vld [vmem:[%s192_s29 + $0x8] sm:$0xf] }
  0xf3   : > { %v340_v9 = vadd.f32 %v339_v3, %v279_v8  ;;  %v1188_v10 = vpop.f32.mrb[2].mxu0  ;;  %v1205_v11 = vpop.f32.mrb[4].mxu1 }
  0xf4   : > { %v282_v12 = vpop.f32.mrb[3].mxu0  ;;  %v505_v13 = vpop.f32.mrb[5].mxu1 }
  0xf5   : > { %v343_v14 = vadd.f32 %v342_v5, %v282_v12  ;;  %v1206_v15 = vpop.f32.mrb[6].mxu1 }
  0xf6   : > { %v508_v16 = vpop.f32.mrb[7].mxu1 }
  0xf9   : > { %v1199_v17 = vpop.f32.mrb[4].mxu0 }
  0xfa   : > { %v438_v18 = vadd.f32 %v1199_v17, %v348_v7  ;;  %v422_v19 = vpop.f32.mrb[5].mxu0 }
  0xfb   : > { %v436_v20 = vadd.f32 %v422_v19, %v340_v9  ;;  %v1200_v21 = vpop.f32.mrb[6].mxu0  ;;  %v1217_v22 = vpop.f32.mrb[8].mxu1 }
  0xfc   : > { %v521_v23 = vadd.f32 %v1205_v11, %v438_v18  ;;  %v425_v24 = vpop.f32.mrb[7].mxu0  ;;  %v671_v25 = vpop.f32.mrb[9].mxu1 }
  0xfd   : > { %v437_v26 = vadd.f32 %v425_v24, %v343_v14  ;;  %v519_v27 = vadd.f32 %v505_v13, %v436_v20  ;;  %v1218_v28 = vpop.f32.mrb[10].mxu1 }
  0xfe   : > { %v674_v29 = vpop.f32.mrb[11].mxu1 }
  0xff   : > { %v520_v30 = vadd.f32 %v508_v16, %v437_v26 }
 0x101   : > { %v1211_v31 = vpop.f32.mrb[8].mxu0 }
 0x102   : > { %v602_v32 = vadd.f32 %v1211_v31, %v521_v23  ;;  %v586_v33 = vpop.f32.mrb[9].mxu0 }
 0x103   : > { %v600_v34 = vadd.f32 %v586_v33, %v519_v27  ;;  %v1212_v35 = vpop.f32.mrb[10].mxu0  ;;  %v1229_v36 = vpop.f32.mrb[12].mxu1 }
 0x104   : > { %v687_v37 = vadd.f32 %v1217_v22, %v602_v32  ;;  %v589_v38 = vpop.f32.mrb[11].mxu0  ;;  %v835_v39 = vpop.f32.mrb[13].mxu1 }
 0x105   : > { %v601_v40 = vadd.f32 %v589_v38, %v520_v30  ;;  %v685_v41 = vadd.f32 %v671_v25, %v600_v34  ;;  %v1230_v42 = vpop.f32.mrb[14].mxu1 }
 0x106   : > { %v838_v43 = vpop.f32.mrb[15].mxu1 }
 0x107   : > { %v686_v44 = vadd.f32 %v674_v29, %v601_v40 }
 0x109   : > { %v1223_v45 = vpop.f32.mrb[12].mxu0 }
 0x10a   : > { %v770_v46 = vadd.f32 %v1223_v45, %v687_v37  ;;  %v754_v47 = vpop.f32.mrb[13].mxu0 }
 0x10b   : > { %v768_v48 = vadd.f32 %v754_v47, %v685_v41  ;;  %v1224_v49 = vpop.f32.mrb[14].mxu0 }
 0x10c   : > { %v851_v50 = vadd.f32 %v1229_v36, %v770_v46  ;;  %v757_v51 = vpop.f32.mrb[15].mxu0 }
 0x10d   : > { %v769_v52 = vadd.f32 %v757_v51, %v686_v44  ;;  %v849_v53 = vadd.f32 %v835_v39, %v768_v48 }
 0x10f   : > { %v850_v54 = vadd.f32 %v838_v43, %v769_v52 }
 0x111   : > { %v1235_v55 = vpop.f32.mrb[16].mxu0 }
 0x112   : > { %v936_v57 = vadd.f32 %v1235_v55, %v851_v50  ;;  %v920_v58 = vpop.f32.mrb[17].mxu0 }
 0x113   : > { %v934_v59 = vadd.f32 %v920_v58, %v849_v53  ;;  %v1236_v60 = vpop.f32.mrb[18].mxu0 }
 0x114   : > { %v946_v61 = vadd.f32 %v1146_v56, %v936_v57  ;;  %v923_v62 = vpop.f32.mrb[19].mxu0 }
 0x115   : > { %v944_v63 = vadd.f32 %v1146_v56, %v934_v59  ;;  %v935_v0 = vadd.f32 %v923_v62, %v850_v54 }
 0x116   : > { %v949_v1 = vmax.f32 %v946_v61, 0.0 }
 0x117   : > { %v947_v3 = vmax.f32 %v944_v63, 0.0  ;;  %v945_v4 = vadd.f32 %v1146_v56, %v935_v0 }
 0x118   : > { %v1155_v5 = vpack.c.bf16 %v949_v1, %v949_v1 }
 0x119   : > { %v1153_v6 = vpack.c.bf16 %v947_v3, %v947_v3  ;;  %v948_v7 = vmax.f32 %v945_v4, 0.0 }
 0x11a   : > { %v970_v8 = vsel %vm968_vm6, %v1155_v5, %v969_v2 }
 0x11b   : > { %971 = vst [vmem:[%s192_s29 + $0x8] sm:$0xf] %v970_v8  ;;  %964 = vst.msk [vmem:[%s192_s29] sm:$0xf] %vm963_vm4, %v1153_v6  ;;  %v1154_v9 = vpack.c.bf16 %v948_v7, %v948_v7 }
 0x11d   : > { %965 = vst.msk [vmem:[%s192_s29 + $0x4] sm:$0xf] %vm963_vm4, %v1154_v9 }
 0x11e PF: > { %s13_s16 = sadd.s32 1, %s1348_s16   ;;  %s1523_s12 = smov %s1340_s14 }
 0x11f   : > { %p10_p7 = scmp.ge.s32.totalorder %s13_s16, 48   ;;  %s1524_s13 = smov %s1344_s15 }
 0x120   : > { %s1525_s14 = smov %s1528_s17  ;;  %s1526_s15 = smov %s1532_s18 }
 0x121   :  { %12 = sbr.rel (!%p10_p7) target bundleno = 3 (0x3), region = 73 }

// kernel: conv2d_module_forward.6
= control target key start
LH: loop header
LB: loop body
LE: loop exit
PB: predicated region body
PF: predicated region fallthrough
CT: control target
= control target key end

     0   :  { %s1548_s12 = smov 0   ;;  %s1550_s13 = smov 0   ;;  %s1800_s0 = inlined_call_operand.vmem [shape: bf16[2,12,12,64], index: 0, kind: input, shape index: {}]   ;;  %s1801_s1 = inlined_call_operand.vmem [shape: bf16[9,64,32], index: 1, kind: input, shape index: {}]   ;;  %s1802_s2 = inlined_call_operand.vmem [shape: f32[1,32], index: 2, kind: input, shape index: {}]   ;;  %s1803_s3 = inlined_call_operand.vmem [shape: bf16[2,10,10,32], index: 3, kind: output, shape index: {}]  }
   0x1   :  { %s1552_s14 = smov 0   ;;  %s1554_s15 = smov 0  }
   0x2   :  { %s1556_s16 = smov 0  }
   0x3 LB: > { %s22_s17 = sadd.s32 1, %s1516_s14  ;;  %s25_s18 = sadd.s32 1, %s1520_s15  ;;  %s1524_s16 = sphi %s1556_s16, %s13_s16   ;;  %s1520_s15 = sphi %s1554_s15, %s1807_s15   ;;  %s1516_s14 = sphi %s1552_s14, %s1806_s14   ;;  %s1512_s13 = sphi %s1550_s13, %s1805_s13   ;;  %s1508_s12 = sphi %s1548_s12, %s1804_s12  }
   0x4   : > { %p23_p0 = scmp.ge.s32.totalorder %s22_s17, 10  ;;  %p1102_p1 = scmp.ge.s32.totalorder %s1524_s16, 1 }
   0x5   : > { %p151_p2 = scmp.lt.s32.totalorder %s1524_s16, 21 }
   0x6   : > { %s1809_s17 = smov (%p23_p0, %s22_s17), 0  ;;  %s1811_s18 = smov (!%p23_p0, %s25_s18), %s1520_s15 }
   0x7   : > { %p152_p3 = pnand %p1102_p1, %p151_p2  ;;  %p27_p4 = scmp.ge.s32.totalorder %s1811_s18, 2 }
   0x8   : > { %v1441_v0 = vld [vmem:[%s1801_s1 + $0x20] sm:$0xff] (!%p152_p3)   ;;  %v1526_v1 = vmov (!%p152_p3), 0.0   ;;  %v1443_v3 = vld [vmem:[%s1801_s1 + $0x28] sm:$0xff] (!%p152_p3)   ;;  %vm1527_vm0 = vmmov (!%p152_p3), 0   ;;  %p179_p5 = scmp.lt.s32.totalorder (!%p152_p3), %s1512_s13, 1  ;;  %s1241_s27 = sshll.u32 (!%p152_p3), %s1508_s12, 3 }
   0x9   : > { %s1813_s18 = smov (%p27_p4, %s1811_s18), 0  ;;  %155 = sbr.rel (%p152_p3) target bundleno = 317 (0x13d), region = 32 }
   0xa   : > { %1289 = vmatprep.subr.bf16.mxu0 (!%p152_p3), %v1526_v1  ;;  %1301 = vmatprep.subr.bf16.mxu1 (!%p152_p3), %v1526_v1  ;;  %v1442_v2 = vld [vmem:[%s1801_s1] sm:$0xff] (!%p152_p3)   ;;  %v1444_v4 = vld [vmem:[%s1801_s1 + $0x8] sm:$0xff] (!%p152_p3)   ;;  %v1445_v5 = vld [vmem:[%s1801_s1 + $0x30] sm:$0xff] (!%p152_p3)   ;;  %vm253_vm1 = vcmask (!%p152_p3), 523264   ;;  %p186_p6 = scmp.lt.s32.totalorder (!%p152_p3), %s1508_s12, 9  ;;  %vm1000_vm2 = vcmask (!%p152_p3), 257024  }
   0xb   : > { %1290 = vmatpush3.bf16.msra.mxu0 (!%p152_p3), %v1441_v0  ;;  %1297 = vmatprep.mubr.msk.bf16.mxu0 (!%p152_p3), %vm1527_vm0, %v1526_v1  ;;  %v1446_v6 = vld [vmem:[%s1801_s1 + $0x10] sm:$0xff] (!%p152_p3)   ;;  %v1447_v7 = vld [vmem:[%s1801_s1 + $0x38] sm:$0xff] (!%p152_p3)   ;;  %v1452_v17 = vld [vmem:[%s1801_s1 + $0x60] sm:$0xff] (!%p152_p3)   ;;  %vm1002_vm3 = vcmask (!%p152_p3), 253952  }
   0xc   : > { %1302 = vmatpush3.bf16.msra.mxu1 (!%p152_p3), %v1442_v2  ;;  %1291 = vmatprep.subr.bf16.mxu0 (!%p152_p3), %v1526_v1  ;;  %v1448_v8 = vld [vmem:[%s1801_s1 + $0x18] sm:$0xff] (!%p152_p3)   ;;  %v1451_v18 = vld [vmem:[%s1801_s1 + $0x40] sm:$0xff] (!%p152_p3)   ;;  %v1454_v20 = vld [vmem:[%s1801_s1 + $0x68] sm:$0xff] (!%p152_p3)  }
   0xd   : > { %1303 = vmatprep.subr.bf16.mxu1 (!%p152_p3), %v1526_v1  ;;  %1309 = vmatprep.mubr.msk.bf16.mxu1 (!%p152_p3), %vm1527_vm0, %v1526_v1  ;;  %v1453_v21 = vld [vmem:[%s1801_s1 + $0x48] sm:$0xff] (!%p152_p3)   ;;  %v1455_v22 = vld [vmem:[%s1801_s1 + $0x50] sm:$0xff] (!%p152_p3)   ;;  %v1458_v25 = vld [vmem:[%s1801_s1 + $0x78] sm:$0xff] (!%p152_p3)  }
   0xe   : > { %v1456_v23 = vld [vmem:[%s1801_s1 + $0x70] sm:$0xff] (!%p152_p3)   ;;  %v1457_v29 = vld [vmem:[%s1801_s1 + $0x58] sm:$0xff] (!%p152_p3)   ;;  %v1463_v33 = vld [vmem:[%s1801_s1 + $0xa0] sm:$0xff] (!%p152_p3)  }
   0xf   : > { %1292 = vmatpush3.bf16.msra.mxu0 (!%p152_p3), %v1443_v3  ;;  %v1460_v34 = vld [vmem:[%s1801_s1 + $0x80] sm:$0xff] (!%p152_p3)   ;;  %v1465_v36 = vld [vmem:[%s1801_s1 + $0xa8] sm:$0xff] (!%p152_p3)   ;;  %v1467_v38 = vld [vmem:[%s1801_s1 + $0xb0] sm:$0xff] (!%p152_p3)  }
  0x10   : > { %s1815_s13 = smov (!%p179_p5, %s1512_s13), 1  ;;  %1304 = vmatpush3.bf16.msra.mxu1 %v1444_v4  ;;  %1293 = vmatprep.subr.bf16.mxu0 %v1526_v1  ;;  %v1464_v37 = vld [vmem:[%s1801_s1 + $0x88] sm:$0xff]   ;;  %v1466_v41 = vld [vmem:[%s1801_s1 + $0x90] sm:$0xff]   ;;  %v1469_v43 = vld [vmem:[%s1801_s1 + $0xb8] sm:$0xff]   ;;  %s1817_s12 = smov (!%p186_p6, %s1508_s12), 9 }
  0x11   : > { %s1397_s30 = smul.u32 96, %s1815_s13  ;;  %1305 = vmatprep.subr.bf16.mxu1 %v1526_v1  ;;  %v1468_v46 = vld [vmem:[%s1801_s1 + $0x98] sm:$0xff]   ;;  %v1472_v49 = vld [vmem:[%s1801_s1 + $0xe0] sm:$0xff]   ;;  %v1474_v54 = vld [vmem:[%s1801_s1 + $0xe8] sm:$0xff]   ;;  %s1104_s20 = sshll.u32 %s1817_s12, 1 }
  0x12   : > { %v1470_v52 = vld [vmem:[%s1801_s1 + $0xc0] sm:$0xff]   ;;  %v1473_v55 = vld [vmem:[%s1801_s1 + $0xc8] sm:$0xff]   ;;  %v1476_v57 = vld [vmem:[%s1801_s1 + $0xf0] sm:$0xff]  }
  0x13   : > { %s183_s8 = scalar_lea.vmem %s1800_s0, %s1397_s30  ;;  %1294 = vmatpush3.bf16.msra.mxu0 %v1445_v5  ;;  %v1475_v58 = vld [vmem:[%s1801_s1 + $0xd0] sm:$0xff]   ;;  %v1478_v61 = vld [vmem:[%s1801_s1 + $0xf8] sm:$0xff]   ;;  %v1481_v3 = vld [vmem:[%s1801_s1 + $0x100] sm:$0xff]  }
  0x14   : > { %s1622_s11 = scalar_lea.vmem %s183_s8, %s1241_s27  ;;  %1306 = vmatpush3.bf16.msra.mxu1 %v1446_v6  ;;  %1295 = vmatprep.subr.bf16.mxu0 %v1526_v1  ;;  %v1477_v62 = vld [vmem:[%s1801_s1 + $0xd8] sm:$0xff]   ;;  %v1482_v4 = vld [vmem:[%s1801_s1 + $0x108] sm:$0xff]   ;;  %v1483_v5 = vld [vmem:[%s1801_s1 + $0x110] sm:$0xff]  }
  0x15   : > { %v197_v9 = vld [vmem:[%s1622_s11] sm:$0xf]  ;;  %v207_v10 = vld [vmem:[%s1622_s11 + $0x4] sm:$0x3]  ;;  %1307 = vmatprep.subr.bf16.mxu1 %v1526_v1  ;;  %v1143_v27 = vld [vmem:[%s1622_s11 + $0x8] sm:$0xf] }
  0x16   : > { %v1116_v11 = vcombine.low %v197_v9, %v207_v10  ;;  %v198_v12 = vld [vmem:[%s1622_s11 + $0x4] sm:$0x1]  ;;  %v369_v24 = vld [vmem:[%s1622_s11] sm:$0xe]  ;;  %v1144_v28 = vld [vmem:[%s1622_s11 + $0xc] sm:$0x1] }
  0x17   : > { %1296 = vmatpush3.bf16.msra.mxu0 %v1447_v7  ;;  %v1122_v15 = vcombine.low %v197_v9, %v198_v12  ;;  %v1136_v26 = vcombine.low %v369_v24, %v207_v10  ;;  %v1153_v30 = vcombine.low %v1143_v27, %v1144_v28  ;;  %v1159_v31 = vld [vmem:[%s1622_s11 + $0xc] sm:$0x3]  ;;  %v1174_v40 = vld [vmem:[%s1622_s11 + $0x8] sm:$0xe]  ;;  %v1190_v50 = vld [vmem:[%s1622_s11 + $0x10] sm:$0xf] }
  0x18   : > { %v223_v13 = vshrl.u32 %v1116_v11, 16  ;;  %v225_v14 = vshll.u32 %v1116_v11, 16  ;;  %1308 = vmatpush3.bf16.msra.mxu1 %v1448_v8  ;;  %1313 = vmatprep.subr.bf16.mxu0 %v1526_v1  ;;  %v1168_v35 = vcombine.low %v1143_v27, %v1159_v31  ;;  %v1183_v42 = vcombine.low %v1174_v40, %v1159_v31  ;;  %v1206_v51 = vld [vmem:[%s1622_s11 + $0x14] sm:$0x3]  ;;  %v1221_v6 = vld [vmem:[%s1622_s11 + $0x10] sm:$0xe] }
  0x19   : > { %1325 = vmatprep.subr.bf16.mxu1 %v1526_v1  ;;  %v382_v32 = vrot.slane %v1136_v26, 1  ;;  %v1215_v53 = vcombine.low %v1190_v50, %v1206_v51  ;;  %v1191_v63 = vld [vmem:[%s1622_s11 + $0x14] sm:$0x1]  ;;  %v1230_v7 = vcombine.low %v1221_v6, %v1206_v51  ;;  %v1484_v8 = vld [vmem:[%s1801_s1 + $0x118] sm:$0xff]   ;;  %s1398_s11 = smul.u32 20, %s1815_s13 }
  0x1a   : > { %v227_v16 = vrot.slane %v225_v14, 1  ;;  %v559_v39 = vshll.u32 %v1168_v35, 16  ;;  %v557_v44 = vshrl.u32 %v1168_v35, 16  ;;  %v646_v47 = vrot.slane %v1183_v42, 1 }
  0x1b   : > { %1310 = vmatmul.mubr.msk.bf16.vlgmr.msra.gmra.mrb[0].mxu1 %vm253_vm1, %v1122_v15  ;;  %v823_v56 = vshll.u32 %v1215_v53, 16  ;;  %v821_v59 = vshrl.u32 %v1215_v53, 16  ;;  %v1200_v2 = vcombine.low %v1190_v50, %v1191_v63  ;;  %v910_v9 = vrot.slane %v1230_v7, 1  ;;  %s190_s21 = sadd.s32 %s1398_s11, %s1104_s20 }
  0x1c   : > { %v228_v19 = vor.u32 %v227_v16, %v223_v13  ;;  %1326 = vmatpush3.bf16.msra.mxu1 %v1452_v17  ;;  %1333 = vmatprep.mubr.msk.bf16.mxu1 %vm1527_vm0, %v1526_v1  ;;  %v561_v45 = vrot.slane %v559_v39, 1  ;;  %s1105_s24 = sshll.u32 %s190_s21, 2 }
  0x1d   : > { %1327 = vmatprep.subr.bf16.mxu1 %v1526_v1  ;;  %v825_v60 = vrot.slane %v823_v56, 1  ;;  %v1236_v56 = vld [vmem:[%s1802_s2] ss:$0 sm:$0xff]  ;;  %s192_s13 = scalar_lea.vmem %s1803_s3, %s1105_s24 }
  0x1e   : > { %1298 = vmatmul.mubr.msk.bf16.vlgmr.msra.gmra.mrb[0].mxu0 %vm253_vm1, %v228_v19  ;;  %v562_v48 = vor.u32 %v561_v45, %v557_v44 }
  0x1f   : > { %1314 = vmatpush3.bf16.msra.mxu0 %v1451_v18  ;;  %1321 = vmatprep.mubr.msk.bf16.mxu0 %vm1527_vm0, %v1526_v1  ;;  %v826_v0 = vor.u32 %v825_v60, %v821_v59 }
  0x20   : > { %1315 = vmatprep.subr.bf16.mxu0 %v1526_v1  ;;  %1328 = vmatpush3.bf16.msra.mxu1 %v1454_v20 }
  0x21   : > { %1329 = vmatprep.subr.bf16.mxu1 %v1526_v1 }
  0x23   : > { %1316 = vmatpush3.bf16.msra.mxu0 %v1453_v21 }
  0x24   : > { %1317 = vmatprep.subr.bf16.mxu0 %v1526_v1  ;;  %1330 = vmatpush3.bf16.msra.mxu1 %v1456_v23 }
  0x25   : > { %1331 = vmatprep.subr.bf16.mxu1 %v1526_v1 }
  0x27   : > { %1318 = vmatpush3.bf16.msra.mxu0 %v1455_v22 }
  0x28   : > { %1319 = vmatprep.subr.bf16.mxu0 %v1526_v1  ;;  %1332 = vmatpush3.bf16.msra.mxu1 %v1458_v25 }
  0x29   : > { %1349 = vmatprep.subr.bf16.mxu1 %v1526_v1 }
  0x2b   : > { %1320 = vmatpush3.bf16.msra.mxu0 %v1457_v29  ;;  %1334 = vmatmul.mubr.msk.bf16.vlgmr.msra.gmra.mrb[4].mxu1 %vm253_vm1, %v1153_v30 }
  0x2c   : > { %1337 = vmatprep.subr.bf16.mxu0 %v1526_v1  ;;  %1350 = vmatpush3.bf16.msra.mxu1 %v1463_v33 }
  0x2d   : > { %1351 = vmatprep.subr.bf16.mxu1 %v1526_v1  ;;  %1357 = vmatprep.mubr.msk.bf16.mxu1 %vm1527_vm0, %v1526_v1 }
  0x2e   : > { %1322 = vmatmul.mubr.msk.bf16.vlgmr.msra.gmra.mrb[4].mxu0 %vm253_vm1, %v382_v32 }
  0x2f   : > { %1338 = vmatpush3.bf16.msra.mxu0 %v1460_v34  ;;  %1345 = vmatprep.mubr.msk.bf16.mxu0 %vm1527_vm0, %v1526_v1 }
  0x30   : > { %1339 = vmatprep.subr.bf16.mxu0 %v1526_v1  ;;  %1352 = vmatpush3.bf16.msra.mxu1 %v1465_v36 }
  0x31   : > { %1353 = vmatprep.subr.bf16.mxu1 %v1526_v1 }
  0x33   : > { %1340 = vmatpush3.bf16.msra.mxu0 %v1464_v37 }
  0x34   : > { %1341 = vmatprep.subr.bf16.mxu0 %v1526_v1  ;;  %1354 = vmatpush3.bf16.msra.mxu1 %v1467_v38 }
  0x35   : > { %1355 = vmatprep.subr.bf16.mxu1 %v1526_v1 }
  0x37   : > { %1342 = vmatpush3.bf16.msra.mxu0 %v1466_v41 }
  0x38   : > { %1343 = vmatprep.subr.bf16.mxu0 %v1526_v1  ;;  %1356 = vmatpush3.bf16.msra.mxu1 %v1469_v43 }
  0x39   : > { %1373 = vmatprep.subr.bf16.mxu1 %v1526_v1 }
  0x3b   : > { %1344 = vmatpush3.bf16.msra.mxu0 %v1468_v46  ;;  %1358 = vmatmul.mubr.msk.bf16.vlgmr.msra.gmra.mrb[8].mxu1 %vm253_vm1, %v646_v47 }
  0x3c   : > { %1361 = vmatprep.subr.bf16.mxu0 %v1526_v1  ;;  %1374 = vmatpush3.bf16.msra.mxu1 %v1472_v49 }
  0x3d   : > { %1375 = vmatprep.subr.bf16.mxu1 %v1526_v1  ;;  %1381 = vmatprep.mubr.msk.bf16.mxu1 %vm1527_vm0, %v1526_v1 }
  0x3e   : > { %1346 = vmatmul.mubr.msk.bf16.vlgmr.msra.gmra.mrb[8].mxu0 %vm253_vm1, %v562_v48 }
  0x3f   : > { %1362 = vmatpush3.bf16.msra.mxu0 %v1470_v52  ;;  %1369 = vmatprep.mubr.msk.bf16.mxu0 %vm1527_vm0, %v1526_v1 }
  0x40   : > { %1363 = vmatprep.subr.bf16.mxu0 %v1526_v1  ;;  %1376 = vmatpush3.bf16.msra.mxu1 %v1474_v54 }
  0x41   : > { %1377 = vmatprep.subr.bf16.mxu1 %v1526_v1 }
  0x43   : > { %1364 = vmatpush3.bf16.msra.mxu0 %v1473_v55 }
  0x44   : > { %1365 = vmatprep.subr.bf16.mxu0 %v1526_v1  ;;  %1378 = vmatpush3.bf16.msra.mxu1 %v1476_v57 }
  0x45   : > { %1379 = vmatprep.subr.bf16.mxu1 %v1526_v1 }
  0x47   : > { %1366 = vmatpush3.bf16.msra.mxu0 %v1475_v58 }
  0x48   : > { %1367 = vmatprep.subr.bf16.mxu0 %v1526_v1  ;;  %1380 = vmatpush3.bf16.msra.mxu1 %v1478_v61 }
  0x4b   : > { %1368 = vmatpush3.bf16.msra.mxu0 %v1477_v62  ;;  %1382 = vmatmul.mubr.msk.bf16.vlgmr.msra.gmra.mrb[12].mxu1 %vm253_vm1, %v826_v0 }
  0x4c   : > { %1385 = vmatprep.subr.bf16.mxu0 %v1526_v1 }
  0x4e   : > { %1370 = vmatmul.mubr.msk.bf16.vlgmr.msra.gmra.mrb[12].mxu0 %vm253_vm1, %v1200_v2 }
  0x4f   : > { %1386 = vmatpush3.bf16.msra.mxu0 %v1481_v3  ;;  %1393 = vmatprep.mubr.msk.bf16.mxu0 %vm1527_vm0, %v1526_v1 }
  0x50   : > { %1387 = vmatprep.subr.bf16.mxu0 %v1526_v1 }
  0x53   : > { %1388 = vmatpush3.bf16.msra.mxu0 %v1482_v4 }
  0x54   : > { %1389 = vmatprep.subr.bf16.mxu0 %v1526_v1 }
  0x57   : > { %1390 = vmatpush3.bf16.msra.mxu0 %v1483_v5 }
  0x58   : > { %1391 = vmatprep.subr.bf16.mxu0 %v1526_v1 }
  0x5b   : > { %1392 = vmatpush3.bf16.msra.mxu0 %v1484_v8 }
  0x5e   : > { %1394 = vmatmul.mubr.msk.bf16.vlgmr.msra.gmra.mrb[16].mxu0 %vm253_vm1, %v910_v9 }
  0xee   : > { %v362_v10 = vpop.f32.mrb[0].mxu1 }
  0xef   : > { %v1311_v12 = vpop.f32.mrb[1].mxu1 }
  0xf0   : > { %v365_v15 = vpop.f32.mrb[2].mxu1 }
  0xf1   : > { %v291_v11 = vpop.f32.mrb[0].mxu0  ;;  %v1312_v17 = vpop.f32.mrb[3].mxu1 }
  0xf2   : > { %v363_v13 = vadd.f32 %v362_v10, %v291_v11  ;;  %v1299_v14 = vpop.f32.mrb[1].mxu0 }
  0xf3   : > { %v294_v16 = vpop.f32.mrb[2].mxu0 }
  0xf4   : > { %v366_v18 = vadd.f32 %v365_v15, %v294_v16  ;;  %v1300_v19 = vpop.f32.mrb[3].mxu0 }
  0xfe   : > { %v534_v20 = vpop.f32.mrb[4].mxu1 }
  0xff   : > { %v1335_v22 = vpop.f32.mrb[5].mxu1 }
 0x100   : > { %v537_v1 = vpop.f32.mrb[6].mxu1 }
 0x101   : > { %v444_v21 = vpop.f32.mrb[4].mxu0  ;;  %v1336_v26 = vpop.f32.mrb[7].mxu1 }
 0x102   : > { %v451_v23 = vadd.f32 %v444_v21, %v363_v13  ;;  %v1323_v24 = vpop.f32.mrb[5].mxu0 }
 0x103   : > { %v447_v25 = vpop.f32.mrb[6].mxu0 }
 0x104   : > { %v452_v27 = vadd.f32 %v447_v25, %v366_v18  ;;  %v541_v28 = vadd.f32 %v534_v20, %v451_v23  ;;  %v1324_v29 = vpop.f32.mrb[7].mxu0 }
 0x106   : > { %v542_v30 = vadd.f32 %v537_v1, %v452_v27 }
 0x10e   : > { %v708_v31 = vpop.f32.mrb[8].mxu1 }
 0x10f   : > { %v1359_v33 = vpop.f32.mrb[9].mxu1 }
 0x110   : > { %v711_v36 = vpop.f32.mrb[10].mxu1 }
 0x111   : > { %v624_v32 = vpop.f32.mrb[8].mxu0  ;;  %v1360_v38 = vpop.f32.mrb[11].mxu1 }
 0x112   : > { %v631_v34 = vadd.f32 %v624_v32, %v541_v28  ;;  %v1347_v35 = vpop.f32.mrb[9].mxu0 }
 0x113   : > { %v627_v37 = vpop.f32.mrb[10].mxu0 }
 0x114   : > { %v632_v39 = vadd.f32 %v627_v37, %v542_v30  ;;  %v715_v40 = vadd.f32 %v708_v31, %v631_v34  ;;  %v1348_v41 = vpop.f32.mrb[11].mxu0 }
 0x116   : > { %v716_v42 = vadd.f32 %v711_v36, %v632_v39 }
 0x11e   : > { %v888_v43 = vpop.f32.mrb[12].mxu1 }
 0x11f   : > { %v1383_v45 = vpop.f32.mrb[13].mxu1 }
 0x120   : > { %v891_v48 = vpop.f32.mrb[14].mxu1 }
 0x121   : > { %v798_v44 = vpop.f32.mrb[12].mxu0  ;;  %v1384_v50 = vpop.f32.mrb[15].mxu1 }
 0x122   : > { %v805_v46 = vadd.f32 %v798_v44, %v715_v40  ;;  %v1371_v47 = vpop.f32.mrb[13].mxu0 }
 0x123   : > { %v801_v49 = vpop.f32.mrb[14].mxu0 }
 0x124   : > { %v806_v51 = vadd.f32 %v801_v49, %v716_v42  ;;  %v895_v52 = vadd.f32 %v888_v43, %v805_v46  ;;  %v1372_v53 = vpop.f32.mrb[15].mxu0 }
 0x126   : > { %v896_v54 = vadd.f32 %v891_v48, %v806_v51 }
 0x131   : > { %v972_v55 = vpop.f32.mrb[16].mxu0 }
 0x132   : > { %v979_v57 = vadd.f32 %v972_v55, %v895_v52  ;;  %v1395_v58 = vpop.f32.mrb[17].mxu0 }
 0x133   : > { %v975_v59 = vpop.f32.mrb[18].mxu0 }
 0x134   : > { %v988_v60 = vadd.f32 %v1236_v56, %v979_v57  ;;  %v980_v61 = vadd.f32 %v975_v59, %v896_v54  ;;  %v1396_v62 = vpop.f32.mrb[19].mxu0 }
 0x136   : > { %v990_v63 = vmax.f32 %v988_v60, 0.0  ;;  %v989_v0 = vadd.f32 %v1236_v56, %v980_v61 }
 0x138   : > { %v1242_v2 = vpack.c.bf16 %v990_v63, %v990_v63  ;;  %v991_v3 = vmax.f32 %v989_v0, 0.0 }
 0x13a   : > { %1001 = vst.msk [vmem:[%s192_s13] sm:$0xf] %vm1000_vm2, %v1242_v2  ;;  %v1243_v4 = vpack.c.bf16 %v991_v3, %v991_v3 }
 0x13c   : > { %1003 = vst.msk [vmem:[%s192_s13 + $0x4] sm:$0x1] %vm1002_vm3, %v1243_v4 }
 0x13d PF: > { %s13_s16 = sadd.s32 1, %s1524_s16   ;;  %s1804_s12 = smov %s1516_s14 }
 0x13e   : > { %p10_p7 = scmp.ge.s32.totalorder %s13_s16, 22   ;;  %s1805_s13 = smov %s1520_s15 }
 0x13f   : > { %s1806_s14 = smov %s1809_s17  ;;  %s1807_s15 = smov %s1813_s18 }
 0x140   :  { %12 = sbr.rel (!%p10_p7) target bundleno = 3 (0x3), region = 73 }

// kernel: conv2d_module_forward.7
= control target key start
LH: loop header
LB: loop body
LE: loop exit
PB: predicated region body
PF: predicated region fallthrough
CT: control target
= control target key end

     0   :  { %s1977_s12 = smov 0   ;;  %s1979_s13 = smov 0   ;;  %s2354_s0 = inlined_call_operand.vmem [shape: bf16[2,5,5,128], index: 0, kind: input, shape index: {}]   ;;  %s2355_s1 = inlined_call_operand.vmem [shape: bf16[9,128,64], index: 1, kind: input, shape index: {}]   ;;  %s2356_s2 = inlined_call_operand.vmem [shape: f32[1,64], index: 2, kind: input, shape index: {}]   ;;  %s2357_s3 = inlined_call_operand.vmem [shape: bf16[2,3,3,64], index: 3, kind: output, shape index: {}]  }
   0x1   :  { %s1981_s14 = smov 0   ;;  %s1983_s15 = smov 0  }
   0x2   :  { %s1985_s16 = smov 0  }
   0x3 LB: > { %s22_s17 = sadd.s32 1, %s1945_s14  ;;  %s25_s18 = sadd.s32 1, %s1949_s15  ;;  %s1953_s16 = sphi %s1985_s16, %s13_s16   ;;  %s1949_s15 = sphi %s1983_s15, %s2361_s15   ;;  %s1945_s14 = sphi %s1981_s14, %s2360_s14   ;;  %s1941_s13 = sphi %s1979_s13, %s2359_s13   ;;  %s1937_s12 = sphi %s1977_s12, %s2358_s12  }
   0x4   : > { %p23_p0 = scmp.ge.s32.totalorder %s22_s17, 3  ;;  %p1313_p1 = scmp.ge.s32.totalorder %s1953_s16, 1 }
   0x5   : > { %p151_p2 = scmp.lt.s32.totalorder %s1953_s16, 7 }
   0x6   : > { %s2363_s17 = smov (%p23_p0, %s22_s17), 0  ;;  %s2365_s18 = smov (!%p23_p0, %s25_s18), %s1949_s15 }
   0x7   : > { %p152_p3 = pnand %p1313_p1, %p151_p2  ;;  %p27_p4 = scmp.ge.s32.totalorder %s2365_s18, 2 }
   0x8   : > { %v1837_v0 = vld [vmem:[%s2355_s1 + $0x40] sm:$0xff] (!%p152_p3)   ;;  %v1955_v1 = vmov (!%p152_p3), 0.0   ;;  %v1839_v3 = vld [vmem:[%s2355_s1 + $0x48] sm:$0xff] (!%p152_p3)   ;;  %vm1956_vm0 = vmmov (!%p152_p3), 0   ;;  %p178_p5 = scmp.lt.s32.totalorder (!%p152_p3), %s1941_s13, 1  ;;  %v1841_v5 = vld [vmem:[%s2355_s1 + $0x50] sm:$0xff] (!%p152_p3)  }
   0x9   : > { %s2367_s18 = smov (%p27_p4, %s2365_s18), 0  ;;  %155 = sbr.rel (%p152_p3) target bundleno = 392 (0x188), region = 32 }
   0xa   : > { %1613 = vmatprep.subr.bf16.mxu0 (!%p152_p3), %v1955_v1  ;;  %1633 = vmatprep.subr.bf16.mxu1 (!%p152_p3), %v1955_v1  ;;  %v1838_v2 = vld [vmem:[%s2355_s1] sm:$0xff] (!%p152_p3)   ;;  %v1840_v4 = vld [vmem:[%s2355_s1 + $0x8] sm:$0xff] (!%p152_p3)   ;;  %v1842_v6 = vld [vmem:[%s2355_s1 + $0x10] sm:$0xff] (!%p152_p3)   ;;  %s1316_s10 = sshll.u32 (!%p152_p3), %s1937_s12, 2  ;;  %p185_p6 = scmp.lt.s32.totalorder (!%p152_p3), %s1937_s12, 2  ;;  %vm1215_vm1 = vcmask (!%p152_p3), 517120  }
   0xb   : > { %1614 = vmatpush3.bf16.msra.mxu0 (!%p152_p3), %v1837_v0  ;;  %1629 = vmatprep.mubr.msk.bf16.mxu0 (!%p152_p3), %vm1956_vm0, %v1955_v1  ;;  %v1843_v7 = vld [vmem:[%s2355_s1 + $0x58] sm:$0xff] (!%p152_p3)   ;;  %v1845_v9 = vld [vmem:[%s2355_s1 + $0x60] sm:$0xff] (!%p152_p3)   ;;  %v1847_v13 = vld [vmem:[%s2355_s1 + $0x68] sm:$0xff] (!%p152_p3)   ;;  %vm1216_vm2 = vsmask.f32 (!%p152_p3), 1280 }
   0xc   : > { %1634 = vmatpush3.bf16.msra.mxu1 (!%p152_p3), %v1838_v2  ;;  %1615 = vmatprep.subr.bf16.mxu0 (!%p152_p3), %v1955_v1  ;;  %v1844_v8 = vld [vmem:[%s2355_s1 + $0x18] sm:$0xff] (!%p152_p3)   ;;  %v1846_v10 = vld [vmem:[%s2355_s1 + $0x20] sm:$0xff] (!%p152_p3)   ;;  %v1848_v14 = vld [vmem:[%s2355_s1 + $0x28] sm:$0xff] (!%p152_p3)  }
   0xd   : > { %1635 = vmatprep.subr.bf16.mxu1 (!%p152_p3), %v1955_v1  ;;  %1649 = vmatprep.mubr.msk.bf16.mxu1 (!%p152_p3), %vm1956_vm0, %v1955_v1  ;;  %v1849_v16 = vld [vmem:[%s2355_s1 + $0x70] sm:$0xff] (!%p152_p3)   ;;  %v1851_v20 = vld [vmem:[%s2355_s1 + $0x78] sm:$0xff] (!%p152_p3)   ;;  %v1854_v23 = vld [vmem:[%s2355_s1 + $0x80] sm:$0xff] (!%p152_p3)  }
   0xe   : > { %v1850_v17 = vld [vmem:[%s2355_s1 + $0x30] sm:$0xff] (!%p152_p3)   ;;  %v1852_v21 = vld [vmem:[%s2355_s1 + $0x38] sm:$0xff] (!%p152_p3)   ;;  %v1855_v24 = vld [vmem:[%s2355_s1 + $0xc0] sm:$0xff] (!%p152_p3)  }
   0xf   : > { %1616 = vmatpush3.bf16.msra.mxu0 (!%p152_p3), %v1839_v3  ;;  %v1856_v25 = vld [vmem:[%s2355_s1 + $0x88] sm:$0xff] (!%p152_p3)   ;;  %v1858_v27 = vld [vmem:[%s2355_s1 + $0x90] sm:$0xff] (!%p152_p3)   ;;  %v1860_v29 = vld [vmem:[%s2355_s1 + $0x98] sm:$0xff] (!%p152_p3)  }
  0x10   : > { %s2369_s13 = smov (!%p178_p5, %s1941_s13), 1  ;;  %1636 = vmatpush3.bf16.msra.mxu1 %v1840_v4  ;;  %1617 = vmatprep.subr.bf16.mxu0 %v1955_v1  ;;  %v1857_v26 = vld [vmem:[%s2355_s1 + $0xc8] sm:$0xff]   ;;  %v1859_v28 = vld [vmem:[%s2355_s1 + $0xd0] sm:$0xff]   ;;  %v1861_v30 = vld [vmem:[%s2355_s1 + $0xd8] sm:$0xff]   ;;  %s2371_s12 = smov (!%p185_p6, %s1937_s12), 2 }
  0x11   : > { %s1793_s29 = smul.u32 20, %s2369_s13  ;;  %1637 = vmatprep.subr.bf16.mxu1 %v1955_v1  ;;  %v1862_v31 = vld [vmem:[%s2355_s1 + $0xa0] sm:$0xff]   ;;  %v1864_v33 = vld [vmem:[%s2355_s1 + $0xa8] sm:$0xff]   ;;  %v1866_v35 = vld [vmem:[%s2355_s1 + $0xb0] sm:$0xff]  }
  0x12   : > { %v1863_v32 = vld [vmem:[%s2355_s1 + $0xe0] sm:$0xff]   ;;  %v1865_v34 = vld [vmem:[%s2355_s1 + $0xe8] sm:$0xff]   ;;  %v1867_v36 = vld [vmem:[%s2355_s1 + $0xf0] sm:$0xff]  }
  0x13   : > { %1618 = vmatpush3.bf16.msra.mxu0 %v1841_v5  ;;  %s182_s9 = scalar_lea.vmem %s2354_s0, %s1793_s29  ;;  %v1868_v38 = vld [vmem:[%s2355_s1 + $0xb8] sm:$0xff]   ;;  %v1871_v41 = vld [vmem:[%s2355_s1 + $0x100] sm:$0xff]   ;;  %v1874_v44 = vld [vmem:[%s2355_s1 + $0x108] sm:$0xff]  }
  0x14   : > { %1638 = vmatpush3.bf16.msra.mxu1 %v1842_v6  ;;  %1619 = vmatprep.subr.bf16.mxu0 %v1955_v1  ;;  %s2052_s20 = scalar_lea.vmem %s182_s9, %s1316_s10  ;;  %v1869_v39 = vld [vmem:[%s2355_s1 + $0xf8] sm:$0xff]   ;;  %v1873_v43 = vld [vmem:[%s2355_s1 + $0x140] sm:$0xff]   ;;  %v1875_v45 = vld [vmem:[%s2355_s1 + $0x148] sm:$0xff]  }
  0x15   : > { %1639 = vmatprep.subr.bf16.mxu1 %v1955_v1  ;;  %v194_v11 = vld [vmem:[%s2052_s20] sm:$0x3]  ;;  %v1376_v42 = vld [vmem:[%s2052_s20 + $0x4] sm:$0x3]  ;;  %v1876_v46 = vld [vmem:[%s2355_s1 + $0x110] sm:$0xff]  }
  0x16   : > { %v1333_v12 = vcombine.low %v194_v11, %v194_v11  ;;  %v1870_v37 = vld [vmem:[%s2052_s20] ss:$0 sps:$4 sm:$0x66]   ;;  %v1877_v47 = vld [vmem:[%s2355_s1 + $0x150] sm:$0xff]   ;;  %v1878_v48 = vld [vmem:[%s2355_s1 + $0x118] sm:$0xff]   ;;  %v1417_v52 = vcombine.low %v1376_v42, %v1376_v42 }
  0x17   : > { %1620 = vmatpush3.bf16.msra.mxu0 %v1843_v7  ;;  %v436_v40 = vrot.slane %v1870_v37, 1  ;;  %v1879_v49 = vld [vmem:[%s2355_s1 + $0x158] sm:$0xff]   ;;  %v1880_v50 = vld [vmem:[%s2355_s1 + $0x120] sm:$0xff]   ;;  %v1882_v53 = vld [vmem:[%s2355_s1 + $0x128] sm:$0xff]  }
  0x18   : > { %1640 = vmatpush3.bf16.msra.mxu1 %v1844_v8  ;;  %1621 = vmatprep.subr.bf16.mxu0 %v1955_v1  ;;  %v234_v15 = vshll.u32 %v1333_v12, 16  ;;  %v232_v18 = vshrl.u32 %v1333_v12, 16  ;;  %v1881_v51 = vld [vmem:[%s2355_s1 + $0x160] sm:$0xff]   ;;  %v1883_v54 = vld [vmem:[%s2355_s1 + $0x168] sm:$0xff]   ;;  %v660_v55 = vshll.u32 %v1417_v52, 16  ;;  %v1884_v56 = vld [vmem:[%s2355_s1 + $0x130] sm:$0xff]  }
  0x19   : > { %1641 = vmatprep.subr.bf16.mxu1 %v1955_v1  ;;  %v1885_v57 = vld [vmem:[%s2355_s1 + $0x170] sm:$0xff]   ;;  %v658_v58 = vshrl.u32 %v1417_v52, 16  ;;  %v1886_v60 = vld [vmem:[%s2355_s1 + $0x138] sm:$0xff]   ;;  %v1889_v61 = vld [vmem:[%s2052_s20 + $0x4] ss:$0 sps:$4 sm:$0x66]  }
  0x1a   : > { %v236_v19 = vrot.slane %v234_v15, 1  ;;  %v662_v59 = vrot.slane %v660_v55, 1  ;;  %v1887_v62 = vld [vmem:[%s2355_s1 + $0x178] sm:$0xff]   ;;  %v1888_v0 = vld [vmem:[%s2355_s1 + $0x180] sm:$0xff]   ;;  %v775_v2 = vrot.slane %v1889_v61, 1  ;;  %v1891_v4 = vld [vmem:[%s2355_s1 + $0x188] sm:$0xff]  }
  0x1b   : > { %1622 = vmatpush3.bf16.msra.mxu0 %v1845_v9  ;;  %v1890_v3 = vld [vmem:[%s2355_s1 + $0x1c0] sm:$0xff]   ;;  %v1892_v5 = vld [vmem:[%s2355_s1 + $0x1c8] sm:$0xff]   ;;  %v1893_v6 = vld [vmem:[%s2355_s1 + $0x190] sm:$0xff]  }
  0x1c   : > { %1642 = vmatpush3.bf16.msra.mxu1 %v1846_v10  ;;  %1623 = vmatprep.subr.bf16.mxu0 %v1955_v1  ;;  %v237_v22 = vor.u32 %v236_v19, %v232_v18  ;;  %v663_v63 = vor.u32 %v662_v59, %v658_v58  ;;  %v1894_v7 = vld [vmem:[%s2355_s1 + $0x1d0] sm:$0xff]   ;;  %v1895_v8 = vld [vmem:[%s2355_s1 + $0x198] sm:$0xff]   ;;  %v1897_v10 = vld [vmem:[%s2355_s1 + $0x1a0] sm:$0xff]  }
  0x1d   : > { %1643 = vmatprep.subr.bf16.mxu1 %v1955_v1  ;;  %v1896_v9 = vld [vmem:[%s2355_s1 + $0x1d8] sm:$0xff]   ;;  %v1453_v12 = vld [vmem:[%s2052_s20 + $0x8] sm:$0x3]  ;;  %v1902_v18 = vld [vmem:[%s2355_s1 + $0x1f0] sm:$0xff]  }
  0x1e   : > { %v1900_v15 = vld [vmem:[%s2355_s1 + $0x1e8] sm:$0xff]   ;;  %v1903_v19 = vld [vmem:[%s2355_s1 + $0x1b8] sm:$0xff]   ;;  %vm1217_vm3 = vmand %vm1215_vm1, %vm1216_vm2 }
  0x1f   : > { %1624 = vmatpush3.bf16.msra.mxu0 %v1847_v13  ;;  %v1899_v13 = vld [vmem:[%s2355_s1 + $0x1a8] sm:$0xff]  }
  0x20   : > { %1644 = vmatpush3.bf16.msra.mxu1 %v1848_v14  ;;  %1625 = vmatprep.subr.bf16.mxu0 %v1955_v1  ;;  %v1494_v14 = vcombine.low %v1453_v12, %v1453_v12 }
  0x21   : > { %1645 = vmatprep.subr.bf16.mxu1 %v1955_v1 }
  0x23   : > { %1626 = vmatpush3.bf16.msra.mxu0 %v1849_v16  ;;  %v1901_v16 = vld [vmem:[%s2355_s1 + $0x1b0] sm:$0xff]  }
  0x24   : > { %1646 = vmatpush3.bf16.msra.mxu1 %v1850_v17  ;;  %1627 = vmatprep.subr.bf16.mxu0 %v1955_v1  ;;  %v999_v17 = vshll.u32 %v1494_v14, 16 }
  0x25   : > { %1647 = vmatprep.subr.bf16.mxu1 %v1955_v1 }
  0x27   : > { %1628 = vmatpush3.bf16.msra.mxu0 %v1851_v20  ;;  %v997_v20 = vshrl.u32 %v1494_v14, 16 }
  0x28   : > { %1648 = vmatpush3.bf16.msra.mxu1 %v1852_v21  ;;  %1653 = vmatprep.subr.bf16.mxu0 %v1955_v1  ;;  %v1001_v21 = vrot.slane %v999_v17, 1 }
  0x29   : > { %1673 = vmatprep.subr.bf16.mxu1 %v1955_v1 }
  0x2a   : > { %1630 = vmatmul.mubr.bf16.vlgmr.msra.gmra.mrb[0].mxu0 %v237_v22  ;;  %v1904_v22 = vld [vmem:[%s2355_s1 + $0x1f8] sm:$0xff]  }
  0x2b   : > { %1650 = vmatmul.mubr.bf16.vlgmr.msra.gmra.mrb[0].mxu1 %v194_v11  ;;  %1654 = vmatpush3.bf16.msra.mxu0 %v1854_v23  ;;  %v1898_v11 = vld [vmem:[%s2355_s1 + $0x1e0] sm:$0xff]  }
  0x2c   : > { %1674 = vmatpush3.bf16.msra.mxu1 %v1855_v24  ;;  %1655 = vmatprep.subr.bf16.mxu0 %v1955_v1  ;;  %v1906_v23 = vld [vmem:[%s2355_s1 + $0x200] sm:$0xff]   ;;  %v1002_v24 = vor.u32 %v1001_v21, %v997_v20 }
  0x2d   : > { %1675 = vmatprep.subr.bf16.mxu1 %v1955_v1  ;;  %1669 = vmatprep.mubr.msk.bf16.mxu0 %vm1956_vm0, %v1955_v1 }
  0x2e   : > { %1689 = vmatprep.mubr.msk.bf16.mxu1 %vm1956_vm0, %v1955_v1 }
  0x2f   : > { %1656 = vmatpush3.bf16.msra.mxu0 %v1856_v25  ;;  %v1907_v25 = vld [vmem:[%s2355_s1 + $0x208] sm:$0xff]  }
  0x30   : > { %1676 = vmatpush3.bf16.msra.mxu1 %v1857_v26  ;;  %1657 = vmatprep.subr.bf16.mxu0 %v1955_v1  ;;  %v1908_v26 = vld [vmem:[%s2355_s1 + $0x210] sm:$0xff]  }
  0x31   : > { %1677 = vmatprep.subr.bf16.mxu1 %v1955_v1 }
  0x33   : > { %1658 = vmatpush3.bf16.msra.mxu0 %v1858_v27  ;;  %v1909_v27 = vld [vmem:[%s2355_s1 + $0x218] sm:$0xff]  }
  0x34   : > { %1678 = vmatpush3.bf16.msra.mxu1 %v1859_v28  ;;  %1659 = vmatprep.subr.bf16.mxu0 %v1955_v1  ;;  %v1910_v28 = vld [vmem:[%s2355_s1 + $0x220] sm:$0xff]  }
  0x35   : > { %1679 = vmatprep.subr.bf16.mxu1 %v1955_v1 }
  0x37   : > { %1660 = vmatpush3.bf16.msra.mxu0 %v1860_v29  ;;  %v1911_v29 = vld [vmem:[%s2355_s1 + $0x228] sm:$0xff]  }
  0x38   : > { %1680 = vmatpush3.bf16.msra.mxu1 %v1861_v30  ;;  %1661 = vmatprep.subr.bf16.mxu0 %v1955_v1  ;;  %v1912_v30 = vld [vmem:[%s2355_s1 + $0x230] sm:$0xff]  }
  0x39   : > { %1681 = vmatprep.subr.bf16.mxu1 %v1955_v1 }
  0x3b   : > { %1662 = vmatpush3.bf16.msra.mxu0 %v1862_v31  ;;  %v1914_v31 = vld [vmem:[%s2052_s20 + $0x8] ss:$0 sps:$4 sm:$0x66]   ;;  %s1794_s20 = smul.u32 3, %s2369_s13 }
  0x3c   : > { %1682 = vmatpush3.bf16.msra.mxu1 %v1863_v32  ;;  %1663 = vmatprep.subr.bf16.mxu0 %v1955_v1  ;;  %v1913_v32 = vld [vmem:[%s2355_s1 + $0x238] sm:$0xff]  }
  0x3d   : > { %1683 = vmatprep.subr.bf16.mxu1 %v1955_v1  ;;  %s188_s8 = sadd.s32 %s1794_s20, %s2371_s12 }
  0x3e   : > { %s1315_s9 = sshll.u32 %s188_s8, 1 }
  0x3f   : > { %1664 = vmatpush3.bf16.msra.mxu0 %v1864_v33  ;;  %v1114_v33 = vrot.slane %v1914_v31, 1  ;;  %s190_s22 = scalar_lea.vmem %s2357_s3, %s1315_s9 }
  0x40   : > { %1684 = vmatpush3.bf16.msra.mxu1 %v1865_v34  ;;  %1665 = vmatprep.subr.bf16.mxu0 %v1955_v1  ;;  %v1218_v17 = vld [vmem:[%s190_s22] sm:$0x3] }
  0x41   : > { %1685 = vmatprep.subr.bf16.mxu1 %v1955_v1 }
  0x43   : > { %1666 = vmatpush3.bf16.msra.mxu0 %v1866_v35 }
  0x44   : > { %1686 = vmatpush3.bf16.msra.mxu1 %v1867_v36  ;;  %1667 = vmatprep.subr.bf16.mxu0 %v1955_v1 }
  0x45   : > { %1687 = vmatprep.subr.bf16.mxu1 %v1955_v1 }
  0x47   : > { %1668 = vmatpush3.bf16.msra.mxu0 %v1868_v38 }
  0x48   : > { %1688 = vmatpush3.bf16.msra.mxu1 %v1869_v39  ;;  %1693 = vmatprep.subr.bf16.mxu0 %v1955_v1 }
  0x49   : > { %1713 = vmatprep.subr.bf16.mxu1 %v1955_v1 }
  0x4a   : > { %1670 = vmatmul.mubr.bf16.vlgmr.msra.gmra.mrb[4].mxu0 %v436_v40 }
  0x4b   : > { %1694 = vmatpush3.bf16.msra.mxu0 %v1871_v41  ;;  %1690 = vmatmul.mubr.bf16.vlgmr.msra.gmra.mrb[4].mxu1 %v1376_v42 }
  0x4c   : > { %1714 = vmatpush3.bf16.msra.mxu1 %v1873_v43  ;;  %1695 = vmatprep.subr.bf16.mxu0 %v1955_v1 }
  0x4d   : > { %1715 = vmatprep.subr.bf16.mxu1 %v1955_v1  ;;  %1709 = vmatprep.mubr.msk.bf16.mxu0 %vm1956_vm0, %v1955_v1 }
  0x4e   : > { %1729 = vmatprep.mubr.msk.bf16.mxu1 %vm1956_vm0, %v1955_v1 }
  0x4f   : > { %1696 = vmatpush3.bf16.msra.mxu0 %v1874_v44 }
  0x50   : > { %1716 = vmatpush3.bf16.msra.mxu1 %v1875_v45  ;;  %1697 = vmatprep.subr.bf16.mxu0 %v1955_v1 }
  0x51   : > { %1717 = vmatprep.subr.bf16.mxu1 %v1955_v1 }
  0x53   : > { %1698 = vmatpush3.bf16.msra.mxu0 %v1876_v46 }
  0x54   : > { %1718 = vmatpush3.bf16.msra.mxu1 %v1877_v47  ;;  %1699 = vmatprep.subr.bf16.mxu0 %v1955_v1 }
  0x55   : > { %1719 = vmatprep.subr.bf16.mxu1 %v1955_v1 }
  0x57   : > { %1700 = vmatpush3.bf16.msra.mxu0 %v1878_v48 }
  0x58   : > { %1720 = vmatpush3.bf16.msra.mxu1 %v1879_v49  ;;  %1701 = vmatprep.subr.bf16.mxu0 %v1955_v1 }
  0x59   : > { %1721 = vmatprep.subr.bf16.mxu1 %v1955_v1 }
  0x5b   : > { %1702 = vmatpush3.bf16.msra.mxu0 %v1880_v50 }
  0x5c   : > { %1722 = vmatpush3.bf16.msra.mxu1 %v1881_v51  ;;  %1703 = vmatprep.subr.bf16.mxu0 %v1955_v1 }
  0x5d   : > { %1723 = vmatprep.subr.bf16.mxu1 %v1955_v1 }
  0x5f   : > { %1704 = vmatpush3.bf16.msra.mxu0 %v1882_v53 }
  0x60   : > { %1724 = vmatpush3.bf16.msra.mxu1 %v1883_v54  ;;  %1705 = vmatprep.subr.bf16.mxu0 %v1955_v1 }
  0x61   : > { %1725 = vmatprep.subr.bf16.mxu1 %v1955_v1 }
  0x63   : > { %1706 = vmatpush3.bf16.msra.mxu0 %v1884_v56 }
  0x64   : > { %1726 = vmatpush3.bf16.msra.mxu1 %v1885_v57  ;;  %1707 = vmatprep.subr.bf16.mxu0 %v1955_v1 }
  0x65   : > { %1727 = vmatprep.subr.bf16.mxu1 %v1955_v1 }
  0x67   : > { %1708 = vmatpush3.bf16.msra.mxu0 %v1886_v60 }
  0x68   : > { %1728 = vmatpush3.bf16.msra.mxu1 %v1887_v62  ;;  %1733 = vmatprep.subr.bf16.mxu0 %v1955_v1 }
  0x69   : > { %1753 = vmatprep.subr.bf16.mxu1 %v1955_v1 }
  0x6a   : > { %1710 = vmatmul.mubr.bf16.vlgmr.msra.gmra.mrb[8].mxu0 %v663_v63 }
  0x6b   : > { %1734 = vmatpush3.bf16.msra.mxu0 %v1888_v0  ;;  %1730 = vmatmul.mubr.bf16.vlgmr.msra.gmra.mrb[8].mxu1 %v775_v2 }
  0x6c   : > { %1754 = vmatpush3.bf16.msra.mxu1 %v1890_v3  ;;  %1735 = vmatprep.subr.bf16.mxu0 %v1955_v1 }
  0x6d   : > { %1755 = vmatprep.subr.bf16.mxu1 %v1955_v1  ;;  %1749 = vmatprep.mubr.msk.bf16.mxu0 %vm1956_vm0, %v1955_v1 }
  0x6e   : > { %1769 = vmatprep.mubr.msk.bf16.mxu1 %vm1956_vm0, %v1955_v1 }
  0x6f   : > { %1736 = vmatpush3.bf16.msra.mxu0 %v1891_v4 }
  0x70   : > { %1756 = vmatpush3.bf16.msra.mxu1 %v1892_v5  ;;  %1737 = vmatprep.subr.bf16.mxu0 %v1955_v1 }
  0x71   : > { %1757 = vmatprep.subr.bf16.mxu1 %v1955_v1 }
  0x73   : > { %1738 = vmatpush3.bf16.msra.mxu0 %v1893_v6 }
  0x74   : > { %1758 = vmatpush3.bf16.msra.mxu1 %v1894_v7  ;;  %1739 = vmatprep.subr.bf16.mxu0 %v1955_v1 }
  0x75   : > { %1759 = vmatprep.subr.bf16.mxu1 %v1955_v1 }
  0x77   : > { %1740 = vmatpush3.bf16.msra.mxu0 %v1895_v8 }
  0x78   : > { %1760 = vmatpush3.bf16.msra.mxu1 %v1896_v9  ;;  %1741 = vmatprep.subr.bf16.mxu0 %v1955_v1 }
  0x79   : > { %1761 = vmatprep.subr.bf16.mxu1 %v1955_v1 }
  0x7b   : > { %1742 = vmatpush3.bf16.msra.mxu0 %v1897_v10  ;;  %v1529_v10 = vld [vmem:[%s2356_s2] ss:$0 sm:$0xff] }
  0x7c   : > { %1762 = vmatpush3.bf16.msra.mxu1 %v1898_v11  ;;  %1743 = vmatprep.subr.bf16.mxu0 %v1955_v1 }
  0x7d   : > { %1763 = vmatprep.subr.bf16.mxu1 %v1955_v1 }
  0x7f   : > { %1744 = vmatpush3.bf16.msra.mxu0 %v1899_v13 }
  0x80   : > { %1764 = vmatpush3.bf16.msra.mxu1 %v1900_v15  ;;  %1745 = vmatprep.subr.bf16.mxu0 %v1955_v1 }
  0x81   : > { %1765 = vmatprep.subr.bf16.mxu1 %v1955_v1 }
  0x83   : > { %1746 = vmatpush3.bf16.msra.mxu0 %v1901_v16 }
  0x84   : > { %1766 = vmatpush3.bf16.msra.mxu1 %v1902_v18  ;;  %1747 = vmatprep.subr.bf16.mxu0 %v1955_v1 }
  0x85   : > { %1767 = vmatprep.subr.bf16.mxu1 %v1955_v1 }
  0x87   : > { %1748 = vmatpush3.bf16.msra.mxu0 %v1903_v19 }
  0x88   : > { %1768 = vmatpush3.bf16.msra.mxu1 %v1904_v22  ;;  %1773 = vmatprep.subr.bf16.mxu0 %v1955_v1 }
  0x8a   : > { %1750 = vmatmul.mubr.bf16.vlgmr.msra.gmra.mrb[12].mxu0 %v1453_v12 }
  0x8b   : > { %1774 = vmatpush3.bf16.msra.mxu0 %v1906_v23  ;;  %1770 = vmatmul.mubr.bf16.vlgmr.msra.gmra.mrb[12].mxu1 %v1002_v24 }
  0x8c   : > { %1775 = vmatprep.subr.bf16.mxu0 %v1955_v1  ;;  %1789 = vmatprep.mubr.msk.bf16.mxu0 %vm1956_vm0, %v1955_v1 }
  0x8f   : > { %1776 = vmatpush3.bf16.msra.mxu0 %v1907_v25 }
  0x90   : > { %1777 = vmatprep.subr.bf16.mxu0 %v1955_v1 }
  0x93   : > { %1778 = vmatpush3.bf16.msra.mxu0 %v1908_v26 }
  0x94   : > { %1779 = vmatprep.subr.bf16.mxu0 %v1955_v1 }
  0x97   : > { %1780 = vmatpush3.bf16.msra.mxu0 %v1909_v27 }
  0x98   : > { %1781 = vmatprep.subr.bf16.mxu0 %v1955_v1 }
  0x9b   : > { %1782 = vmatpush3.bf16.msra.mxu0 %v1910_v28 }
  0x9c   : > { %1783 = vmatprep.subr.bf16.mxu0 %v1955_v1 }
  0x9f   : > { %1784 = vmatpush3.bf16.msra.mxu0 %v1911_v29 }
  0xa0   : > { %1785 = vmatprep.subr.bf16.mxu0 %v1955_v1 }
  0xa3   : > { %1786 = vmatpush3.bf16.msra.mxu0 %v1912_v30 }
  0xa4   : > { %1787 = vmatprep.subr.bf16.mxu0 %v1955_v1 }
  0xa7   : > { %1788 = vmatpush3.bf16.msra.mxu0 %v1913_v32 }
  0xaa   : > { %1790 = vmatmul.mubr.bf16.vlgmr.msra.gmra.mrb[16].mxu0 %v1114_v33 }
  0xfd   : > { %v321_v34 = vpop.f32.mrb[0].mxu0 }
  0xfe   : > { %v1631_v35 = vpop.f32.mrb[1].mxu0  ;;  %v409_v36 = vpop.f32.mrb[0].mxu1 }
  0xff   : > { %v410_v37 = vadd.f32 %v409_v36, %v321_v34  ;;  %v324_v38 = vpop.f32.mrb[2].mxu0  ;;  %v1651_v39 = vpop.f32.mrb[1].mxu1 }
 0x100   : > { %v1632_v40 = vpop.f32.mrb[3].mxu0  ;;  %v412_v41 = vpop.f32.mrb[2].mxu1 }
 0x101   : > { %v1652_v42 = vpop.f32.mrb[3].mxu1 }
 0x11d   : > { %v520_v43 = vpop.f32.mrb[4].mxu0 }
 0x11e   : > { %v526_v44 = vadd.f32 %v520_v43, %v410_v37  ;;  %v1671_v45 = vpop.f32.mrb[5].mxu0  ;;  %v630_v46 = vpop.f32.mrb[4].mxu1 }
 0x11f   : > { %v523_v47 = vpop.f32.mrb[6].mxu0  ;;  %v1691_v48 = vpop.f32.mrb[5].mxu1 }
 0x120   : > { %v636_v49 = vadd.f32 %v630_v46, %v526_v44  ;;  %v1672_v1 = vpop.f32.mrb[7].mxu0  ;;  %v633_v50 = vpop.f32.mrb[6].mxu1 }
 0x121   : > { %v1692_v51 = vpop.f32.mrb[7].mxu1 }
 0x13d   : > { %v747_v52 = vpop.f32.mrb[8].mxu0 }
 0x13e   : > { %v753_v53 = vadd.f32 %v747_v52, %v636_v49  ;;  %v1711_v54 = vpop.f32.mrb[9].mxu0  ;;  %v859_v55 = vpop.f32.mrb[8].mxu1 }
 0x13f   : > { %v750_v56 = vpop.f32.mrb[10].mxu0  ;;  %v1731_v57 = vpop.f32.mrb[9].mxu1 }
 0x140   : > { %v865_v58 = vadd.f32 %v859_v55, %v753_v53  ;;  %v1712_v59 = vpop.f32.mrb[11].mxu0  ;;  %v862_v60 = vpop.f32.mrb[10].mxu1 }
 0x141   : > { %v1732_v61 = vpop.f32.mrb[11].mxu1 }
 0x15d   : > { %v969_v62 = vpop.f32.mrb[12].mxu0 }
 0x15e   : > { %v975_v63 = vadd.f32 %v969_v62, %v865_v58  ;;  %v1751_v0 = vpop.f32.mrb[13].mxu0  ;;  %v1086_v2 = vpop.f32.mrb[12].mxu1 }
 0x15f   : > { %v972_v3 = vpop.f32.mrb[14].mxu0  ;;  %v1771_v4 = vpop.f32.mrb[13].mxu1 }
 0x160   : > { %v1092_v5 = vadd.f32 %v1086_v2, %v975_v63  ;;  %v1752_v6 = vpop.f32.mrb[15].mxu0  ;;  %v1089_v7 = vpop.f32.mrb[14].mxu1 }
 0x161   : > { %v1772_v8 = vpop.f32.mrb[15].mxu1 }
 0x17d   : > { %v1198_v9 = vpop.f32.mrb[16].mxu0 }
 0x17e   : > { %v1204_v11 = vadd.f32 %v1198_v9, %v1092_v5  ;;  %v1791_v12 = vpop.f32.mrb[17].mxu0 }
 0x17f   : > { %v1201_v13 = vpop.f32.mrb[18].mxu0 }
 0x180   : > { %v1212_v14 = vadd.f32 %v1529_v10, %v1204_v11  ;;  %v1792_v15 = vpop.f32.mrb[19].mxu0 }
 0x182   : > { %v1213_v16 = vmax.f32 %v1212_v14, 0.0 }
 0x184   : > { %v1214_v18 = vpack.c.bf16 %v1213_v16, %v1213_v16 }
 0x186   : > { %v1219_v19 = vsel %vm1217_vm3, %v1214_v18, %v1218_v17 }
 0x187   : > { %1220 = vst [vmem:[%s190_s22] sm:$0x3] %v1219_v19 }
 0x188 PF: > { %s13_s16 = sadd.s32 1, %s1953_s16   ;;  %s2358_s12 = smov %s1945_s14 }
 0x189   : > { %p10_p7 = scmp.ge.s32.totalorder %s13_s16, 8   ;;  %s2359_s13 = smov %s1949_s15 }
 0x18a   : > { %s2360_s14 = smov %s2363_s17  ;;  %s2361_s15 = smov %s2367_s18 }
 0x18b   :  { %12 = sbr.rel (!%p10_p7) target bundleno = 3 (0x3), region = 73 }

// kernel: conv2d_module_forward.8
= control target key start
LH: loop header
LB: loop body
LE: loop exit
PB: predicated region body
PF: predicated region fallthrough
CT: control target
= control target key end

     0   :  { %s1492_s12 = smov 0   ;;  %s1494_s13 = smov 0   ;;  %s1795_s0 = inlined_call_operand.vmem [shape: bf16[2,576], index: 0, kind: input, shape index: {}]   ;;  %s1796_s1 = inlined_call_operand.vmem [shape: bf16[576,1024], index: 1, kind: input, shape index: {}]   ;;  %s1797_s2 = inlined_call_operand.vmem [shape: f32[1,1024], index: 2, kind: input, shape index: {}]   ;;  %s1798_s3 = inlined_call_operand.vmem [shape: bf16[2,1024], index: 3, kind: output, shape index: {}]  }
   0x1   :  { %s1496_s14 = smov 0  }
   0x2 LB: > { %s1214_s15 = sadd.s32 4294967295, %s1468_s14   ;;  %s1509_s16 = sadd.s32 1, %s1468_s14   ;;  %s1468_s14 = sphi %s1496_s14, %s1801_s14   ;;  %s1464_s13 = sphi %s1494_s13, %s1800_s13   ;;  %s1460_s12 = sphi %s1492_s12, %s1799_s12  }
   0x3   : > { %s38_s17 = ssub.s32 %s1468_s14, %s1509_s16  ;;  %s41_s18 = sadd.s32 1, %s1464_s13 }
   0x4   : > { %p39_p0 = scmp.eq.s32.totalorder %s38_s17, 0  ;;  %p48_p1 = scmp.ne.s32.totalorder %s1464_s13, %s1460_s12 }
   0x5   : > { %p49_p2 = scmp.eq.s32.totalorder %s1468_s14, 0  ;;  %p1217_p4 = scmp.ge.s32.totalorder %s1468_s14, 4 }
   0x6   : > { %s1518_s19 = scalar_select %p39_p0, %s1464_s13, %s41_s18  }
   0x7   : > { %p50_p3 = por %p49_p2, %p48_p1  ;;  %129 = sbr.rel (%p1217_p4) target bundleno = 90 (0x5a), region = 20 }
   0xe   : > { %132 = sbr.rel (!%p50_p3) target bundleno = 90 (0x5a), region = 24  ;;  %s134_s20 = sand.u32 (%p50_p3), 1, %s1464_s13  }
   0xf   : > { %s1300_s21 = sshll.u32 (%p50_p3), %s1468_s14, 3  ;;  %s1309_s22 = smul.u32 (%p50_p3), 576, %s134_s20 }
  0x10   : > { %s1526_s25 = scalar_lea.vmem (%p50_p3), %s1796_s1, %s1300_s21 }
  0x11   : > { %v309_v0 = vld [vmem:[%s1526_s25] sm:$0xff] (%p50_p3)  ;;  %s1534_s26 = scalar_lea.vmem (%p50_p3), [#allocation2], %s1309_s22 }
  0x12   : > { %v311_v1 = vld [vmem:[%s1526_s25 + $0x20] sm:$0xff] (%p50_p3)  ;;  %310 = vst [vmem:[%s1534_s26] sm:$0xff] (%p50_p3), %v309_v0 }
  0x13   : > { %v313_v2 = vld [vmem:[%s1526_s25 + $0x40] sm:$0xff] (%p50_p3)  ;;  %312 = vst [vmem:[%s1534_s26 + $0x8] sm:$0xff] (%p50_p3), %v311_v1 }
  0x14   : > { %v315_v3 = vld [vmem:[%s1526_s25 + $0x60] sm:$0xff] (%p50_p3)  ;;  %314 = vst [vmem:[%s1534_s26 + $0x10] sm:$0xff] (%p50_p3), %v313_v2 }
  0x15   : > { %v317_v4 = vld [vmem:[%s1526_s25 + $0x80] sm:$0xff]  ;;  %316 = vst [vmem:[%s1534_s26 + $0x18] sm:$0xff] %v315_v3 }
  0x16   : > { %v319_v5 = vld [vmem:[%s1526_s25 + $0xa0] sm:$0xff]  ;;  %318 = vst [vmem:[%s1534_s26 + $0x20] sm:$0xff] %v317_v4 }
  0x17   : > { %320 = vst [vmem:[%s1534_s26 + $0x28] sm:$0xff] %v319_v5  ;;  %v321_v6 = vld [vmem:[%s1526_s25 + $0xc0] sm:$0xff] }
  0x18   : > { %v323_v7 = vld [vmem:[%s1526_s25 + $0xe0] sm:$0xff]  ;;  %322 = vst [vmem:[%s1534_s26 + $0x30] sm:$0xff] %v321_v6 }
  0x19   : > { %v325_v8 = vld [vmem:[%s1526_s25 + $0x100] sm:$0xff]  ;;  %324 = vst [vmem:[%s1534_s26 + $0x38] sm:$0xff] %v323_v7 }
  0x1a   : > { %326 = vst [vmem:[%s1534_s26 + $0x40] sm:$0xff] %v325_v8  ;;  %v327_v9 = vld [vmem:[%s1526_s25 + $0x120] sm:$0xff] }
  0x1b   : > { %v329_v10 = vld [vmem:[%s1526_s25 + $0x140] sm:$0xff]  ;;  %328 = vst [vmem:[%s1534_s26 + $0x48] sm:$0xff] %v327_v9 }
  0x1c   : > { %v331_v11 = vld [vmem:[%s1526_s25 + $0x160] sm:$0xff]  ;;  %330 = vst [vmem:[%s1534_s26 + $0x50] sm:$0xff] %v329_v10 }
  0x1d   : > { %332 = vst [vmem:[%s1534_s26 + $0x58] sm:$0xff] %v331_v11  ;;  %v333_v12 = vld [vmem:[%s1526_s25 + $0x180] sm:$0xff] }
  0x1e   : > { %v335_v13 = vld [vmem:[%s1526_s25 + $0x1a0] sm:$0xff]  ;;  %334 = vst [vmem:[%s1534_s26 + $0x60] sm:$0xff] %v333_v12 }
  0x1f   : > { %v337_v14 = vld [vmem:[%s1526_s25 + $0x1c0] sm:$0xff]  ;;  %336 = vst [vmem:[%s1534_s26 + $0x68] sm:$0xff] %v335_v13 }
  0x20   : > { %338 = vst [vmem:[%s1534_s26 + $0x70] sm:$0xff] %v337_v14  ;;  %v339_v15 = vld [vmem:[%s1526_s25 + $0x1e0] sm:$0xff] }
  0x21   : > { %v341_v16 = vld [vmem:[%s1526_s25 + $0x200] sm:$0xff]  ;;  %340 = vst [vmem:[%s1534_s26 + $0x78] sm:$0xff] %v339_v15 }
  0x22   : > { %v343_v17 = vld [vmem:[%s1526_s25 + $0x220] sm:$0xff]  ;;  %342 = vst [vmem:[%s1534_s26 + $0x80] sm:$0xff] %v341_v16 }
  0x23   : > { %344 = vst [vmem:[%s1534_s26 + $0x88] sm:$0xff] %v343_v17  ;;  %v345_v18 = vld [vmem:[%s1526_s25 + $0x240] sm:$0xff] }
  0x24   : > { %v347_v19 = vld [vmem:[%s1526_s25 + $0x260] sm:$0xff]  ;;  %346 = vst [vmem:[%s1534_s26 + $0x90] sm:$0xff] %v345_v18 }
  0x25   : > { %v349_v20 = vld [vmem:[%s1526_s25 + $0x280] sm:$0xff]  ;;  %348 = vst [vmem:[%s1534_s26 + $0x98] sm:$0xff] %v347_v19 }
  0x26   : > { %350 = vst [vmem:[%s1534_s26 + $0xa0] sm:$0xff] %v349_v20  ;;  %v351_v21 = vld [vmem:[%s1526_s25 + $0x2a0] sm:$0xff] }
  0x27   : > { %v353_v22 = vld [vmem:[%s1526_s25 + $0x2c0] sm:$0xff]  ;;  %352 = vst [vmem:[%s1534_s26 + $0xa8] sm:$0xff] %v351_v21 }
  0x28   : > { %v355_v23 = vld [vmem:[%s1526_s25 + $0x2e0] sm:$0xff]  ;;  %354 = vst [vmem:[%s1534_s26 + $0xb0] sm:$0xff] %v353_v22 }
  0x29   : > { %356 = vst [vmem:[%s1534_s26 + $0xb8] sm:$0xff] %v355_v23  ;;  %v357_v24 = vld [vmem:[%s1526_s25 + $0x300] sm:$0xff] }
  0x2a   : > { %v359_v25 = vld [vmem:[%s1526_s25 + $0x320] sm:$0xff]  ;;  %358 = vst [vmem:[%s1534_s26 + $0xc0] sm:$0xff] %v357_v24 }
  0x2b   : > { %v361_v26 = vld [vmem:[%s1526_s25 + $0x340] sm:$0xff]  ;;  %360 = vst [vmem:[%s1534_s26 + $0xc8] sm:$0xff] %v359_v25 }
  0x2c   : > { %362 = vst [vmem:[%s1534_s26 + $0xd0] sm:$0xff] %v361_v26  ;;  %v363_v27 = vld [vmem:[%s1526_s25 + $0x360] sm:$0xff] }
  0x2d   : > { %v365_v28 = vld [vmem:[%s1526_s25 + $0x380] sm:$0xff]  ;;  %364 = vst [vmem:[%s1534_s26 + $0xd8] sm:$0xff] %v363_v27 }
  0x2e   : > { %v367_v29 = vld [vmem:[%s1526_s25 + $0x3a0] sm:$0xff]  ;;  %366 = vst [vmem:[%s1534_s26 + $0xe0] sm:$0xff] %v365_v28 }
  0x2f   : > { %368 = vst [vmem:[%s1534_s26 + $0xe8] sm:$0xff] %v367_v29  ;;  %v369_v30 = vld [vmem:[%s1526_s25 + $0x3c0] sm:$0xff] }
  0x30   : > { %v371_v31 = vld [vmem:[%s1526_s25 + $0x3e0] sm:$0xff]  ;;  %370 = vst [vmem:[%s1534_s26 + $0xf0] sm:$0xff] %v369_v30 }
  0x31   : > { %v373_v32 = vld [vmem:[%s1526_s25 + $0x400] sm:$0xff]  ;;  %372 = vst [vmem:[%s1534_s26 + $0xf8] sm:$0xff] %v371_v31 }
  0x32   : > { %374 = vst [vmem:[%s1534_s26 + $0x100] sm:$0xff] %v373_v32  ;;  %v375_v33 = vld [vmem:[%s1526_s25 + $0x420] sm:$0xff] }
  0x33   : > { %v377_v34 = vld [vmem:[%s1526_s25 + $0x440] sm:$0xff]  ;;  %376 = vst [vmem:[%s1534_s26 + $0x108] sm:$0xff] %v375_v33 }
  0x34   : > { %v379_v35 = vld [vmem:[%s1526_s25 + $0x460] sm:$0xff]  ;;  %378 = vst [vmem:[%s1534_s26 + $0x110] sm:$0xff] %v377_v34 }
  0x35   : > { %380 = vst [vmem:[%s1534_s26 + $0x118] sm:$0xff] %v379_v35  ;;  %v381_v36 = vld [vmem:[%s1526_s25 + $0x480] sm:$0xff] }
  0x36   : > { %v383_v37 = vld [vmem:[%s1526_s25 + $0x4a0] sm:$0xff]  ;;  %382 = vst [vmem:[%s1534_s26 + $0x120] sm:$0xff] %v381_v36 }
  0x37   : > { %v385_v38 = vld [vmem:[%s1526_s25 + $0x4c0] sm:$0xff]  ;;  %384 = vst [vmem:[%s1534_s26 + $0x128] sm:$0xff] %v383_v37 }
  0x38   : > { %386 = vst [vmem:[%s1534_s26 + $0x130] sm:$0xff] %v385_v38  ;;  %v387_v39 = vld [vmem:[%s1526_s25 + $0x4e0] sm:$0xff] }
  0x39   : > { %v389_v40 = vld [vmem:[%s1526_s25 + $0x500] sm:$0xff]  ;;  %388 = vst [vmem:[%s1534_s26 + $0x138] sm:$0xff] %v387_v39 }
  0x3a   : > { %v391_v41 = vld [vmem:[%s1526_s25 + $0x520] sm:$0xff]  ;;  %390 = vst [vmem:[%s1534_s26 + $0x140] sm:$0xff] %v389_v40 }
  0x3b   : > { %392 = vst [vmem:[%s1534_s26 + $0x148] sm:$0xff] %v391_v41  ;;  %v393_v42 = vld [vmem:[%s1526_s25 + $0x540] sm:$0xff] }
  0x3c   : > { %v395_v43 = vld [vmem:[%s1526_s25 + $0x560] sm:$0xff]  ;;  %394 = vst [vmem:[%s1534_s26 + $0x150] sm:$0xff] %v393_v42 }
  0x3d   : > { %v397_v44 = vld [vmem:[%s1526_s25 + $0x580] sm:$0xff]  ;;  %396 = vst [vmem:[%s1534_s26 + $0x158] sm:$0xff] %v395_v43 }
  0x3e   : > { %398 = vst [vmem:[%s1534_s26 + $0x160] sm:$0xff] %v397_v44  ;;  %v399_v45 = vld [vmem:[%s1526_s25 + $0x5a0] sm:$0xff] }
  0x3f   : > { %v401_v46 = vld [vmem:[%s1526_s25 + $0x5c0] sm:$0xff]  ;;  %400 = vst [vmem:[%s1534_s26 + $0x168] sm:$0xff] %v399_v45 }
  0x40   : > { %v403_v47 = vld [vmem:[%s1526_s25 + $0x5e0] sm:$0xff]  ;;  %402 = vst [vmem:[%s1534_s26 + $0x170] sm:$0xff] %v401_v46 }
  0x41   : > { %404 = vst [vmem:[%s1534_s26 + $0x178] sm:$0xff] %v403_v47  ;;  %v405_v48 = vld [vmem:[%s1526_s25 + $0x600] sm:$0xff] }
  0x42   : > { %v407_v49 = vld [vmem:[%s1526_s25 + $0x620] sm:$0xff]  ;;  %406 = vst [vmem:[%s1534_s26 + $0x180] sm:$0xff] %v405_v48 }
  0x43   : > { %v409_v50 = vld [vmem:[%s1526_s25 + $0x640] sm:$0xff]  ;;  %408 = vst [vmem:[%s1534_s26 + $0x188] sm:$0xff] %v407_v49 }
  0x44   : > { %410 = vst [vmem:[%s1534_s26 + $0x190] sm:$0xff] %v409_v50  ;;  %v411_v51 = vld [vmem:[%s1526_s25 + $0x660] sm:$0xff] }
  0x45   : > { %v413_v52 = vld [vmem:[%s1526_s25 + $0x680] sm:$0xff]  ;;  %412 = vst [vmem:[%s1534_s26 + $0x198] sm:$0xff] %v411_v51 }
  0x46   : > { %v415_v53 = vld [vmem:[%s1526_s25 + $0x6a0] sm:$0xff]  ;;  %414 = vst [vmem:[%s1534_s26 + $0x1a0] sm:$0xff] %v413_v52 }
  0x47   : > { %416 = vst [vmem:[%s1534_s26 + $0x1a8] sm:$0xff] %v415_v53  ;;  %v417_v54 = vld [vmem:[%s1526_s25 + $0x6c0] sm:$0xff] }
  0x48   : > { %v419_v55 = vld [vmem:[%s1526_s25 + $0x6e0] sm:$0xff]  ;;  %418 = vst [vmem:[%s1534_s26 + $0x1b0] sm:$0xff] %v417_v54 }
  0x49   : > { %v421_v56 = vld [vmem:[%s1526_s25 + $0x700] sm:$0xff]  ;;  %420 = vst [vmem:[%s1534_s26 + $0x1b8] sm:$0xff] %v419_v55 }
  0x4a   : > { %422 = vst [vmem:[%s1534_s26 + $0x1c0] sm:$0xff] %v421_v56  ;;  %v423_v57 = vld [vmem:[%s1526_s25 + $0x720] sm:$0xff] }
  0x4b   : > { %v425_v58 = vld [vmem:[%s1526_s25 + $0x740] sm:$0xff]  ;;  %424 = vst [vmem:[%s1534_s26 + $0x1c8] sm:$0xff] %v423_v57 }
  0x4c   : > { %v427_v59 = vld [vmem:[%s1526_s25 + $0x760] sm:$0xff]  ;;  %426 = vst [vmem:[%s1534_s26 + $0x1d0] sm:$0xff] %v425_v58 }
  0x4d   : > { %428 = vst [vmem:[%s1534_s26 + $0x1d8] sm:$0xff] %v427_v59  ;;  %v429_v60 = vld [vmem:[%s1526_s25 + $0x780] sm:$0xff] }
  0x4e   : > { %v431_v61 = vld [vmem:[%s1526_s25 + $0x7a0] sm:$0xff]  ;;  %430 = vst [vmem:[%s1534_s26 + $0x1e0] sm:$0xff] %v429_v60 }
  0x4f   : > { %v433_v62 = vld [vmem:[%s1526_s25 + $0x7c0] sm:$0xff]  ;;  %432 = vst [vmem:[%s1534_s26 + $0x1e8] sm:$0xff] %v431_v61 }
  0x50   : > { %434 = vst [vmem:[%s1534_s26 + $0x1f0] sm:$0xff] %v433_v62  ;;  %v435_v63 = vld [vmem:[%s1526_s25 + $0x7e0] sm:$0xff] }
  0x51   : > { %v437_v0 = vld [vmem:[%s1526_s25 + $0x800] sm:$0xff]  ;;  %436 = vst [vmem:[%s1534_s26 + $0x1f8] sm:$0xff] %v435_v63 }
  0x52   : > { %v439_v1 = vld [vmem:[%s1526_s25 + $0x820] sm:$0xff]  ;;  %438 = vst [vmem:[%s1534_s26 + $0x200] sm:$0xff] %v437_v0 }
  0x53   : > { %440 = vst [vmem:[%s1534_s26 + $0x208] sm:$0xff] %v439_v1  ;;  %v441_v2 = vld [vmem:[%s1526_s25 + $0x840] sm:$0xff] }
  0x54   : > { %v443_v3 = vld [vmem:[%s1526_s25 + $0x860] sm:$0xff]  ;;  %442 = vst [vmem:[%s1534_s26 + $0x210] sm:$0xff] %v441_v2 }
  0x55   : > { %v445_v4 = vld [vmem:[%s1526_s25 + $0x880] sm:$0xff]  ;;  %444 = vst [vmem:[%s1534_s26 + $0x218] sm:$0xff] %v443_v3 }
  0x56   : > { %446 = vst [vmem:[%s1534_s26 + $0x220] sm:$0xff] %v445_v4  ;;  %v447_v5 = vld [vmem:[%s1526_s25 + $0x8a0] sm:$0xff] }
  0x57   : > { %v449_v6 = vld [vmem:[%s1526_s25 + $0x8c0] sm:$0xff]  ;;  %448 = vst [vmem:[%s1534_s26 + $0x228] sm:$0xff] %v447_v5 }
  0x58   : > { %v451_v7 = vld [vmem:[%s1526_s25 + $0x8e0] sm:$0xff]  ;;  %450 = vst [vmem:[%s1534_s26 + $0x230] sm:$0xff] %v449_v6 }
  0x59   : > { %452 = vst [vmem:[%s1534_s26 + $0x238] sm:$0xff] %v451_v7 }
  0x5a PF: > { %p1220_p5 = scmp.ge.s32.totalorder %s1468_s14, 1  ;;  %p465_p6 = scmp.lt.s32.totalorder %s1468_s14, 5 }
  0x5c   : > { %p466_p7 = pnand %p1220_p5, %p465_p6 }
  0x5d   : > { %s472_s27 = sand.u32 (!%p466_p7), 1, %s1460_s12   ;;  %v585_v8 = vlaneseq (!%p466_p7)  ;;  %v1470_v9 = vmov (!%p466_p7), 1966171168   ;;  %v1682_v12 = vld [vmem:[%s1795_s0] sm:$0x1f] (!%p466_p7)  ;;  %vm999_vm0 = vcmask (!%p466_p7), 523264  }
  0x5e   : > { %469 = sbr.rel (%p466_p7) target bundleno = 401 (0x191), region = 66  ;;  %v598_v10 = vunpack.c.l.s4 (!%p466_p7), %v1470_v9  ;;  %s1221_s5 = sshll.u32 (!%p466_p7), %s1214_s15, 1 }
  0x5f   : > { %s1310_s28 = smul.u32 (!%p466_p7), 576, %s472_s27  ;;  %v1677_v11 = vshrl.u32 (!%p466_p7), %v585_v8, 7  ;;  %p500_p8 = scmp.lt.s32.totalorder (!%p466_p7), %s1221_s5, 7 }
  0x60   : > { %v599_v13 = vunpack.c.0.s8 (!%p466_p7), %v598_v10 }
  0x61   : > { %s1684_s4 = scalar_lea.vmem (!%p466_p7), [#allocation2], %s1310_s28 }
  0x62   : > { %v1337_v14 = vld [vmem:[%s1684_s4 + $0x104] ss:$8 sps:$4 sm:$0xff] (!%p466_p7)   ;;  %v1339_v15 = vld [vmem:[%s1684_s4 + $0x100] ss:$8 sps:$4 sm:$0xff] (!%p466_p7)   ;;  %v1689_v16 = vsub.s32 (!%p466_p7), %v599_v13, %v1677_v11  ;;  %v1340_v17 = vld [vmem:[%s1684_s4 + $0x114] ss:$8 sps:$4 sm:$0xff] (!%p466_p7)  }
  0x63   : > { %1044 = vmatprep.subr.bf16.mxu0 (!%p466_p7), %v1337_v14  ;;  %v1342_v18 = vld [vmem:[%s1684_s4 + $0x110] ss:$8 sps:$4 sm:$0xff] (!%p466_p7)   ;;  %v1343_v19 = vld [vmem:[%s1684_s4 + $0x124] ss:$8 sps:$4 sm:$0xff] (!%p466_p7)   ;;  %v1348_v22 = vld [vmem:[%s1684_s4] ss:$8 sps:$4 sm:$0xff] (!%p466_p7)  }
  0x64   : > { %1045 = vmatpush1.bf16.msra.mxu0 (!%p466_p7), %v1339_v15  ;;  %v1696_v20 = vrot.slane (!%p466_p7), %v1682_v12, %v1689_v16  ;;  %v1346_v21 = vld [vmem:[%s1684_s4 + $0x4] ss:$8 sps:$4 sm:$0xff] (!%p466_p7)   ;;  %v1345_v24 = vld [vmem:[%s1684_s4 + $0x120] ss:$8 sps:$4 sm:$0xff] (!%p466_p7)   ;;  %v1352_v25 = vld [vmem:[%s1684_s4 + $0x14] ss:$8 sps:$4 sm:$0xff] (!%p466_p7)  }
  0x65   : > { %1046 = vmatprep.subr.bf16.mxu0 %v1340_v17  ;;  %1003 = vmatprep.subr.bf16.mxu1 %v1346_v21  ;;  %v1354_v26 = vld [vmem:[%s1684_s4 + $0x10] ss:$8 sps:$4 sm:$0xff]   ;;  %v1349_v28 = vld [vmem:[%s1684_s4 + $0x134] ss:$8 sps:$4 sm:$0xff]   ;;  %v1358_v31 = vld [vmem:[%s1684_s4 + $0x24] ss:$8 sps:$4 sm:$0xff]  }
  0x66   : > { %v611_v23 = vcombine.high %v1696_v20, %v1696_v20  ;;  %1004 = vmatpush1.bf16.msra.mxu1 %v1348_v22  ;;  %v1351_v30 = vld [vmem:[%s1684_s4 + $0x130] ss:$8 sps:$4 sm:$0xff]   ;;  %v1355_v32 = vld [vmem:[%s1684_s4 + $0x144] ss:$8 sps:$4 sm:$0xff]   ;;  %v1360_v33 = vld [vmem:[%s1684_s4 + $0x20] ss:$8 sps:$4 sm:$0xff]  }
  0x67   : > { %1005 = vmatprep.subr.bf16.mxu1 %v1352_v25  ;;  %v1364_v34 = vld [vmem:[%s1684_s4 + $0x34] ss:$8 sps:$4 sm:$0xff]   ;;  %v1357_v35 = vld [vmem:[%s1684_s4 + $0x140] ss:$8 sps:$4 sm:$0xff]   ;;  %v1366_v37 = vld [vmem:[%s1684_s4 + $0x30] ss:$8 sps:$4 sm:$0xff]  }
  0x68   : > { %1047 = vmatpush1.bf16.msra.mxu0 %v1342_v18  ;;  %v632_v27 = vrot.slane %v611_v23, %v1689_v16  ;;  %v1361_v36 = vld [vmem:[%s1684_s4 + $0x154] ss:$8 sps:$4 sm:$0xff]   ;;  %v1370_v38 = vld [vmem:[%s1684_s4 + $0x44] ss:$8 sps:$4 sm:$0xff]   ;;  %v1363_v39 = vld [vmem:[%s1684_s4 + $0x150] ss:$8 sps:$4 sm:$0xff]   ;;  %v618_v18 = vrot.slane %v1696_v20, %v1689_v16 }
  0x69   : > { %1048 = vmatprep.subr.bf16.mxu0 %v1343_v19  ;;  %v1367_v40 = vld [vmem:[%s1684_s4 + $0x164] ss:$8 sps:$4 sm:$0xff]   ;;  %v1372_v41 = vld [vmem:[%s1684_s4 + $0x40] ss:$8 sps:$4 sm:$0xff]   ;;  %v1376_v42 = vld [vmem:[%s1684_s4 + $0x54] ss:$8 sps:$4 sm:$0xff]  }
  0x6a   : > { %v634_v29 = vcombine.high %v632_v27, %v632_v27  ;;  %1035 = vmatprep.mubr.bf16.mxu1 %v632_v27  ;;  %1006 = vmatpush1.bf16.msra.mxu1 %v1354_v26  ;;  %v1369_v43 = vld [vmem:[%s1684_s4 + $0x160] ss:$8 sps:$4 sm:$0xff]   ;;  %v1373_v44 = vld [vmem:[%s1684_s4 + $0x174] ss:$8 sps:$4 sm:$0xff]   ;;  %v1378_v45 = vld [vmem:[%s1684_s4 + $0x50] ss:$8 sps:$4 sm:$0xff]  }
  0x6b   : > { %1007 = vmatprep.subr.bf16.mxu1 %v1358_v31  ;;  %v1382_v46 = vld [vmem:[%s1684_s4 + $0x64] ss:$8 sps:$4 sm:$0xff]   ;;  %v1375_v47 = vld [vmem:[%s1684_s4 + $0x170] ss:$8 sps:$4 sm:$0xff]   ;;  %v1384_v49 = vld [vmem:[%s1684_s4 + $0x60] ss:$8 sps:$4 sm:$0xff]  }
  0x6c   : > { %1049 = vmatpush1.bf16.msra.mxu0 %v1345_v24  ;;  %1076 = vmatprep.mubr.bf16.mxu0 %v634_v29  ;;  %v1379_v48 = vld [vmem:[%s1684_s4 + $0x184] ss:$8 sps:$4 sm:$0xff]   ;;  %v1388_v50 = vld [vmem:[%s1684_s4 + $0x74] ss:$8 sps:$4 sm:$0xff]   ;;  %v1381_v51 = vld [vmem:[%s1684_s4 + $0x180] ss:$8 sps:$4 sm:$0xff]   ;;  %v633_v24 = vcombine.high %v618_v18, %v618_v18 }
  0x6d   : > { %1050 = vmatprep.subr.bf16.mxu0 %v1349_v28  ;;  %v1385_v52 = vld [vmem:[%s1684_s4 + $0x194] ss:$8 sps:$4 sm:$0xff]   ;;  %v1390_v53 = vld [vmem:[%s1684_s4 + $0x70] ss:$8 sps:$4 sm:$0xff]   ;;  %v1394_v54 = vld [vmem:[%s1684_s4 + $0x84] ss:$8 sps:$4 sm:$0xff]  }
  0x6e   : > { %1008 = vmatpush1.bf16.msra.mxu1 %v1360_v33  ;;  %v1387_v55 = vld [vmem:[%s1684_s4 + $0x190] ss:$8 sps:$4 sm:$0xff]   ;;  %v1391_v56 = vld [vmem:[%s1684_s4 + $0x1a4] ss:$8 sps:$4 sm:$0xff]   ;;  %v1396_v57 = vld [vmem:[%s1684_s4 + $0x80] ss:$8 sps:$4 sm:$0xff]  }
  0x6f   : > { %1009 = vmatprep.subr.bf16.mxu1 %v1364_v34  ;;  %v1400_v58 = vld [vmem:[%s1684_s4 + $0x94] ss:$8 sps:$4 sm:$0xff]   ;;  %v1393_v59 = vld [vmem:[%s1684_s4 + $0x1a0] ss:$8 sps:$4 sm:$0xff]   ;;  %v1402_v61 = vld [vmem:[%s1684_s4 + $0x90] ss:$8 sps:$4 sm:$0xff]  }
  0x70   : > { %1051 = vmatpush1.bf16.msra.mxu0 %v1351_v30  ;;  %v1397_v60 = vld [vmem:[%s1684_s4 + $0x1b4] ss:$8 sps:$4 sm:$0xff]   ;;  %v1406_v62 = vld [vmem:[%s1684_s4 + $0xa4] ss:$8 sps:$4 sm:$0xff]   ;;  %v1399_v63 = vld [vmem:[%s1684_s4 + $0x1b0] ss:$8 sps:$4 sm:$0xff]   ;;  %v596_v30 = vcombine.high %v1682_v12, %v1682_v12 }
  0x71   : > { %1052 = vmatprep.subr.bf16.mxu0 %v1355_v32  ;;  %v1403_v0 = vld [vmem:[%s1684_s4 + $0x1c4] ss:$8 sps:$4 sm:$0xff]   ;;  %v1408_v1 = vld [vmem:[%s1684_s4 + $0xa0] ss:$8 sps:$4 sm:$0xff]   ;;  %v1412_v2 = vld [vmem:[%s1684_s4 + $0xb4] ss:$8 sps:$4 sm:$0xff]  }
  0x72   : > { %1010 = vmatpush1.bf16.msra.mxu1 %v1366_v37  ;;  %v1405_v3 = vld [vmem:[%s1684_s4 + $0x1c0] ss:$8 sps:$4 sm:$0xff]   ;;  %v1414_v4 = vld [vmem:[%s1684_s4 + $0xb0] ss:$8 sps:$4 sm:$0xff]   ;;  %v1409_v5 = vld [vmem:[%s1684_s4 + $0x1d4] ss:$8 sps:$4 sm:$0xff]   ;;  %v610_v33 = vrot.slane %v596_v30, %v1689_v16 }
  0x73   : > { %1011 = vmatprep.subr.bf16.mxu1 %v1370_v38  ;;  %v1418_v6 = vld [vmem:[%s1684_s4 + $0xc4] ss:$8 sps:$4 sm:$0xff]   ;;  %v1411_v7 = vld [vmem:[%s1684_s4 + $0x1d0] ss:$8 sps:$4 sm:$0xff]   ;;  %v1420_v8 = vld [vmem:[%s1684_s4 + $0xc0] ss:$8 sps:$4 sm:$0xff]  }
  0x74   : > { %1053 = vmatpush1.bf16.msra.mxu0 %v1357_v35  ;;  %v1415_v9 = vld [vmem:[%s1684_s4 + $0x1e4] ss:$8 sps:$4 sm:$0xff]   ;;  %v1424_v10 = vld [vmem:[%s1684_s4 + $0xd4] ss:$8 sps:$4 sm:$0xff]   ;;  %v1417_v13 = vld [vmem:[%s1684_s4 + $0x1e0] ss:$8 sps:$4 sm:$0xff]   ;;  %v625_v35 = vrot.slane %v610_v33, %v1689_v16 }
  0x75   : > { %1054 = vmatprep.subr.bf16.mxu0 %v1361_v36  ;;  %v1426_v14 = vld [vmem:[%s1684_s4 + $0xd0] ss:$8 sps:$4 sm:$0xff]   ;;  %v1421_v15 = vld [vmem:[%s1684_s4 + $0x1f4] ss:$8 sps:$4 sm:$0xff]   ;;  %v1431_v17 = vld [vmem:[%s1684_s4 + $0xe4] ss:$8 sps:$4 sm:$0xff]  }
  0x76   : > { %1012 = vmatpush1.bf16.msra.mxu1 %v1372_v41  ;;  %v1423_v19 = vld [vmem:[%s1684_s4 + $0x1f0] ss:$8 sps:$4 sm:$0xff]   ;;  %v1433_v21 = vld [vmem:[%s1684_s4 + $0xe0] ss:$8 sps:$4 sm:$0xff]   ;;  %v1430_v22 = vld [vmem:[%s1684_s4 + $0x204] ss:$8 sps:$4 sm:$0xff]  }
  0x77   : > { %1013 = vmatprep.subr.bf16.mxu1 %v1376_v42  ;;  %v1437_v23 = vld [vmem:[%s1684_s4 + $0xf4] ss:$8 sps:$4 sm:$0xff]   ;;  %v1428_v25 = vld [vmem:[%s1684_s4 + $0x200] ss:$8 sps:$4 sm:$0xff]   ;;  %v1439_v26 = vld [vmem:[%s1684_s4 + $0xf0] ss:$8 sps:$4 sm:$0xff]  }
  0x78   : > { %1055 = vmatpush1.bf16.msra.mxu0 %v1363_v39  ;;  %v1436_v27 = vld [vmem:[%s1684_s4 + $0x214] ss:$8 sps:$4 sm:$0xff]   ;;  %v1434_v20 = vld [vmem:[%s1684_s4 + $0x210] ss:$8 sps:$4 sm:$0xff]   ;;  %v1442_v28 = vld [vmem:[%s1684_s4 + $0x224] ss:$8 sps:$4 sm:$0xff]  }
  0x79   : > { %1056 = vmatprep.subr.bf16.mxu0 %v1367_v40  ;;  %v1471_v29 = vmov 0   ;;  %v1440_v31 = vld [vmem:[%s1684_s4 + $0x220] ss:$8 sps:$4 sm:$0xff]   ;;  %v1445_v32 = vld [vmem:[%s1684_s4 + $0x234] ss:$8 sps:$4 sm:$0xff]   ;;  %s1803_s5 = smov (!%p500_p8, %s1221_s5), 7 }
  0x7a   : > { %1014 = vmatpush1.bf16.msra.mxu1 %v1378_v45  ;;  %v1443_v34 = vld [vmem:[%s1684_s4 + $0x230] ss:$8 sps:$4 sm:$0xff]   ;;  %s502_s8 = scalar_lea.vmem %s1797_s2, %s1803_s5  ;;  %v587_v36 = vsub.s32 0, %v1677_v11  ;;  %v591_v39 = vsub.s32 1, %v1677_v11  ;;  %s507_s11 = scalar_lea.vmem %s1798_s3, %s1803_s5 }
  0x7b   : > { %1015 = vmatprep.subr.bf16.mxu1 %v1382_v46  ;;  %v583_v38 = vld [vmem:[%s502_s8] sm:$0x3] }
  0x7c   : > { %1057 = vmatpush1.bf16.msra.mxu0 %v1369_v43  ;;  %v588_v42 = vrot.slane %v583_v38, %v587_v36  ;;  %v592_v43 = vrot.slane %v583_v38, %v591_v39 }
  0x7d   : > { %1058 = vmatprep.subr.bf16.mxu0 %v1373_v44 }
  0x7e   : > { %1016 = vmatpush1.bf16.msra.mxu1 %v1384_v49 }
  0x7f   : > { %1017 = vmatprep.subr.bf16.mxu1 %v1388_v50 }
  0x80   : > { %1059 = vmatpush1.bf16.msra.mxu0 %v1375_v47 }
  0x81   : > { %1060 = vmatprep.subr.bf16.mxu0 %v1379_v48 }
  0x82   : > { %1018 = vmatpush1.bf16.msra.mxu1 %v1390_v53 }
  0x83   : > { %1019 = vmatprep.subr.bf16.mxu1 %v1394_v54 }
  0x84   : > { %1061 = vmatpush1.bf16.msra.mxu0 %v1381_v51 }
  0x85   : > { %1062 = vmatprep.subr.bf16.mxu0 %v1385_v52 }
  0x86   : > { %1020 = vmatpush1.bf16.msra.mxu1 %v1396_v57 }
  0x87   : > { %1021 = vmatprep.subr.bf16.mxu1 %v1400_v58 }
  0x88   : > { %1063 = vmatpush1.bf16.msra.mxu0 %v1387_v55 }
  0x89   : > { %1064 = vmatprep.subr.bf16.mxu0 %v1391_v56 }
  0x8a   : > { %1022 = vmatpush1.bf16.msra.mxu1 %v1402_v61 }
  0x8b   : > { %1023 = vmatprep.subr.bf16.mxu1 %v1406_v62 }
  0x8c   : > { %1065 = vmatpush1.bf16.msra.mxu0 %v1393_v59 }
  0x8d   : > { %1066 = vmatprep.subr.bf16.mxu0 %v1397_v60 }
  0x8e   : > { %1024 = vmatpush1.bf16.msra.mxu1 %v1408_v1 }
  0x8f   : > { %1025 = vmatprep.subr.bf16.mxu1 %v1412_v2 }
  0x90   : > { %1067 = vmatpush1.bf16.msra.mxu0 %v1399_v63 }
  0x91   : > { %1068 = vmatprep.subr.bf16.mxu0 %v1403_v0 }
  0x92   : > { %1026 = vmatpush1.bf16.msra.mxu1 %v1414_v4 }
  0x93   : > { %1027 = vmatprep.subr.bf16.mxu1 %v1418_v6 }
  0x94   : > { %1069 = vmatpush1.bf16.msra.mxu0 %v1405_v3 }
  0x95   : > { %1070 = vmatprep.subr.bf16.mxu0 %v1409_v5 }
  0x96   : > { %1028 = vmatpush1.bf16.msra.mxu1 %v1420_v8 }
  0x97   : > { %1029 = vmatprep.subr.bf16.mxu1 %v1424_v10 }
  0x98   : > { %1071 = vmatpush1.bf16.msra.mxu0 %v1411_v7 }
  0x99   : > { %1072 = vmatprep.subr.bf16.mxu0 %v1415_v9 }
  0x9a   : > { %1030 = vmatpush1.bf16.msra.mxu1 %v1426_v14 }
  0x9b   : > { %1031 = vmatprep.subr.bf16.mxu1 %v1431_v17 }
  0x9c   : > { %1073 = vmatpush1.bf16.msra.mxu0 %v1417_v13 }
  0x9d   : > { %1074 = vmatprep.subr.bf16.mxu0 %v1421_v15 }
  0x9e   : > { %1032 = vmatpush1.bf16.msra.mxu1 %v1433_v21 }
  0x9f   : > { %1033 = vmatprep.subr.bf16.mxu1 %v1437_v23 }
  0xa0   : > { %1075 = vmatpush1.bf16.msra.mxu0 %v1423_v19 }
  0xa1   : > { %1085 = vmatprep.subr.bf16.mxu0 %v1430_v22 }
  0xa2   : > { %1034 = vmatpush1.bf16.msra.mxu1 %v1439_v26 }
  0xa3   : > { %1077 = vmatmul.mubr.bf16.vlgmr.msra.gmra.mrb[0].mxu0 %v633_v24 }
  0xa4   : > { %1086 = vmatpush1.bf16.msra.mxu0 %v1428_v25  ;;  %1117 = vmatprep.mubr.bf16.mxu0 %v1471_v29 }
  0xa5   : > { %1087 = vmatprep.subr.bf16.mxu0 %v1436_v27  ;;  %1036 = vmatmul.mubr.bf16.vlgmr.msra.gmra.mrb[0].mxu1 %v618_v18 }
  0xa8   : > { %1088 = vmatpush1.bf16.msra.mxu0 %v1434_v20 }
  0xa9   : > { %1089 = vmatprep.subr.bf16.mxu0 %v1442_v28 }
  0xac   : > { %1090 = vmatpush1.bf16.msra.mxu0 %v1440_v31 }
  0xad   : > { %1091 = vmatprep.subr.bf16.mxu0 %v1445_v32 }
  0xb0   : > { %1092 = vmatpush1.bf16.msra.mxu0 %v1443_v34 }
  0xb3   : > { %1295 = vmatmul.mubr.msk.bf16.vlgmr.msra.gmra.mrb[0].mxu0 %vm999_vm0, %v625_v35 }
 0x178   : > { %v1037_v12 = vpop.f32.mrb[0].mxu1 }
 0x179   : > { %v1039_v37 = vpop.f32.mrb[1].mxu1  ;;  %v1038_v44 = vadd.f32 %v1037_v12, %v588_v42 }
 0x17a   : > { %v1041_v40 = vpop.f32.mrb[2].mxu1  ;;  %v1040_v45 = vadd.f32 %v1039_v37, %v592_v43 }
 0x17b   : > { %v1042_v41 = vpop.f32.mrb[3].mxu1 }
 0x186   : > { %v1119_v46 = vpop.f32.mrb[0].mxu0 }
 0x187   : > { %v1302_v47 = vadd.f32 %v1119_v46, %v1038_v44  ;;  %v1121_v48 = vpop.f32.mrb[1].mxu0 }
 0x188   : > { %v1304_v49 = vadd.f32 %v1121_v48, %v1040_v45  ;;  %v1123_v50 = vpop.f32.mrb[2].mxu0 }
 0x189   : > { %v1126_v51 = vmax.f32 %v1302_v47, 0.0  ;;  %v1124_v52 = vpop.f32.mrb[3].mxu0 }
 0x18a   : > { %v1127_v53 = vmax.f32 %v1304_v49, 0.0 }
 0x18c   : > { %v1296_v54 = vpack.c.bf16 %v1127_v53, %v1126_v51 }
 0x18e   : > { %v1139_v11 = vrot.slane %v1296_v54, %v1689_v16 }
 0x190   : > { %1297 = vst.sshfl [vmem:[%s507_s11] sm:$0x5 pattern:$0x73625140] %v1139_v11 }
 0x191 PF: > { %p10_p9 = scmp.ge.s32.totalorder %s1509_s16, 6   ;;  %s1799_s12 = smov %s1464_s13 }
 0x192   : > { %s1800_s13 = smov %s1518_s19  ;;  %s1801_s14 = smov %s1509_s16 }
 0x193   :  { %12 = sbr.rel (!%p10_p9) target bundleno = 2 (0x2), region = 108 }

// kernel: conv2d_module_forward.9
= control target key start
LH: loop header
LB: loop body
LE: loop exit
PB: predicated region body
PF: predicated region fallthrough
CT: control target
= control target key end

     0   :  { %v157_v28 = vlaneseq  ;;  %v1014_v36 = vmov 1966171168   ;;  %s1259_s0 = inlined_call_operand.vmem [shape: bf16[2,1024], index: 0, kind: input, shape index: {}]   ;;  %s1260_s1 = inlined_call_operand.vmem [shape: bf16[1024,10], index: 1, kind: input, shape index: {}]   ;;  %s1261_s2 = inlined_call_operand.vmem [shape: f32[1,10], index: 2, kind: input, shape index: {}]   ;;  %s1262_s3 = inlined_call_operand.hbm [shape: f32[2,10], index: 3, kind: output, shape index: {}]  }
   0x1   :  { %v925_v0 = vld [vmem:[%s1260_s1 + $0x40] sm:$0xff]   ;;  %v929_v4 = vld [vmem:[%s1260_s1 + $0x48] sm:$0xff]   ;;  %v933_v8 = vld [vmem:[%s1260_s1 + $0x50] sm:$0xff]   ;;  %v155_v37 = vunpack.c.l.s4 %v1014_v36 }
   0x2   :  { %v926_v1 = vld [vmem:[%s1260_s1 + $0xc0] sm:$0xff]   ;;  %835 = vmatprep.subr.bf16.mxu0 %v925_v0  ;;  %v930_v5 = vld [vmem:[%s1260_s1 + $0xc8] sm:$0xff]   ;;  %v934_v9 = vld [vmem:[%s1260_s1 + $0xd0] sm:$0xff]   ;;  %v158_v33 = vshrl.u32 %v157_v28, 7 }
   0x3   :  { %v927_v2 = vld [vmem:[%s1260_s1] sm:$0xff]   ;;  %857 = vmatprep.subr.bf16.mxu1 %v926_v1  ;;  %v931_v6 = vld [vmem:[%s1260_s1 + $0x8] sm:$0xff]   ;;  %v935_v10 = vld [vmem:[%s1260_s1 + $0x10] sm:$0xff]   ;;  %v156_v40 = vunpack.c.0.s8 %v155_v37 }
   0x4   :  { %v928_v3 = vld [vmem:[%s1260_s1 + $0x80] sm:$0xff]   ;;  %836 = vmatpush3.bf16.msra.mxu0 %v927_v2  ;;  %v932_v7 = vld [vmem:[%s1260_s1 + $0x88] sm:$0xff]   ;;  %v936_v11 = vld [vmem:[%s1260_s1 + $0x90] sm:$0xff]  }
   0x5   :  { %858 = vmatpush3.bf16.msra.mxu1 %v928_v3  ;;  %837 = vmatprep.subr.bf16.mxu0 %v929_v4  ;;  %v937_v12 = vld [vmem:[%s1260_s1 + $0x58] sm:$0xff]   ;;  %v941_v16 = vld [vmem:[%s1260_s1 + $0x60] sm:$0xff]   ;;  %v945_v20 = vld [vmem:[%s1260_s1 + $0x68] sm:$0xff]   ;;  %v1141_v41 = vsub.s32 %v156_v40, %v158_v33 }
   0x6   :  { %859 = vmatprep.subr.bf16.mxu1 %v930_v5  ;;  %v938_v13 = vld [vmem:[%s1260_s1 + $0xd8] sm:$0xff]   ;;  %v942_v17 = vld [vmem:[%s1260_s1 + $0xe0] sm:$0xff]   ;;  %v946_v21 = vld [vmem:[%s1260_s1 + $0xe8] sm:$0xff]  }
   0x7   :  { %v939_v14 = vld [vmem:[%s1260_s1 + $0x18] sm:$0xff]   ;;  %v943_v18 = vld [vmem:[%s1260_s1 + $0x20] sm:$0xff]   ;;  %v947_v22 = vld [vmem:[%s1260_s1 + $0x28] sm:$0xff]  }
   0x8   :  { %838 = vmatpush3.bf16.msra.mxu0 %v931_v6  ;;  %v940_v15 = vld [vmem:[%s1260_s1 + $0x98] sm:$0xff]   ;;  %v944_v19 = vld [vmem:[%s1260_s1 + $0xa0] sm:$0xff]   ;;  %v948_v23 = vld [vmem:[%s1260_s1 + $0xa8] sm:$0xff]  }
   0x9   :  { %860 = vmatpush3.bf16.msra.mxu1 %v932_v7  ;;  %839 = vmatprep.subr.bf16.mxu0 %v933_v8  ;;  %v949_v24 = vld [vmem:[%s1260_s1 + $0x70] sm:$0xff]   ;;  %v953_v29 = vld [vmem:[%s1260_s1 + $0x78] sm:$0xff]   ;;  %v16_v34 = vld [vmem:[%s1259_s0] sm:$0xff] }
   0xa   :  { %861 = vmatprep.subr.bf16.mxu1 %v934_v9  ;;  %v950_v25 = vld [vmem:[%s1260_s1 + $0xf0] sm:$0xff]   ;;  %v954_v30 = vld [vmem:[%s1260_s1 + $0xf8] sm:$0xff]   ;;  %v958_v35 = vld [vmem:[%s1260_s1 + $0x140] sm:$0xff]   ;;  %v153_v39 = vcombine.high %v16_v34, %v16_v34  ;;  %v160_v42 = vrot.slane %v16_v34, %v1141_v41 }
   0xb   :  { %v951_v26 = vld [vmem:[%s1260_s1 + $0x30] sm:$0xff]   ;;  %v955_v31 = vld [vmem:[%s1260_s1 + $0x38] sm:$0xff]   ;;  %v959_v38 = vld [vmem:[%s1260_s1 + $0x1c0] sm:$0xff]  }
   0xc   :  { %840 = vmatpush3.bf16.msra.mxu0 %v935_v10  ;;  %v952_v27 = vld [vmem:[%s1260_s1 + $0xb0] sm:$0xff]   ;;  %v956_v32 = vld [vmem:[%s1260_s1 + $0xb8] sm:$0xff]   ;;  %v1145_v43 = vrot.slane %v153_v39, %v1141_v41  ;;  %v168_v44 = vcombine.high %v160_v42, %v160_v42  ;;  %v176_v45 = vrot.slane %v160_v42, %v1141_v41  ;;  %v960_v48 = vld [vmem:[%s1260_s1 + $0x100] sm:$0xff]  }
   0xd   :  { %862 = vmatpush3.bf16.msra.mxu1 %v936_v11  ;;  %841 = vmatprep.subr.bf16.mxu0 %v937_v12  ;;  %v962_v51 = vld [vmem:[%s1260_s1 + $0x148] sm:$0xff]   ;;  %v961_v53 = vld [vmem:[%s1260_s1 + $0x180] sm:$0xff]   ;;  %v966_v57 = vld [vmem:[%s1260_s1 + $0x150] sm:$0xff]  }
   0xe   :  { %863 = vmatprep.subr.bf16.mxu1 %v938_v13  ;;  %v169_v46 = vcombine.high %v1145_v43, %v1145_v43  ;;  %v190_v47 = vrot.slane %v168_v44, %v1141_v41  ;;  %v198_v50 = vcombine.high %v176_v45, %v176_v45  ;;  %v963_v54 = vld [vmem:[%s1260_s1 + $0x1c8] sm:$0xff]   ;;  %v967_v59 = vld [vmem:[%s1260_s1 + $0x1d0] sm:$0xff]   ;;  %v970_v61 = vld [vmem:[%s1260_s1 + $0x158] sm:$0xff]  }
   0xf   :  { %v964_v56 = vld [vmem:[%s1260_s1 + $0x108] sm:$0xff]   ;;  %v968_v60 = vld [vmem:[%s1260_s1 + $0x110] sm:$0xff]   ;;  %v971_v63 = vld [vmem:[%s1260_s1 + $0x1d8] sm:$0xff]  }
  0x10   :  { %842 = vmatpush3.bf16.msra.mxu0 %v939_v14  ;;  %v197_v49 = vrot.slane %v169_v46, %v1141_v41  ;;  %626 = vmatprep.mubr.bf16.mxu0 %v190_v47  ;;  %v200_v52 = vcombine.high %v190_v47, %v190_v47  ;;  %v965_v58 = vld [vmem:[%s1260_s1 + $0x188] sm:$0xff]   ;;  %v969_v62 = vld [vmem:[%s1260_s1 + $0x190] sm:$0xff]   ;;  %v972_v0 = vld [vmem:[%s1260_s1 + $0x118] sm:$0xff]  }
  0x11   :  { %864 = vmatpush3.bf16.msra.mxu1 %v940_v15  ;;  %843 = vmatprep.subr.bf16.mxu0 %v941_v16  ;;  %v974_v1 = vld [vmem:[%s1260_s1 + $0x160] sm:$0xff]   ;;  %v973_v2 = vld [vmem:[%s1260_s1 + $0x198] sm:$0xff]   ;;  %v978_v5 = vld [vmem:[%s1260_s1 + $0x168] sm:$0xff]  }
  0x12   :  { %865 = vmatprep.subr.bf16.mxu1 %v942_v17  ;;  %v201_v55 = vcombine.high %v197_v49, %v197_v49  ;;  %666 = vmatprep.mubr.bf16.mxu1 %v200_v52  ;;  %v975_v3 = vld [vmem:[%s1260_s1 + $0x1e0] sm:$0xff]   ;;  %v979_v7 = vld [vmem:[%s1260_s1 + $0x1e8] sm:$0xff]   ;;  %v982_v9 = vld [vmem:[%s1260_s1 + $0x170] sm:$0xff]  }
  0x13   :  { %v976_v4 = vld [vmem:[%s1260_s1 + $0x120] sm:$0xff]   ;;  %v980_v8 = vld [vmem:[%s1260_s1 + $0x128] sm:$0xff]  }
  0x14   :  { %844 = vmatpush3.bf16.msra.mxu0 %v943_v18  ;;  %v977_v6 = vld [vmem:[%s1260_s1 + $0x1a0] sm:$0xff]  }
  0x15   :  { %866 = vmatpush3.bf16.msra.mxu1 %v944_v19  ;;  %845 = vmatprep.subr.bf16.mxu0 %v945_v20 }
  0x16   :  { %867 = vmatprep.subr.bf16.mxu1 %v946_v21 }
  0x18   :  { %846 = vmatpush3.bf16.msra.mxu0 %v947_v22 }
  0x19   :  { %868 = vmatpush3.bf16.msra.mxu1 %v948_v23  ;;  %847 = vmatprep.subr.bf16.mxu0 %v949_v24 }
  0x1a   :  { %869 = vmatprep.subr.bf16.mxu1 %v950_v25 }
  0x1c   :  { %848 = vmatpush3.bf16.msra.mxu0 %v951_v26 }
  0x1d   :  { %870 = vmatpush3.bf16.msra.mxu1 %v952_v27  ;;  %849 = vmatprep.subr.bf16.mxu0 %v953_v29 }
  0x1e   :  { %871 = vmatprep.subr.bf16.mxu1 %v954_v30 }
  0x20   :  { %850 = vmatpush3.bf16.msra.mxu0 %v955_v31 }
  0x21   :  { %872 = vmatpush3.bf16.msra.mxu1 %v956_v32  ;;  %879 = vmatprep.subr.bf16.mxu0 %v958_v35 }
  0x22   :  { %901 = vmatprep.subr.bf16.mxu1 %v959_v38 }
  0x23   :  { %627 = vmatmul.mubr.bf16.vlgmr.msra.gmra.mrb[0].mxu0 %v176_v45 }
  0x24   :  { %880 = vmatpush3.bf16.msra.mxu0 %v960_v48  ;;  %667 = vmatmul.mubr.bf16.vlgmr.msra.gmra.mrb[0].mxu1 %v198_v50 }
  0x25   :  { %881 = vmatprep.subr.bf16.mxu0 %v962_v51  ;;  %902 = vmatpush3.bf16.msra.mxu1 %v961_v53 }
  0x26   :  { %706 = vmatprep.mubr.bf16.mxu0 %v197_v49  ;;  %903 = vmatprep.subr.bf16.mxu1 %v963_v54 }
  0x27   :  { %746 = vmatprep.mubr.bf16.mxu1 %v201_v55 }
  0x28   :  { %882 = vmatpush3.bf16.msra.mxu0 %v964_v56 }
  0x29   :  { %883 = vmatprep.subr.bf16.mxu0 %v966_v57  ;;  %904 = vmatpush3.bf16.msra.mxu1 %v965_v58 }
  0x2a   :  { %905 = vmatprep.subr.bf16.mxu1 %v967_v59 }
  0x2c   :  { %884 = vmatpush3.bf16.msra.mxu0 %v968_v60 }
  0x2d   :  { %885 = vmatprep.subr.bf16.mxu0 %v970_v61  ;;  %906 = vmatpush3.bf16.msra.mxu1 %v969_v62 }
  0x2e   :  { %907 = vmatprep.subr.bf16.mxu1 %v971_v63 }
  0x30   :  { %886 = vmatpush3.bf16.msra.mxu0 %v972_v0 }
  0x31   :  { %887 = vmatprep.subr.bf16.mxu0 %v974_v1  ;;  %908 = vmatpush3.bf16.msra.mxu1 %v973_v2 }
  0x32   :  { %909 = vmatprep.subr.bf16.mxu1 %v975_v3 }
  0x34   :  { %888 = vmatpush3.bf16.msra.mxu0 %v976_v4 }
  0x35   :  { %889 = vmatprep.subr.bf16.mxu0 %v978_v5 }
  0x36   :  { %8 = vsyncpa [#allocation3], 0  ;;  %910 = vmatpush3.bf16.msra.mxu1 %v977_v6  ;;  %v981_v10 = vld [vmem:[%s1260_s1 + $0x1a8] sm:$0xff]   ;;  %v983_v11 = vld [vmem:[%s1260_s1 + $0x1f0] sm:$0xff]   ;;  %v183_v17 = vrot.slane %v1145_v43, %v1141_v41  ;;  %vm754_vm0 = vcmask 74752  }
  0x37   :  { %911 = vmatprep.subr.bf16.mxu1 %v979_v7  ;;  %v984_v12 = vld [vmem:[%s1260_s1 + $0x130] sm:$0xff]   ;;  %v986_v13 = vld [vmem:[%s1260_s1 + $0x178] sm:$0xff]   ;;  %v770_v21 = vld [vmem:[%s1261_s2] ss:$0 sm:$0xff] }
  0x38   :  { %890 = vmatpush3.bf16.msra.mxu0 %v980_v8  ;;  %v985_v14 = vld [vmem:[%s1260_s1 + $0x1b0] sm:$0xff]   ;;  %v987_v15 = vld [vmem:[%s1260_s1 + $0x1f8] sm:$0xff]   ;;  %v199_v19 = vcombine.high %v183_v17, %v183_v17 }
  0x39   :  { %891 = vmatprep.subr.bf16.mxu0 %v982_v9  ;;  %v988_v16 = vld [vmem:[%s1260_s1 + $0x138] sm:$0xff]  }
  0x3a   :  { %912 = vmatpush3.bf16.msra.mxu1 %v981_v10  ;;  %v989_v18 = vld [vmem:[%s1260_s1 + $0x1b8] sm:$0xff]   ;;  %s1015_s1 = smov [#allocation2]  }
  0x3b   :  { %913 = vmatprep.subr.bf16.mxu1 %v983_v11  ;;  %s762_s2 = sshll.u32 %s1015_s1, 4  ;;  %s763_s2 = int_to_ptr.vmem [resolvable:$true] %s762_s2 }
  0x3c   :  { %892 = vmatpush3.bf16.msra.mxu0 %v984_v12  ;;  %s990_s6 = scalar_lea.vmem %s763_s2, 32  ;;  %p995_p1 = scmp.lt.s32.totalorder %s763_s2, %s763_s2 }
  0x3d   :  { %893 = vmatprep.subr.bf16.mxu0 %v986_v13  ;;  %p991_p0 = scmp.ne.s32.totalorder %s763_s2, %s990_s6  ;;  %p996_p2 = scmp.lt.s32.totalorder %s990_s6, %s990_s6 }
  0x3e   :  { %914 = vmatpush3.bf16.msra.mxu1 %v985_v14 }
  0x3f   :  { %915 = vmatprep.subr.bf16.mxu1 %v987_v15  ;;  %p997_p3 = por %p996_p2, %p995_p1 }
  0x40   :  { %894 = vmatpush3.bf16.msra.mxu0 %v988_v16 }
  0x41   :  { %p998_p4 = pnand %p997_p3, %p991_p0 }
  0x42   :  { %916 = vmatpush3.bf16.msra.mxu1 %v989_v18 }
  0x43   :  { %707 = vmatmul.mubr.bf16.vlgmr.msra.gmra.mrb[4].mxu0 %v183_v17 }
  0x45   :  { %747 = vmatmul.mubr.bf16.vlgmr.msra.gmra.mrb[4].mxu1 %v199_v19 }
  0xf6   :  { %v851_v20 = vpop.f32.mrb[0].mxu0 }
  0xf7   :  { %v852_v22 = vpop.f32.mrb[1].mxu0  ;;  %v873_v23 = vpop.f32.mrb[0].mxu1 }
  0xf8   :  { %v853_v24 = vadd.f32 %v852_v22, %v851_v20  ;;  %v854_v25 = vpop.f32.mrb[2].mxu0  ;;  %v874_v26 = vpop.f32.mrb[1].mxu1 }
  0xf9   :  { %v855_v27 = vpop.f32.mrb[3].mxu0  ;;  %v875_v29 = vadd.f32 %v874_v26, %v873_v23  ;;  %v876_v30 = vpop.f32.mrb[2].mxu1 }
  0xfa   :  { %v629_v28 = vadd.f32 %v853_v24, %v770_v21  ;;  %v877_v31 = vpop.f32.mrb[3].mxu1 }
  0xfc   :  { %v669_v32 = vadd.f32 %v875_v29, %v629_v28 }
 0x116   :  { %v895_v33 = vpop.f32.mrb[4].mxu0 }
 0x117   :  { %v896_v34 = vpop.f32.mrb[5].mxu0 }
 0x118   :  { %v917_v35 = vpop.f32.mrb[4].mxu1  ;;  %v897_v36 = vadd.f32 %v896_v34, %v895_v33  ;;  %v898_v37 = vpop.f32.mrb[6].mxu0 }
 0x119   :  { %v918_v38 = vpop.f32.mrb[5].mxu1  ;;  %v899_v39 = vpop.f32.mrb[7].mxu0 }
 0x11a   :  { %v709_v40 = vadd.f32 %v897_v36, %v669_v32  ;;  %v919_v41 = vadd.f32 %v918_v38, %v917_v35  ;;  %v920_v42 = vpop.f32.mrb[6].mxu1 }
 0x11b   :  { %v921_v43 = vpop.f32.mrb[7].mxu1 }
 0x11c   :  { %v749_v44 = vadd.f32 %v919_v41, %v709_v40 }
 0x11e   :  { %755 = vst.msk [vmem:[#allocation2] sm:$0x3] %vm754_vm0, %v749_v44 }
 0x11f   :  { %1001 = shalt.err (!%p998_p4)
}
 0x120   :  { %s1002_s9 = scalar_lea.hbm %s1262_s3, 32 }
 0x121   :  { %p1003_p5 = scmp.ne.s32.totalorder %s1262_s3, %s1002_s9  ;;  %p1006_p6 = scmp.lt.u32.totalorder %s1002_s9, %s1262_s3 }
 0x123   :  { %p1008_p7 = pnand %p1006_p6, %p1003_p5 }
 0x125   :  { %1011 = shalt.err (!%p1008_p7)
}
 0x126   :  { %765 = dma.vmem_to_hbm [thread:$0]  %s763_s2, 32, %s1262_s3, [#allocation3]  }
 0x127   :  { %1012 = dma.done.wait [#allocation3], 32  }
 0x128   :  { %1013 = vsyncadd [#allocation3], 4294967264 }
 0x129   :  { %769 = vsyncpa [#allocation3], 1 }

</bundles_post_ra>
